<compile_context>
chip_gen: v5e
topology: v5e:2x2
jax: 0.10.0
libtpu: 0.0.40
codegen_flags: <defaults>
</compile_context>

<pallas_src>
import jax
import jax.numpy as jnp
from jax.experimental import pallas as pl
from jax.experimental.pallas import tpu as pltpu

LANE = 128
SUBLANE = 8


def _round_up(x, m):
    return (x + m - 1) // m * m


def fusion_kernel(t_ref, a_ref, v_ref,
                  w1t_ref, w1a_ref, w1v_ref, b1_ref,
                  w2_ref, b2_ref, w3_ref, b3_ref,
                  o_ref):
    """One (tm, :) batch tile of the fusion MLP (concat folded into layer 1)."""
    # Layer 1: Linear(text_dim + audio_dim + video_dim -> 512) + ReLU.
    # f32 -> bf16 cast happens here (cheap VPU op hidden under the MXU).
    t = t_ref[...].astype(jnp.bfloat16)
    a = a_ref[...].astype(jnp.bfloat16)
    v = v_ref[...].astype(jnp.bfloat16)
    acc = jnp.dot(t, w1t_ref[...], preferred_element_type=jnp.float32)
    acc = acc + jnp.dot(a, w1a_ref[...], preferred_element_type=jnp.float32)
    acc = acc + jnp.dot(v, w1v_ref[...], preferred_element_type=jnp.float32)
    h1 = jnp.maximum(acc + b1_ref[...], 0.0)
    # TODO(synk): Dropout(0.5) omitted — eval/inference semantics (identity).

    # Layer 2: Linear(512 -> 256) + ReLU.
    h2 = jnp.dot(h1.astype(jnp.bfloat16), w2_ref[...],
                 preferred_element_type=jnp.float32) + b2_ref[...]
    h2 = jnp.maximum(h2, 0.0)
    # TODO(synk): Dropout(0.3) omitted — eval/inference semantics (identity).

    # Layer 3: Linear(256 -> num_emotions), lane-padded to 128 output columns.
    out = jnp.dot(h2.astype(jnp.bfloat16), w3_ref[...],
                  preferred_element_type=jnp.float32) + b3_ref[...]
    o_ref[...] = out.astype(o_ref.dtype)


def prepare_params(params, text_dim, audio_dim, video_dim):
    """One-time weight prep: bf16 cast, split w1 per modality, lane-pad layer 3."""
    # TODO(synk): on v7x, fp8 (e4m3) weights with per-channel scales folded
    # into the bias would halve weight DMA again; kept bf16 for portability.
    w1, b1, w2, b2, w3, b3 = params
    num_emotions = w3.shape[1]
    n_pad = _round_up(num_emotions, LANE)

    w1 = w1.astype(jnp.bfloat16)
    w1t = w1[:text_dim]
    w1a = w1[text_dim:text_dim + audio_dim]
    w1v = w1[text_dim + audio_dim:]
    w2b = w2.astype(jnp.bfloat16)
    w3p = jnp.zeros((w3.shape[0], n_pad), jnp.bfloat16)
    w3p = w3p.at[:, :num_emotions].set(w3.astype(jnp.bfloat16))
    b3p = jnp.zeros((1, n_pad), jnp.float32)
    b3p = b3p.at[:, :num_emotions].set(b3.astype(jnp.float32))
    return (w1t, w1a, w1v, b1.astype(jnp.float32),
            w2b, b2.astype(jnp.float32), w3p, b3p, num_emotions)


def multimodal_fusion(text_features, audio_features, video_features, prepared):
    """Forward pass of MultiModalFusion (eval mode)."""
    (w1t, w1a, w1v, b1, w2, b2, w3p, b3p, num_emotions) = prepared
    text_dim, h1_dim = w1t.shape
    audio_dim = w1a.shape[0]
    video_dim = w1v.shape[0]
    h2_dim = w2.shape[1]
    n_pad = w3p.shape[1]

    batch = text_features.shape[0]
    # Batch tiling:
    #  * batch <= 128: single tile, rounded up to a sublane multiple.
    #  * large batch: up to 512-row tiles; tm chosen so grid_m >= 2, which lets
    #    dimension_semantics=("parallel",) shard the batch axis across the two
    #    v7x TensorCores while still amortizing the resident-weight DMA.
    if batch <= 128:
        tm = _round_up(max(batch, 1), SUBLANE)
    else:
        tm = min(512, _round_up(pl.cdiv(batch, 2), SUBLANE))
    grid_m = pl.cdiv(batch, tm)
    rows = grid_m * tm  # kernel-visible output rows (tail rows are garbage)

    t = text_features.astype(jnp.float32)
    a = audio_features.astype(jnp.float32)
    v = video_features.astype(jnp.float32)

    def row_spec(d):
        return pl.BlockSpec((tm, d), lambda i: (i, 0))

    def const_spec(r, c):
        return pl.BlockSpec((r, c), lambda i: (0, 0))

    d_in = text_dim + audio_dim + video_dim
    bytes_accessed = (
        2 * d_in * h1_dim                 # w1 (bf16)
        + 2 * h1_dim * h2_dim             # w2 (bf16)
        + 2 * h2_dim * n_pad              # w3 (bf16, lane-padded)
        + 4 * (h1_dim + h2_dim + n_pad)   # biases (f32)
        + 4 * batch * d_in                # activations in (f32)
        + 2 * rows * n_pad                # output (bf16, lane-padded)
    )
    flops = 2 * rows * (d_in * h1_dim + h1_dim * h2_dim + h2_dim * n_pad)

    out = pl.pallas_call(
        fusion_kernel,
        out_shape=jax.ShapeDtypeStruct((rows, n_pad), jnp.bfloat16),
        grid=(grid_m,),
        in_specs=[
            row_spec(text_dim), row_spec(audio_dim), row_spec(video_dim),
            const_spec(text_dim, h1_dim), const_spec(audio_dim, h1_dim),
            const_spec(video_dim, h1_dim), const_spec(1, h1_dim),
            const_spec(h1_dim, h2_dim), const_spec(1, h2_dim),
            const_spec(h2_dim, n_pad), const_spec(1, n_pad),
        ],
        out_specs=pl.BlockSpec((tm, n_pad), lambda i: (i, 0)),
        compiler_params=pltpu.CompilerParams(
            dimension_semantics=("parallel",),
            # 512-row tiles + resident weights + f32 intermediates ~ 15 MiB;
            # 32 MiB clears v5e's 16 MiB default without over-reserving v7x.
            vmem_limit_bytes=32 * 1024 * 1024),
        cost_estimate=pl.CostEstimate(
            flops=flops, transcendentals=0, bytes_accessed=bytes_accessed),
    )(t, a, v, w1t, w1a, w1v, b1, w2, b2, w3p, b3p)

    return out[:batch, :num_emotions].astype(jnp.float32)


def init_params(key, text_dim=768, audio_dim=512, video_dim=512, num_emotions=7):
    d_in = text_dim + audio_dim + video_dim
    k1, k2, k3, k4, k5, k6 = jax.random.split(key, 6)
    # Deterministic synthetic init (scaled normal); weights stored (in, out).
    w1 = jax.random.normal(k1, (d_in, 512), jnp.float32) * (1.0 / d_in ** 0.5)
    b1 = jax.random.normal(k2, (1, 512), jnp.float32) * 0.01
    w2 = jax.random.normal(k3, (512, 256), jnp.float32) * (1.0 / 512 ** 0.5)
    b2 = jax.random.normal(k4, (1, 256), jnp.float32) * 0.01
    w3 = jax.random.normal(k5, (256, num_emotions), jnp.float32) * (1.0 / 256 ** 0.5)
    b3 = jax.random.normal(k6, (1, num_emotions), jnp.float32) * 0.01
    return (w1, b1, w2, b2, w3, b3)


if __name__ == "__main__":
    key = jax.random.PRNGKey(0)
    kp, kt, ka, kv = jax.random.split(key, 4)

    batch = 8
    text_dim, audio_dim, video_dim, num_emotions = 768, 512, 512, 7

    params = init_params(kp, text_dim, audio_dim, video_dim, num_emotions)
    prepared = prepare_params(params, text_dim, audio_dim, video_dim)

    text_features = jax.random.normal(kt, (batch, text_dim), jnp.float32)
    audio_features = jax.random.normal(ka, (batch, audio_dim), jnp.float32)
    video_features = jax.random.normal(kv, (batch, video_dim), jnp.float32)

    out = multimodal_fusion(text_features, audio_features, video_features, prepared)
    out = jax.block_until_ready(out)

    # Pure-JAX reference with the same quantization scheme (bf16 weights/acts,
    # f32 accumulation, bf16 output round-trip; eval-mode dropout = identity).
    w1, b1, w2, b2, w3, b3 = params
    xb = jnp.concatenate(
        [text_features.astype(jnp.bfloat16),
         audio_features.astype(jnp.bfloat16),
         video_features.astype(jnp.bfloat16)], axis=1)
    h1 = jnp.maximum(
        jnp.dot(xb, w1.astype(jnp.bfloat16),
                preferred_element_type=jnp.float32) + b1, 0.0)
    h2 = jnp.maximum(
        jnp.dot(h1.astype(jnp.bfloat16), w2.astype(jnp.bfloat16),
                preferred_element_type=jnp.float32) + b2, 0.0)
    ref = (jnp.dot(h2.astype(jnp.bfloat16), w3.astype(jnp.bfloat16),
                   preferred_element_type=jnp.float32) + b3)
    ref = ref.astype(jnp.bfloat16).astype(jnp.float32)

    assert out.shape == (batch, num_emotions)
    assert jnp.allclose(out, ref, atol=2e-2, rtol=2e-2)

    print("KERNEL_OK")
</pallas_src>

<mosaic_0001>
module attributes {stable_mosaic.version = 11 : i64} {
  func.func @fusion_kernel(%arg0: i32, %arg1: memref<8x768xf32, #tpu.memory_space<vmem>>, %arg2: memref<8x512xf32, #tpu.memory_space<vmem>>, %arg3: memref<8x512xf32, #tpu.memory_space<vmem>>, %arg4: memref<768x512xbf16, #tpu.memory_space<vmem>>, %arg5: memref<512x512xbf16, #tpu.memory_space<vmem>>, %arg6: memref<512x512xbf16, #tpu.memory_space<vmem>>, %arg7: memref<1x512xf32, #tpu.memory_space<vmem>>, %arg8: memref<512x256xbf16, #tpu.memory_space<vmem>>, %arg9: memref<1x256xf32, #tpu.memory_space<vmem>>, %arg10: memref<256x128xbf16, #tpu.memory_space<vmem>>, %arg11: memref<1x128xf32, #tpu.memory_space<vmem>>, %arg12: memref<8x128xbf16, #tpu.memory_space<vmem>>) attributes {dimension_semantics = [#tpu.dimension_semantics<parallel>], iteration_bounds = array<i64: 1>, scalar_prefetch = 0 : i64, scratch_operands = 0 : i64, tpu.core_type = #tpu.core_type<tc>, window_params = [{transform_indices = @transform_0, window_bounds = array<i64: 8, 768>}, {transform_indices = @transform_1, window_bounds = array<i64: 8, 512>}, {transform_indices = @transform_2, window_bounds = array<i64: 8, 512>}, {pipeline_mode = #tpu.pipeline_mode<synchronous>, transform_indices = @transform_3, window_bounds = array<i64: 768, 512>}, {pipeline_mode = #tpu.pipeline_mode<synchronous>, transform_indices = @transform_4, window_bounds = array<i64: 512, 512>}, {pipeline_mode = #tpu.pipeline_mode<synchronous>, transform_indices = @transform_5, window_bounds = array<i64: 512, 512>}, {pipeline_mode = #tpu.pipeline_mode<synchronous>, transform_indices = @transform_6, window_bounds = array<i64: 1, 512>}, {pipeline_mode = #tpu.pipeline_mode<synchronous>, transform_indices = @transform_7, window_bounds = array<i64: 512, 256>}, {pipeline_mode = #tpu.pipeline_mode<synchronous>, transform_indices = @transform_8, window_bounds = array<i64: 1, 256>}, {pipeline_mode = #tpu.pipeline_mode<synchronous>, transform_indices = @transform_9, window_bounds = array<i64: 256, 128>}, {pipeline_mode = #tpu.pipeline_mode<synchronous>, transform_indices = @transform_10, window_bounds = array<i64: 1, 128>}, {transform_indices = @transform_11, window_bounds = array<i64: 8, 128>}]} {
    %c0 = arith.constant 0 : index
    %c0_0 = arith.constant 0 : index
    %0 = vector.load %arg1[%c0, %c0_0] : memref<8x768xf32, #tpu.memory_space<vmem>>, vector<8x768xf32>
    %1 = arith.truncf %0 : vector<8x768xf32> to vector<8x768xbf16>
    %c0_1 = arith.constant 0 : index
    %c0_2 = arith.constant 0 : index
    %2 = vector.load %arg2[%c0_1, %c0_2] : memref<8x512xf32, #tpu.memory_space<vmem>>, vector<8x512xf32>
    %3 = arith.truncf %2 : vector<8x512xf32> to vector<8x512xbf16>
    %c0_3 = arith.constant 0 : index
    %c0_4 = arith.constant 0 : index
    %4 = vector.load %arg3[%c0_3, %c0_4] : memref<8x512xf32, #tpu.memory_space<vmem>>, vector<8x512xf32>
    %5 = arith.truncf %4 : vector<8x512xf32> to vector<8x512xbf16>
    %c0_5 = arith.constant 0 : index
    %c0_6 = arith.constant 0 : index
    %6 = vector.load %arg4[%c0_5, %c0_6] : memref<768x512xbf16, #tpu.memory_space<vmem>>, vector<768x512xbf16>
    %cst = arith.constant dense<0.000000e+00> : vector<8x512xf32>
    %7 = tpu.matmul %1, %6, %cst {dimension_numbers = #tpu.dot_dimension_numbers<[1], [0], [0], [1], [0, 0, 1, 1], [], []>} : vector<8x768xbf16>, vector<768x512xbf16>, vector<8x512xf32> -> vector<8x512xf32>
    %c0_7 = arith.constant 0 : index
    %c0_8 = arith.constant 0 : index
    %8 = vector.load %arg5[%c0_7, %c0_8] : memref<512x512xbf16, #tpu.memory_space<vmem>>, vector<512x512xbf16>
    %cst_9 = arith.constant dense<0.000000e+00> : vector<8x512xf32>
    %9 = tpu.matmul %3, %8, %cst_9 {dimension_numbers = #tpu.dot_dimension_numbers<[1], [0], [0], [1], [0, 0, 1, 1], [], []>} : vector<8x512xbf16>, vector<512x512xbf16>, vector<8x512xf32> -> vector<8x512xf32>
    %10 = arith.addf %7, %9 : vector<8x512xf32>
    %c0_10 = arith.constant 0 : index
    %c0_11 = arith.constant 0 : index
    %11 = vector.load %arg6[%c0_10, %c0_11] : memref<512x512xbf16, #tpu.memory_space<vmem>>, vector<512x512xbf16>
    %cst_12 = arith.constant dense<0.000000e+00> : vector<8x512xf32>
    %12 = tpu.matmul %5, %11, %cst_12 {dimension_numbers = #tpu.dot_dimension_numbers<[1], [0], [0], [1], [0, 0, 1, 1], [], []>} : vector<8x512xbf16>, vector<512x512xbf16>, vector<8x512xf32> -> vector<8x512xf32>
    %13 = arith.addf %10, %12 : vector<8x512xf32>
    %c0_13 = arith.constant 0 : index
    %c0_14 = arith.constant 0 : index
    %14 = vector.load %arg7[%c0_13, %c0_14] : memref<1x512xf32, #tpu.memory_space<vmem>>, vector<1x512xf32>
    %15 = vector.broadcast %14 : vector<1x512xf32> to vector<8x512xf32>
    %16 = arith.addf %13, %15 : vector<8x512xf32>
    %cst_15 = arith.constant 0.000000e+00 : f32
    %17 = vector.broadcast %cst_15 : f32 to vector<8x512xf32>
    %18 = arith.maximumf %16, %17 : vector<8x512xf32>
    %19 = arith.truncf %18 : vector<8x512xf32> to vector<8x512xbf16>
    %c0_16 = arith.constant 0 : index
    %c0_17 = arith.constant 0 : index
    %20 = vector.load %arg8[%c0_16, %c0_17] : memref<512x256xbf16, #tpu.memory_space<vmem>>, vector<512x256xbf16>
    %cst_18 = arith.constant dense<0.000000e+00> : vector<8x256xf32>
    %21 = tpu.matmul %19, %20, %cst_18 {dimension_numbers = #tpu.dot_dimension_numbers<[1], [0], [0], [1], [0, 0, 1, 1], [], []>} : vector<8x512xbf16>, vector<512x256xbf16>, vector<8x256xf32> -> vector<8x256xf32>
    %c0_19 = arith.constant 0 : index
    %c0_20 = arith.constant 0 : index
    %22 = vector.load %arg9[%c0_19, %c0_20] : memref<1x256xf32, #tpu.memory_space<vmem>>, vector<1x256xf32>
    %23 = vector.broadcast %22 : vector<1x256xf32> to vector<8x256xf32>
    %24 = arith.addf %21, %23 : vector<8x256xf32>
    %cst_21 = arith.constant 0.000000e+00 : f32
    %25 = vector.broadcast %cst_21 : f32 to vector<8x256xf32>
    %26 = arith.maximumf %24, %25 : vector<8x256xf32>
    %27 = arith.truncf %26 : vector<8x256xf32> to vector<8x256xbf16>
    %c0_22 = arith.constant 0 : index
    %c0_23 = arith.constant 0 : index
    %28 = vector.load %arg10[%c0_22, %c0_23] : memref<256x128xbf16, #tpu.memory_space<vmem>>, vector<256x128xbf16>
    %cst_24 = arith.constant dense<0.000000e+00> : vector<8x128xf32>
    %29 = tpu.matmul %27, %28, %cst_24 {dimension_numbers = #tpu.dot_dimension_numbers<[1], [0], [0], [1], [0, 0, 1, 1], [], []>} : vector<8x256xbf16>, vector<256x128xbf16>, vector<8x128xf32> -> vector<8x128xf32>
    %c0_25 = arith.constant 0 : index
    %c0_26 = arith.constant 0 : index
    %30 = vector.load %arg11[%c0_25, %c0_26] : memref<1x128xf32, #tpu.memory_space<vmem>>, vector<1x128xf32>
    %31 = vector.broadcast %30 : vector<1x128xf32> to vector<8x128xf32>
    %32 = arith.addf %29, %31 : vector<8x128xf32>
    %33 = arith.truncf %32 : vector<8x128xf32> to vector<8x128xbf16>
    %c0_27 = arith.constant 0 : index
    %c0_28 = arith.constant 0 : index
    %34 = vector.load %arg12[%c0_27, %c0_28] : memref<8x128xbf16, #tpu.memory_space<vmem>>, vector<8x128xbf16>
    tpu.vector_store %arg12[%c0_27, %c0_28], %33 {strides = array<i32>} : memref<8x128xbf16, #tpu.memory_space<vmem>>, vector<8x128xbf16>,
    return
  }
  func.func @transform_0(%arg0: i32) -> (i32, i32) {
    %c0_i32 = arith.constant 0 : i32
    %c0_i32_0 = arith.constant 0 : i32
    return %arg0, %c0_i32 : i32, i32
  }
  func.func @transform_1(%arg0: i32) -> (i32, i32) {
    %c0_i32 = arith.constant 0 : i32
    %c0_i32_0 = arith.constant 0 : i32
    return %arg0, %c0_i32 : i32, i32
  }
  func.func @transform_2(%arg0: i32) -> (i32, i32) {
    %c0_i32 = arith.constant 0 : i32
    %c0_i32_0 = arith.constant 0 : i32
    return %arg0, %c0_i32 : i32, i32
  }
  func.func @transform_3(%arg0: i32) -> (i32, i32) {
    %c0_i32 = arith.constant 0 : i32
    %c0_i32_0 = arith.constant 0 : i32
    %c0_i32_1 = arith.constant 0 : i32
    return %c0_i32, %c0_i32_0 : i32, i32
  }
  func.func @transform_4(%arg0: i32) -> (i32, i32) {
    %c0_i32 = arith.constant 0 : i32
    %c0_i32_0 = arith.constant 0 : i32
    %c0_i32_1 = arith.constant 0 : i32
    return %c0_i32, %c0_i32_0 : i32, i32
  }
  func.func @transform_5(%arg0: i32) -> (i32, i32) {
    %c0_i32 = arith.constant 0 : i32
    %c0_i32_0 = arith.constant 0 : i32
    %c0_i32_1 = arith.constant 0 : i32
    return %c0_i32, %c0_i32_0 : i32, i32
  }
  func.func @transform_6(%arg0: i32) -> (i32, i32) {
    %c0_i32 = arith.constant 0 : i32
    %c0_i32_0 = arith.constant 0 : i32
    %c0_i32_1 = arith.constant 0 : i32
    return %c0_i32, %c0_i32_0 : i32, i32
  }
  func.func @transform_7(%arg0: i32) -> (i32, i32) {
    %c0_i32 = arith.constant 0 : i32
    %c0_i32_0 = arith.constant 0 : i32
    %c0_i32_1 = arith.constant 0 : i32
    return %c0_i32, %c0_i32_0 : i32, i32
  }
  func.func @transform_8(%arg0: i32) -> (i32, i32) {
    %c0_i32 = arith.constant 0 : i32
    %c0_i32_0 = arith.constant 0 : i32
    %c0_i32_1 = arith.constant 0 : i32
    return %c0_i32, %c0_i32_0 : i32, i32
  }
  func.func @transform_9(%arg0: i32) -> (i32, i32) {
    %c0_i32 = arith.constant 0 : i32
    %c0_i32_0 = arith.constant 0 : i32
    %c0_i32_1 = arith.constant 0 : i32
    return %c0_i32, %c0_i32_0 : i32, i32
  }
  func.func @transform_10(%arg0: i32) -> (i32, i32) {
    %c0_i32 = arith.constant 0 : i32
    %c0_i32_0 = arith.constant 0 : i32
    %c0_i32_1 = arith.constant 0 : i32
    return %c0_i32, %c0_i32_0 : i32, i32
  }
  func.func @transform_11(%arg0: i32) -> (i32, i32) {
    %c0_i32 = arith.constant 0 : i32
    %c0_i32_0 = arith.constant 0 : i32
    return %arg0, %c0_i32 : i32, i32
  }
}

</mosaic_0001>

<bundles_post_ra>
// kernel: tpu_custom_call.1
= control target key start
LH: loop header
LB: loop body
LE: loop exit
PB: predicated region body
PF: predicated region fallthrough
CT: control target
= control target key end

     0   :  { %16 = vsyncpa [#allocation3], 0  ;;  %s7434_s0 = inlined_call_operand.hbm [shape: f32[8,768], index: 0, kind: input, shape index: {}]   ;;  %s7435_s1 = inlined_call_operand.hbm [shape: f32[8,512], index: 1, kind: input, shape index: {}]   ;;  %s7436_s2 = inlined_call_operand.hbm [shape: f32[8,512], index: 2, kind: input, shape index: {}]   ;;  %s7437_s3 = inlined_call_operand.hbm [shape: bf16[768,512], index: 3, kind: input, shape index: {}]   ;;  %s7438_s4 = inlined_call_operand.hbm [shape: bf16[512,512], index: 4, kind: input, shape index: {}]   ;;  %s7439_s5 = inlined_call_operand.hbm [shape: bf16[512,512], index: 5, kind: input, shape index: {}]   ;;  %s7440_s6 = inlined_call_operand.vmem [shape: f32[1,512], index: 6, kind: input, shape index: {}]   ;;  %s7441_s7 = inlined_call_operand.hbm [shape: bf16[512,256], index: 7, kind: input, shape index: {}]   ;;  %s7442_s8 = inlined_call_operand.vmem [shape: f32[1,256], index: 8, kind: input, shape index: {}]   ;;  %s7443_s9 = inlined_call_operand.hbm [shape: bf16[256,128], index: 9, kind: input, shape index: {}]   ;;  %s7444_s10 = inlined_call_operand.vmem [shape: f32[1,128], index: 10, kind: input, shape index: {}]   ;;  %s7445_s11 = inlined_call_operand.hbm [shape: bf16[8,128], index: 11, kind: output, shape index: {}]  }
   0x1   :  { %17 = vsyncpa [#allocation6], 0 }
   0x2   :  { %18 = vsyncpa [#allocation9], 0 }
   0x3   :  { %19 = vsyncpa [#allocation12], 0 }
   0x4   :  { %20 = vsyncpa [#allocation15], 0  ;;  %s38_s19 = sshll.u32 %s7435_s1, 4  ;;  %s39_s19 = int_to_ptr.hbm [resolvable:$true] %s38_s19 }
   0x5   :  { %21 = vsyncpa [#allocation4], 0  ;;  %s7191_s20 = smov [#allocation5]   ;;  %s59_s24 = sshll.u32 %s7437_s3, 4  ;;  %s60_s24 = int_to_ptr.hbm [resolvable:$true] %s59_s24 }
   0x6   :  { %s40_s21 = sshll.u32 %s7191_s20, 4  ;;  %s7192_s25 = smov [#allocation8]   ;;  %s41_s21 = int_to_ptr.vmem [resolvable:$true] %s40_s21 }
   0x7   :  { %43 = dma.hbm_to_vmem [thread:$0]  %s39_s19, 512, %s41_s21, [#allocation6]  }
   0x8   :  { %s61_s26 = sshll.u32 %s7192_s25, 4  ;;  %s7193_s27 = smov 256   ;;  %s62_s26 = int_to_ptr.vmem [resolvable:$true] %s61_s26 }
   0x9   :  { %s7194_s28 = smov 16   ;;  %s85_s30 = sshll.u32 %s7439_s5, 4  ;;  %s86_s30 = int_to_ptr.hbm [resolvable:$true] %s85_s30 }
   0xa   :  { %67 = dma.hbm_to_vmem [thread:$0]  %s60_s24, 24576, %s62_s26, [#allocation9], %s7193_s27, %s7193_s27, %s7194_s28  }
   0xb   :  { %s7195_s12 = smov [#allocation11]   ;;  %s27_s15 = sshll.u32 %s7434_s0, 4  ;;  %s28_s15 = int_to_ptr.hbm [resolvable:$true] %s27_s15 }
   0xc   :  { %s87_s13 = sshll.u32 %s7195_s12, 4  ;;  %s7196_s16 = smov [#allocation2]   ;;  %s88_s13 = int_to_ptr.vmem [resolvable:$true] %s87_s13 }
   0xd   :  { %93 = dma.hbm_to_vmem [thread:$0]  %s86_s30, 16384, %s88_s13, [#allocation12], %s7193_s27, %s7193_s27, %s7194_s28  }
   0xe   :  { %s29_s17 = sshll.u32 %s7196_s16, 4  ;;  %s49_s20 = sshll.u32 %s7436_s2, 4  ;;  %s30_s17 = int_to_ptr.vmem [resolvable:$true] %s29_s17  ;;  %s50_s20 = int_to_ptr.hbm [resolvable:$true] %s49_s20 }
   0xf   :  { %32 = dma.hbm_to_vmem [thread:$0]  %s28_s15, 768, %s30_s17, [#allocation3]  }
  0x10   :  { %s72_s22 = sshll.u32 %s7438_s4, 4  ;;  %s7197_s23 = smov [#allocation7]   ;;  %s73_s22 = int_to_ptr.hbm [resolvable:$true] %s72_s22 }
  0x11   :  { %s51_s0 = sshll.u32 %s7197_s23, 4  ;;  %s7198_s24 = smov [#allocation10]   ;;  %s52_s0 = int_to_ptr.vmem [resolvable:$true] %s51_s0 }
  0x12   :  { %54 = dma.hbm_to_vmem [thread:$0]  %s50_s20, 512, %s52_s0, [#allocation6]  }
  0x13   :  { %s74_s25 = sshll.u32 %s7198_s24, 4  ;;  %s100_s29 = sshll.u32 %s7441_s7, 4  ;;  %s75_s25 = int_to_ptr.vmem [resolvable:$true] %s74_s25  ;;  %s101_s29 = int_to_ptr.hbm [resolvable:$true] %s100_s29 }
  0x14   :  { %80 = dma.hbm_to_vmem [thread:$0]  %s73_s22, 16384, %s75_s25, [#allocation9], %s7193_s27, %s7193_s27, %s7194_s28  }
  0x15   :  { %s7199_s2 = smov [#allocation13]   ;;  %s115_s13 = sshll.u32 %s7443_s9, 4  ;;  %s116_s13 = int_to_ptr.hbm [resolvable:$true] %s115_s13 }
  0x16   :  { %s102_s30 = sshll.u32 %s7199_s2, 4  ;;  %s7200_s3 = smov 128   ;;  %s103_s30 = int_to_ptr.vmem [resolvable:$true] %s102_s30 }
  0x17   :  { %s7201_s14 = smov 8   ;;  %s7202_s15 = smov [#allocation14]  }
  0x18   :  { %108 = dma.hbm_to_vmem [thread:$0]  %s101_s29, 8192, %s103_s30, [#allocation12], %s7200_s3, %s7200_s3, %s7201_s14  }
  0x19   :  { %s117_s16 = sshll.u32 %s7202_s15, 4  ;;  %s7203_s7 = smov 64   ;;  %s118_s16 = int_to_ptr.vmem [resolvable:$true] %s117_s16 }
  0x1a   :  { %s7204_s17 = smov 4  }
  0x1b   :  { %123 = dma.hbm_to_vmem [thread:$0]  %s116_s13, 2048, %s118_s16, [#allocation15], %s7203_s7, %s7203_s7, %s7204_s17  }
  0x1c   :  { %7179 = dma.done.wait [#allocation3], 768  }
  0x1d   :  { %7180 = vsyncadd [#allocation3], 4294966528 }
  0x1e   :  { %7181 = dma.done.wait [#allocation6], 1024  }
  0x1f   :  { %7182 = vsyncadd [#allocation6], 4294966272 }
  0x20   :  { %7183 = dma.done.wait [#allocation9], 40960  }
  0x21   :  { %7184 = vsyncadd [#allocation9], 4294926336 }
  0x22   :  { %7185 = dma.done.wait [#allocation12], 24576  }
  0x23   :  { %7186 = vsyncadd [#allocation12], 4294942720 }
  0x24   :  { %7187 = dma.done.wait [#allocation15], 2048  }
  0x25   :  { %7188 = vsyncadd [#allocation15], 4294965248  ;;  %v4421_v0 = vld [vmem:[#allocation10 + $0xe0] sm:$0xf]  ;;  %v6641_v1 = vld [vmem:[#allocation10 + $0xec] sm:$0xf0] }
  0x26   :  { %v4549_v2 = vld [vmem:[#allocation10 + $0x1e0] sm:$0xf]  ;;  %v4422_v3 = vor.u32 %v6641_v1, %v4421_v0  ;;  %v6673_v4 = vld [vmem:[#allocation10 + $0x1ec] sm:$0xf0]  ;;  %s7205_s19 = smov [#allocation16]   ;;  %s4293_s22 = sshll.u32 %s7445_s11, 4  ;;  %s4294_s22 = int_to_ptr.hbm [resolvable:$true] %s4293_s22 }
  0x27   :  { %v4677_v5 = vld [vmem:[#allocation10 + $0x2e0] sm:$0xf]  ;;  %v6705_v6 = vld [vmem:[#allocation10 + $0x2ec] sm:$0xf0]  ;;  %v4550_v7 = vor.u32 %v6673_v4, %v4549_v2  ;;  %s4291_s20 = sshll.u32 %s7205_s19, 4  ;;  %s4292_s20 = int_to_ptr.vmem [resolvable:$true] %s4291_s20 }
  0x28   :  { %v4678_v8 = vor.u32 %v6705_v6, %v4677_v5  ;;  %v4805_v9 = vld [vmem:[#allocation10 + $0x3e0] sm:$0xf]  ;;  %v6737_v10 = vld [vmem:[#allocation10 + $0x3ec] sm:$0xf0]  ;;  %1146 = vmatpush.bf16.msra.mxu0 %v4422_v3 }
  0x29   :  { %v4405_v11 = vld [vmem:[#allocation10 + $0xc0] sm:$0xf]  ;;  %v4806_v12 = vor.u32 %v6737_v10, %v4805_v9  ;;  %v6637_v13 = vld [vmem:[#allocation10 + $0xcc] sm:$0xf0]  ;;  %1159 = vmatpush.bf16.msra.mxu1 %v4550_v7 }
  0x2a   :  { %v4533_v14 = vld [vmem:[#allocation10 + $0x1c0] sm:$0xf]  ;;  %v6669_v15 = vld [vmem:[#allocation10 + $0x1cc] sm:$0xf0]  ;;  %1172 = vmatpush.bf16.msra.mxu2 %v4678_v8  ;;  %v4406_v16 = vor.u32 %v6637_v13, %v4405_v11 }
  0x2b   :  { %v4534_v17 = vor.u32 %v6669_v15, %v4533_v14  ;;  %v4661_v18 = vld [vmem:[#allocation10 + $0x2c0] sm:$0xf]  ;;  %v6701_v19 = vld [vmem:[#allocation10 + $0x2cc] sm:$0xf0]  ;;  %1185 = vmatpush.bf16.msra.mxu3 %v4806_v12 }
  0x2c   :  { %v4789_v20 = vld [vmem:[#allocation10 + $0x3c0] sm:$0xf]  ;;  %v4662_v21 = vor.u32 %v6701_v19, %v4661_v18  ;;  %v6733_v22 = vld [vmem:[#allocation10 + $0x3cc] sm:$0xf0]  ;;  %1147 = vmatpush.bf16.msra.mxu0 %v4406_v16 }
  0x2d   :  { %v4389_v23 = vld [vmem:[#allocation10 + $0xa0] sm:$0xf]  ;;  %v6633_v24 = vld [vmem:[#allocation10 + $0xac] sm:$0xf0]  ;;  %v4790_v25 = vor.u32 %v6733_v22, %v4789_v20  ;;  %1160 = vmatpush.bf16.msra.mxu1 %v4534_v17 }
  0x2e   :  { %v4517_v26 = vld [vmem:[#allocation10 + $0x1a0] sm:$0xf]  ;;  %v6665_v27 = vld [vmem:[#allocation10 + $0x1ac] sm:$0xf0]  ;;  %v4390_v29 = vor.u32 %v6633_v24, %v4389_v23  ;;  %1173 = vmatpush.bf16.msra.mxu2 %v4662_v21 }
  0x2f   :  { %v4645_v28 = vld [vmem:[#allocation10 + $0x2a0] sm:$0xf]  ;;  %v6697_v30 = vld [vmem:[#allocation10 + $0x2ac] sm:$0xf0]  ;;  %v4518_v33 = vor.u32 %v6665_v27, %v4517_v26  ;;  %1186 = vmatpush.bf16.msra.mxu3 %v4790_v25 }
  0x30   :  { %v4773_v31 = vld [vmem:[#allocation10 + $0x3a0] sm:$0xf]  ;;  %v6729_v32 = vld [vmem:[#allocation10 + $0x3ac] sm:$0xf0]  ;;  %v4646_v34 = vor.u32 %v6697_v30, %v4645_v28  ;;  %1148 = vmatpush.bf16.msra.mxu0 %v4390_v29  ;;  %v6639_v28 = vld [vmem:[#allocation10 + $0xe4] sm:$0xf] }
  0x31   :  { %v4373_v35 = vld [vmem:[#allocation10 + $0x80] sm:$0xf]  ;;  %v6629_v36 = vld [vmem:[#allocation10 + $0x8c] sm:$0xf0]  ;;  %v4774_v38 = vor.u32 %v6729_v32, %v4773_v31  ;;  %1161 = vmatpush.bf16.msra.mxu1 %v4518_v33  ;;  %v4423_v29 = vld [vmem:[#allocation10 + $0xf0] sm:$0xf0] }
  0x32   :  { %v4501_v37 = vld [vmem:[#allocation10 + $0x180] sm:$0xf]  ;;  %v6661_v39 = vld [vmem:[#allocation10 + $0x18c] sm:$0xf0]  ;;  %v4374_v44 = vor.u32 %v6629_v36, %v4373_v35  ;;  %1174 = vmatpush.bf16.msra.mxu2 %v4646_v34  ;;  %v6671_v30 = vld [vmem:[#allocation10 + $0x1e4] sm:$0xf] }
  0x33   :  { %v4629_v40 = vld [vmem:[#allocation10 + $0x280] sm:$0xf]  ;;  %v6693_v41 = vld [vmem:[#allocation10 + $0x28c] sm:$0xf0]  ;;  %v4502_v45 = vor.u32 %v6661_v39, %v4501_v37  ;;  %1187 = vmatpush.bf16.msra.mxu3 %v4774_v38  ;;  %v4551_v32 = vld [vmem:[#allocation10 + $0x1f0] sm:$0xf0] }
  0x34   :  { %v4757_v42 = vld [vmem:[#allocation10 + $0x380] sm:$0xf]  ;;  %v6725_v43 = vld [vmem:[#allocation10 + $0x38c] sm:$0xf0]  ;;  %v4630_v46 = vor.u32 %v6693_v41, %v4629_v40  ;;  %1149 = vmatpush.bf16.msra.mxu0 %v4374_v44  ;;  %v6703_v33 = vld [vmem:[#allocation10 + $0x2e4] sm:$0xf]  ;;  %v4426_v40 = vor.u32 %v6639_v28, %v4423_v29  ;;  %v4554_v41 = vor.u32 %v6671_v30, %v4551_v32 }
  0x35   :  { %v4357_v47 = vld [vmem:[#allocation10 + $0x60] sm:$0xf]  ;;  %v6625_v48 = vld [vmem:[#allocation10 + $0x6c] sm:$0xf0]  ;;  %v4758_v50 = vor.u32 %v6725_v43, %v4757_v42  ;;  %1162 = vmatpush.bf16.msra.mxu1 %v4502_v45  ;;  %v4679_v34 = vld [vmem:[#allocation10 + $0x2f0] sm:$0xf0] }
  0x36   :  { %v4485_v49 = vld [vmem:[#allocation10 + $0x160] sm:$0xf]  ;;  %v6657_v51 = vld [vmem:[#allocation10 + $0x16c] sm:$0xf0]  ;;  %v4358_v56 = vor.u32 %v6625_v48, %v4357_v47  ;;  %1175 = vmatpush.bf16.msra.mxu2 %v4630_v46  ;;  %v6735_v37 = vld [vmem:[#allocation10 + $0x3e4] sm:$0xf]  ;;  %v4682_v42 = vor.u32 %v6703_v33, %v4679_v34 }
  0x37   :  { %v4613_v52 = vld [vmem:[#allocation10 + $0x260] sm:$0xf]  ;;  %v6689_v53 = vld [vmem:[#allocation10 + $0x26c] sm:$0xf0]  ;;  %v4486_v57 = vor.u32 %v6657_v51, %v4485_v49  ;;  %1188 = vmatpush.bf16.msra.mxu3 %v4758_v50  ;;  %v4807_v38 = vld [vmem:[#allocation10 + $0x3f0] sm:$0xf0] }
  0x38   :  { %v4741_v54 = vld [vmem:[#allocation10 + $0x360] sm:$0xf]  ;;  %v6721_v55 = vld [vmem:[#allocation10 + $0x36c] sm:$0xf0]  ;;  %v4614_v58 = vor.u32 %v6689_v53, %v4613_v52  ;;  %1150 = vmatpush.bf16.msra.mxu0 %v4358_v56  ;;  %v6635_v43 = vld [vmem:[#allocation10 + $0xc4] sm:$0xf]  ;;  %v4810_v46 = vor.u32 %v6735_v37, %v4807_v38 }
  0x39   :  { %v4341_v59 = vld [vmem:[#allocation10 + $0x40] sm:$0xf]  ;;  %v6621_v60 = vld [vmem:[#allocation10 + $0x4c] sm:$0xf0]  ;;  %v4742_v62 = vor.u32 %v6721_v55, %v4741_v54  ;;  %1163 = vmatpush.bf16.msra.mxu1 %v4486_v57  ;;  %v4407_v44 = vld [vmem:[#allocation10 + $0xd0] sm:$0xf0] }
  0x3a   :  { %v4469_v61 = vld [vmem:[#allocation10 + $0x140] sm:$0xf]  ;;  %v6653_v63 = vld [vmem:[#allocation10 + $0x14c] sm:$0xf0]  ;;  %v4342_v4 = vor.u32 %v6621_v60, %v4341_v59  ;;  %1176 = vmatpush.bf16.msra.mxu2 %v4614_v58  ;;  %v6667_v45 = vld [vmem:[#allocation10 + $0x1c4] sm:$0xf]  ;;  %v4410_v52 = vor.u32 %v6635_v43, %v4407_v44 }
  0x3b   :  { %v4597_v0 = vld [vmem:[#allocation10 + $0x240] sm:$0xf]  ;;  %v6685_v1 = vld [vmem:[#allocation10 + $0x24c] sm:$0xf0]  ;;  %v4470_v5 = vor.u32 %v6653_v63, %v4469_v61  ;;  %1189 = vmatpush.bf16.msra.mxu3 %v4742_v62  ;;  %v4535_v47 = vld [vmem:[#allocation10 + $0x1d0] sm:$0xf0] }
  0x3c   :  { %v4725_v2 = vld [vmem:[#allocation10 + $0x340] sm:$0xf]  ;;  %v6717_v3 = vld [vmem:[#allocation10 + $0x34c] sm:$0xf0]  ;;  %v4598_v6 = vor.u32 %v6685_v1, %v4597_v0  ;;  %1151 = vmatpush.bf16.msra.mxu0 %v4342_v4  ;;  %v6699_v48 = vld [vmem:[#allocation10 + $0x2c4] sm:$0xf]  ;;  %v4538_v54 = vor.u32 %v6667_v45, %v4535_v47 }
  0x3d   :  { %v4325_v7 = vld [vmem:[#allocation10 + $0x20] sm:$0xf]  ;;  %v6617_v8 = vld [vmem:[#allocation10 + $0x2c] sm:$0xf0]  ;;  %v4726_v10 = vor.u32 %v6717_v3, %v4725_v2  ;;  %1164 = vmatpush.bf16.msra.mxu1 %v4470_v5  ;;  %v4663_v49 = vld [vmem:[#allocation10 + $0x2d0] sm:$0xf0] }
  0x3e   :  { %v4453_v9 = vld [vmem:[#allocation10 + $0x120] sm:$0xf]  ;;  %v6649_v11 = vld [vmem:[#allocation10 + $0x12c] sm:$0xf0]  ;;  %v4326_v16 = vor.u32 %v6617_v8, %v4325_v7  ;;  %1177 = vmatpush.bf16.msra.mxu2 %v4598_v6  ;;  %v6731_v50 = vld [vmem:[#allocation10 + $0x3c4] sm:$0xf]  ;;  %v4666_v55 = vor.u32 %v6699_v48, %v4663_v49 }
  0x3f   :  { %v4581_v12 = vld [vmem:[#allocation10 + $0x220] sm:$0xf]  ;;  %v6681_v13 = vld [vmem:[#allocation10 + $0x22c] sm:$0xf0]  ;;  %v4454_v19 = vor.u32 %v6649_v11, %v4453_v9  ;;  %1190 = vmatpush.bf16.msra.mxu3 %v4726_v10  ;;  %v4791_v51 = vld [vmem:[#allocation10 + $0x3d0] sm:$0xf0] }
  0x40   :  { %v4709_v14 = vld [vmem:[#allocation10 + $0x320] sm:$0xf]  ;;  %v6713_v15 = vld [vmem:[#allocation10 + $0x32c] sm:$0xf0]  ;;  %v4582_v20 = vor.u32 %v6681_v13, %v4581_v12  ;;  %1152 = vmatpush.bf16.msra.mxu0 %v4326_v16  ;;  %v6631_v53 = vld [vmem:[#allocation10 + $0xa4] sm:$0xf]  ;;  %v4794_v59 = vor.u32 %v6731_v50, %v4791_v51 }
  0x41   :  { %v4309_v17 = vld [vmem:[#allocation10] sm:$0xf]  ;;  %v6613_v18 = vld [vmem:[#allocation10 + $0xc] sm:$0xf0]  ;;  %v4710_v24 = vor.u32 %v6713_v15, %v4709_v14  ;;  %1165 = vmatpush.bf16.msra.mxu1 %v4454_v19  ;;  %v4391_v56 = vld [vmem:[#allocation10 + $0xb0] sm:$0xf0] }
  0x42   :  { %v4437_v21 = vld [vmem:[#allocation10 + $0x100] sm:$0xf]  ;;  %v6645_v22 = vld [vmem:[#allocation10 + $0x10c] sm:$0xf0]  ;;  %v4310_v31 = vor.u32 %v6613_v18, %v4309_v17  ;;  %1178 = vmatpush.bf16.msra.mxu2 %v4582_v20  ;;  %v6663_v57 = vld [vmem:[#allocation10 + $0x1a4] sm:$0xf]  ;;  %v4394_v0 = vor.u32 %v6631_v53, %v4391_v56 }
  0x43   :  { %v4565_v23 = vld [vmem:[#allocation10 + $0x200] sm:$0xf]  ;;  %v6677_v25 = vld [vmem:[#allocation10 + $0x20c] sm:$0xf0]  ;;  %v4438_v35 = vor.u32 %v6645_v22, %v4437_v21  ;;  %1191 = vmatpush.bf16.msra.mxu3 %v4710_v24  ;;  %v4519_v58 = vld [vmem:[#allocation10 + $0x1b0] sm:$0xf0] }
  0x44   :  { %v4693_v26 = vld [vmem:[#allocation10 + $0x300] sm:$0xf]  ;;  %v6709_v27 = vld [vmem:[#allocation10 + $0x30c] sm:$0xf0]  ;;  %v4566_v36 = vor.u32 %v6677_v25, %v4565_v23  ;;  %1153 = vmatpush.bf16.msra.mxu0 %v4310_v31  ;;  %v6695_v60 = vld [vmem:[#allocation10 + $0x2a4] sm:$0xf]  ;;  %v4522_v1 = vor.u32 %v6663_v57, %v4519_v58 }
  0x45   :  { %v4694_v39 = vor.u32 %v6709_v27, %v4693_v26  ;;  %1166 = vmatpush.bf16.msra.mxu1 %v4438_v35  ;;  %v4647_v61 = vld [vmem:[#allocation10 + $0x2b0] sm:$0xf0]  ;;  %v6727_v62 = vld [vmem:[#allocation10 + $0x3a4] sm:$0xf]  ;;  %v173_v3 = vld [vmem:[#allocation5 + $0x18] sm:$0xff] }
  0x46   :  { %1179 = vmatpush.bf16.msra.mxu2 %v4566_v36  ;;  %v4775_v63 = vld [vmem:[#allocation10 + $0x3b0] sm:$0xf0]  ;;  %v4650_v4 = vor.u32 %v6695_v60, %v4647_v61  ;;  %v6627_v5 = vld [vmem:[#allocation10 + $0x84] sm:$0xf]  ;;  %v7301_v9 = vpack.c.bf16 %v173_v3, %v173_v3  ;;  %v171_v19 = vld [vmem:[#allocation5 + $0x8] sm:$0xff] }
  0x47   :  { %1192 = vmatpush.bf16.msra.mxu3 %v4694_v39  ;;  %v172_v2 = vld [vmem:[#allocation5 + $0x10] sm:$0xff]  ;;  %v6659_v7 = vld [vmem:[#allocation10 + $0x184] sm:$0xf]  ;;  %v4778_v10 = vor.u32 %v6727_v62, %v4775_v63  ;;  %v7307_v25 = vpack.c.bf16 %v171_v19, %v171_v19 }
  0x48   :  { %1198 = vmatpush.bf16.msrb.mxu0 %v4426_v40  ;;  %v4375_v6 = vld [vmem:[#allocation10 + $0x90] sm:$0xf0]  ;;  %v7299_v8 = vpack.c.bf16 %v172_v2, %v172_v2  ;;  %v6691_v12 = vld [vmem:[#allocation10 + $0x284] sm:$0xf] }
  0x49   :  { %1211 = vmatpush.bf16.msrb.mxu1 %v4554_v41  ;;  %v4503_v11 = vld [vmem:[#allocation10 + $0x190] sm:$0xf0]  ;;  %v6723_v14 = vld [vmem:[#allocation10 + $0x384] sm:$0xf]  ;;  %v4378_v17 = vor.u32 %v6627_v5, %v4375_v6  ;;  %v6642_v5 = vld [vmem:[#allocation10 + $0xf4] sm:$0xf0] }
  0x4a   :  { %1224 = vmatpush.bf16.msrb.mxu2 %v4682_v42  ;;  %v4631_v13 = vld [vmem:[#allocation10 + $0x290] sm:$0xf0]  ;;  %1193 = vmatmul.bf16.vlgmr.msra.gmra.mxu3 %v7301_v9  ;;  %v170_v16 = vld [vmem:[#allocation5] sm:$0xff]  ;;  %v4506_v20 = vor.u32 %v6659_v7, %v4503_v11  ;;  %v4557_v6 = vld [vmem:[#allocation10 + $0x1e8] sm:$0xf] }
  0x4b   :  { %1237 = vmatpush.bf16.msrb.mxu3 %v4810_v46  ;;  %v4759_v15 = vld [vmem:[#allocation10 + $0x390] sm:$0xf0]  ;;  %1180 = vmatmul.bf16.vlgmr.msra.gmra.mxu2 %v7299_v8  ;;  %v7305_v18 = vpack.c.bf16 %v170_v16, %v170_v16  ;;  %v4634_v21 = vor.u32 %v6691_v12, %v4631_v13  ;;  %v6623_v22 = vld [vmem:[#allocation10 + $0x64] sm:$0xf]  ;;  %v4685_v11 = vld [vmem:[#allocation10 + $0x2e8] sm:$0xf] }
  0x4c   :  { %1199 = vmatpush.bf16.msrb.mxu0 %v4410_v52  ;;  %v4359_v23 = vld [vmem:[#allocation10 + $0x70] sm:$0xf0]  ;;  %v6655_v24 = vld [vmem:[#allocation10 + $0x164] sm:$0xf]  ;;  %v4762_v26 = vor.u32 %v6723_v14, %v4759_v15  ;;  %1167 = vmatmul.bf16.vlgmr.msra.gmra.mxu1 %v7307_v25  ;;  %v6706_v12 = vld [vmem:[#allocation10 + $0x2f4] sm:$0xf0] }
  0x4d   :  { %1212 = vmatpush.bf16.msrb.mxu1 %v4538_v54  ;;  %v4487_v27 = vld [vmem:[#allocation10 + $0x170] sm:$0xf0]  ;;  %v6687_v28 = vld [vmem:[#allocation10 + $0x264] sm:$0xf]  ;;  %1154 = vmatmul.bf16.vlgmr.msra.gmra.mxu0 %v7305_v18  ;;  %v4362_v32 = vor.u32 %v6623_v22, %v4359_v23  ;;  %v4813_v15 = vld [vmem:[#allocation10 + $0x3e8] sm:$0xf] }
  0x4e   :  { %1225 = vmatpush.bf16.msrb.mxu2 %v4666_v55  ;;  %v4615_v29 = vld [vmem:[#allocation10 + $0x270] sm:$0xf0]  ;;  %v6719_v30 = vld [vmem:[#allocation10 + $0x364] sm:$0xf]  ;;  %v4490_v33 = vor.u32 %v6655_v24, %v4487_v27  ;;  %v6738_v16 = vld [vmem:[#allocation10 + $0x3f4] sm:$0xf0] }
  0x4f   :  { %1238 = vmatpush.bf16.msrb.mxu3 %v4794_v59  ;;  %v4743_v31 = vld [vmem:[#allocation10 + $0x370] sm:$0xf0]  ;;  %v4618_v34 = vor.u32 %v6687_v28, %v4615_v29  ;;  %v6619_v35 = vld [vmem:[#allocation10 + $0x44] sm:$0xf]  ;;  %v4413_v22 = vld [vmem:[#allocation10 + $0xc8] sm:$0xf] }
  0x50   :  { %1200 = vmatpush.bf16.msrb.mxu0 %v4394_v0  ;;  %v4343_v36 = vld [vmem:[#allocation10 + $0x50] sm:$0xf0]  ;;  %v6651_v37 = vld [vmem:[#allocation10 + $0x144] sm:$0xf]  ;;  %v4746_v38 = vor.u32 %v6719_v30, %v4743_v31  ;;  %v6638_v23 = vld [vmem:[#allocation10 + $0xd4] sm:$0xf0] }
  0x51   :  { %1213 = vmatpush.bf16.msrb.mxu1 %v4522_v1  ;;  %v4471_v39 = vld [vmem:[#allocation10 + $0x150] sm:$0xf0]  ;;  %v6683_v40 = vld [vmem:[#allocation10 + $0x244] sm:$0xf]  ;;  %v4346_v44 = vor.u32 %v6619_v35, %v4343_v36  ;;  %v4541_v24 = vld [vmem:[#allocation10 + $0x1c8] sm:$0xf] }
  0x52   :  { %1226 = vmatpush.bf16.msrb.mxu2 %v4650_v4  ;;  %v4599_v41 = vld [vmem:[#allocation10 + $0x250] sm:$0xf0]  ;;  %v6715_v42 = vld [vmem:[#allocation10 + $0x344] sm:$0xf]  ;;  %v4474_v45 = vor.u32 %v6651_v37, %v4471_v39  ;;  %v4429_v4 = vld [vmem:[#allocation10 + $0xe8] sm:$0xf] }
  0x53   :  { %1239 = vmatpush.bf16.msrb.mxu3 %v4778_v10  ;;  %v4727_v43 = vld [vmem:[#allocation10 + $0x350] sm:$0xf0]  ;;  %v4602_v46 = vor.u32 %v6683_v40, %v4599_v41  ;;  %v6615_v47 = vld [vmem:[#allocation10 + $0x24] sm:$0xf]  ;;  %v6674_v10 = vld [vmem:[#allocation10 + $0x1f4] sm:$0xf0]  ;;  %v4430_v19 = vor.u32 %v6642_v5, %v4429_v4 }
  0x54   :  { %1201 = vmatpush.bf16.msrb.mxu0 %v4378_v17  ;;  %v4327_v48 = vld [vmem:[#allocation10 + $0x30] sm:$0xf0]  ;;  %v6647_v49 = vld [vmem:[#allocation10 + $0x124] sm:$0xf]  ;;  %v4730_v50 = vor.u32 %v6715_v42, %v4727_v43  ;;  %v6670_v27 = vld [vmem:[#allocation10 + $0x1d4] sm:$0xf0] }
  0x55   :  { %1214 = vmatpush.bf16.msrb.mxu1 %v4506_v20  ;;  %v4455_v51 = vld [vmem:[#allocation10 + $0x130] sm:$0xf0]  ;;  %v6679_v52 = vld [vmem:[#allocation10 + $0x224] sm:$0xf]  ;;  %v4330_v56 = vor.u32 %v6615_v47, %v4327_v48  ;;  %v4558_v20 = vor.u32 %v6674_v10, %v4557_v6  ;;  %v4669_v28 = vld [vmem:[#allocation10 + $0x2c8] sm:$0xf] }
  0x56   :  { %1227 = vmatpush.bf16.msrb.mxu2 %v4634_v21  ;;  %v4583_v53 = vld [vmem:[#allocation10 + $0x230] sm:$0xf0]  ;;  %v6711_v54 = vld [vmem:[#allocation10 + $0x324] sm:$0xf]  ;;  %v4458_v59 = vor.u32 %v6647_v49, %v4455_v51  ;;  %v4686_v21 = vor.u32 %v6706_v12, %v4685_v11  ;;  %v6702_v29 = vld [vmem:[#allocation10 + $0x2d4] sm:$0xf0] }
  0x57   :  { %1240 = vmatpush.bf16.msrb.mxu3 %v4762_v26  ;;  %v4711_v55 = vld [vmem:[#allocation10 + $0x330] sm:$0xf0]  ;;  %v6611_v57 = vld [vmem:[#allocation10 + $0x4] sm:$0xf]  ;;  %v4586_v60 = vor.u32 %v6679_v52, %v4583_v53  ;;  %v4814_v26 = vor.u32 %v6738_v16, %v4813_v15  ;;  %v4797_v30 = vld [vmem:[#allocation10 + $0x3c8] sm:$0xf] }
  0x58   :  { %1202 = vmatpush.bf16.msrb.mxu0 %v4362_v32  ;;  %v4311_v58 = vld [vmem:[#allocation10 + $0x10] sm:$0xf0]  ;;  %v6643_v61 = vld [vmem:[#allocation10 + $0x104] sm:$0xf]  ;;  %v4714_v0 = vor.u32 %v6711_v54, %v4711_v55  ;;  %v6734_v31 = vld [vmem:[#allocation10 + $0x3d4] sm:$0xf0]  ;;  %v4414_v32 = vor.u32 %v6638_v23, %v4413_v22 }
  0x59   :  { %1215 = vmatpush.bf16.msrb.mxu1 %v4490_v33  ;;  %v4439_v62 = vld [vmem:[#allocation10 + $0x110] sm:$0xf0]  ;;  %v6675_v63 = vld [vmem:[#allocation10 + $0x204] sm:$0xf]  ;;  %v4314_v7 = vor.u32 %v6611_v57, %v4311_v58  ;;  %v4542_v33 = vor.u32 %v6670_v27, %v4541_v24  ;;  %v4397_v35 = vld [vmem:[#allocation10 + $0xa8] sm:$0xf] }
  0x5a   :  { %1228 = vmatpush.bf16.msrb.mxu2 %v4618_v34  ;;  %v4567_v1 = vld [vmem:[#allocation10 + $0x210] sm:$0xf0]  ;;  %v6707_v2 = vld [vmem:[#allocation10 + $0x304] sm:$0xf]  ;;  %v4442_v13 = vor.u32 %v6643_v61, %v4439_v62  ;;  %v4670_v34 = vor.u32 %v6702_v29, %v4669_v28  ;;  %v6634_v36 = vld [vmem:[#allocation10 + $0xb4] sm:$0xf0] }
  0x5b   :  { %1241 = vmatpush.bf16.msrb.mxu3 %v4746_v38  ;;  %v4695_v3 = vld [vmem:[#allocation10 + $0x310] sm:$0xf0]  ;;  %v4570_v14 = vor.u32 %v6675_v63, %v4567_v1  ;;  %v4525_v37 = vld [vmem:[#allocation10 + $0x1a8] sm:$0xf]  ;;  %v4798_v38 = vor.u32 %v6734_v31, %v4797_v30  ;;  %v6666_v39 = vld [vmem:[#allocation10 + $0x1b4] sm:$0xf0] }
  0x5c   :  { %1203 = vmatpush.bf16.msrb.mxu0 %v4346_v44  ;;  %v4698_v17 = vor.u32 %v6707_v2, %v4695_v3  ;;  %v4653_v40 = vld [vmem:[#allocation10 + $0x2a8] sm:$0xf]  ;;  %v6698_v41 = vld [vmem:[#allocation10 + $0x2b4] sm:$0xf0]  ;;  %v4398_v44 = vor.u32 %v6634_v36, %v4397_v35 }
  0x5d   :  { %1216 = vmatpush.bf16.msrb.mxu1 %v4474_v45  ;;  %v4781_v42 = vld [vmem:[#allocation10 + $0x3a8] sm:$0xf]  ;;  %v6730_v43 = vld [vmem:[#allocation10 + $0x3b4] sm:$0xf0]  ;;  %v4526_v45 = vor.u32 %v6666_v39, %v4525_v37 }
  0x5e   :  { %1229 = vmatpush.bf16.msrb.mxu2 %v4602_v46  ;;  %v4654_v46 = vor.u32 %v6698_v41, %v4653_v40  ;;  %v4381_v47 = vld [vmem:[#allocation10 + $0x88] sm:$0xf]  ;;  %v6630_v48 = vld [vmem:[#allocation10 + $0x94] sm:$0xf0] }
  0x5f   :  { %1242 = vmatpush.bf16.msrb.mxu3 %v4730_v50  ;;  %v4509_v49 = vld [vmem:[#allocation10 + $0x188] sm:$0xf]  ;;  %v4782_v50 = vor.u32 %v6730_v43, %v4781_v42  ;;  %v6662_v51 = vld [vmem:[#allocation10 + $0x194] sm:$0xf0] }
  0x60   :  { %1204 = vmatpush.bf16.msrb.mxu0 %v4330_v56  ;;  %v4637_v52 = vld [vmem:[#allocation10 + $0x288] sm:$0xf]  ;;  %v6694_v53 = vld [vmem:[#allocation10 + $0x294] sm:$0xf0]  ;;  %v4382_v56 = vor.u32 %v6630_v48, %v4381_v47  ;;  %v4510_v57 = vor.u32 %v6662_v51, %v4509_v49  ;;  %v4559_v48 = vld [vmem:[#allocation10 + $0x1f8] sm:$0xf0] }
  0x61   :  { %1217 = vmatpush.bf16.msrb.mxu1 %v4458_v59  ;;  %v4765_v54 = vld [vmem:[#allocation10 + $0x388] sm:$0xf]  ;;  %v6726_v55 = vld [vmem:[#allocation10 + $0x394] sm:$0xf0]  ;;  %v4638_v58 = vor.u32 %v6694_v53, %v4637_v52  ;;  %v6704_v49 = vld [vmem:[#allocation10 + $0x2ec] sm:$0xf] }
  0x62   :  { %1230 = vmatpush.bf16.msrb.mxu2 %v4586_v60  ;;  %v4365_v59 = vld [vmem:[#allocation10 + $0x68] sm:$0xf]  ;;  %v6626_v60 = vld [vmem:[#allocation10 + $0x74] sm:$0xf0]  ;;  %v4766_v62 = vor.u32 %v6726_v55, %v4765_v54  ;;  %v6736_v53 = vld [vmem:[#allocation10 + $0x3ec] sm:$0xf] }
  0x63   :  { %1243 = vmatpush.bf16.msrb.mxu3 %v4714_v0  ;;  %v4493_v61 = vld [vmem:[#allocation10 + $0x168] sm:$0xf]  ;;  %v6658_v63 = vld [vmem:[#allocation10 + $0x174] sm:$0xf0]  ;;  %v4366_v4 = vor.u32 %v6626_v60, %v4365_v59  ;;  %v4815_v54 = vld [vmem:[#allocation10 + $0x3f8] sm:$0xf0] }
  0x64   :  { %1205 = vmatpush.bf16.msrb.mxu0 %v4314_v7  ;;  %v4621_v0 = vld [vmem:[#allocation10 + $0x268] sm:$0xf]  ;;  %v6690_v1 = vld [vmem:[#allocation10 + $0x274] sm:$0xf0]  ;;  %v4494_v5 = vor.u32 %v6658_v63, %v4493_v61  ;;  %v6636_v59 = vld [vmem:[#allocation10 + $0xcc] sm:$0xf] }
  0x65   :  { %1218 = vmatpush.bf16.msrb.mxu1 %v4442_v13  ;;  %v4749_v2 = vld [vmem:[#allocation10 + $0x368] sm:$0xf]  ;;  %v6722_v3 = vld [vmem:[#allocation10 + $0x374] sm:$0xf0]  ;;  %v4622_v6 = vor.u32 %v6690_v1, %v4621_v0  ;;  %v4415_v60 = vld [vmem:[#allocation10 + $0xd8] sm:$0xf0] }
  0x66   :  { %1231 = vmatpush.bf16.msrb.mxu2 %v4570_v14  ;;  %v4349_v7 = vld [vmem:[#allocation10 + $0x48] sm:$0xf]  ;;  %v6622_v10 = vld [vmem:[#allocation10 + $0x54] sm:$0xf0]  ;;  %v4750_v12 = vor.u32 %v6722_v3, %v4749_v2  ;;  %v6668_v61 = vld [vmem:[#allocation10 + $0x1cc] sm:$0xf] }
  0x67   :  { %1244 = vmatpush.bf16.msrb.mxu3 %v4698_v17  ;;  %1206 = vmatmul.bf16.vlgmr.msrb.gmra.mxu0 %v7305_v18  ;;  %v4477_v11 = vld [vmem:[#allocation10 + $0x148] sm:$0xf]  ;;  %v6654_v13 = vld [vmem:[#allocation10 + $0x154] sm:$0xf0]  ;;  %v4543_v63 = vld [vmem:[#allocation10 + $0x1d8] sm:$0xf0] }
  0x68   :  { %1250 = vmatpush.bf16.msra.mxu0 %v4430_v19  ;;  %1219 = vmatmul.bf16.vlgmr.msrb.gmra.mxu1 %v7307_v25  ;;  %v4605_v14 = vld [vmem:[#allocation10 + $0x248] sm:$0xf]  ;;  %v6686_v15 = vld [vmem:[#allocation10 + $0x254] sm:$0xf0]  ;;  %v4350_v19 = vor.u32 %v6622_v10, %v4349_v7  ;;  %v6700_v0 = vld [vmem:[#allocation10 + $0x2cc] sm:$0xf] }
  0x69   :  { %1263 = vmatpush.bf16.msra.mxu1 %v4558_v20  ;;  %1232 = vmatmul.bf16.vlgmr.msrb.gmra.mxu2 %v7299_v8  ;;  %v4733_v16 = vld [vmem:[#allocation10 + $0x348] sm:$0xf]  ;;  %v6718_v17 = vld [vmem:[#allocation10 + $0x354] sm:$0xf0]  ;;  %v4478_v20 = vor.u32 %v6654_v13, %v4477_v11  ;;  %v4671_v1 = vld [vmem:[#allocation10 + $0x2d8] sm:$0xf0] }
  0x6a   :  { %1276 = vmatpush.bf16.msra.mxu2 %v4686_v21  ;;  %1245 = vmatmul.bf16.vlgmr.msrb.gmra.mxu3 %v7301_v9  ;;  %v4606_v21 = vor.u32 %v6686_v15, %v4605_v14  ;;  %v4333_v22 = vld [vmem:[#allocation10 + $0x28] sm:$0xf]  ;;  %v6618_v23 = vld [vmem:[#allocation10 + $0x34] sm:$0xf0]  ;;  %v6732_v2 = vld [vmem:[#allocation10 + $0x3cc] sm:$0xf] }
  0x6b   :  { %1289 = vmatpush.bf16.msra.mxu3 %v4814_v26  ;;  %v4461_v24 = vld [vmem:[#allocation10 + $0x128] sm:$0xf]  ;;  %v4734_v26 = vor.u32 %v6718_v17, %v4733_v16  ;;  %v6650_v27 = vld [vmem:[#allocation10 + $0x134] sm:$0xf0]  ;;  %v4799_v3 = vld [vmem:[#allocation10 + $0x3d8] sm:$0xf0] }
  0x6c   :  { %1251 = vmatpush.bf16.msra.mxu0 %v4414_v32  ;;  %v4589_v28 = vld [vmem:[#allocation10 + $0x228] sm:$0xf]  ;;  %v6682_v29 = vld [vmem:[#allocation10 + $0x234] sm:$0xf0]  ;;  %v4334_v32 = vor.u32 %v6618_v23, %v4333_v22  ;;  %v4462_v35 = vor.u32 %v6650_v27, %v4461_v24  ;;  %v6632_v7 = vld [vmem:[#allocation10 + $0xac] sm:$0xf] }
  0x6d   :  { %1264 = vmatpush.bf16.msra.mxu1 %v4542_v33  ;;  %v4717_v30 = vld [vmem:[#allocation10 + $0x328] sm:$0xf]  ;;  %v6714_v31 = vld [vmem:[#allocation10 + $0x334] sm:$0xf0]  ;;  %v4590_v36 = vor.u32 %v6682_v29, %v4589_v28  ;;  %v4399_v10 = vld [vmem:[#allocation10 + $0xb8] sm:$0xf0] }
  0x6e   :  { %1277 = vmatpush.bf16.msra.mxu2 %v4670_v34  ;;  %v4317_v33 = vld [vmem:[#allocation10 + $0x8] sm:$0xf]  ;;  %v6614_v34 = vld [vmem:[#allocation10 + $0x14] sm:$0xf0]  ;;  %v4718_v40 = vor.u32 %v6714_v31, %v4717_v30  ;;  %v6664_v11 = vld [vmem:[#allocation10 + $0x1ac] sm:$0xf] }
  0x6f   :  { %1290 = vmatpush.bf16.msra.mxu3 %v4798_v38  ;;  %v4445_v37 = vld [vmem:[#allocation10 + $0x108] sm:$0xf]  ;;  %v6646_v38 = vld [vmem:[#allocation10 + $0x114] sm:$0xf0]  ;;  %v4318_v47 = vor.u32 %v6614_v34, %v4317_v33  ;;  %v4527_v13 = vld [vmem:[#allocation10 + $0x1b8] sm:$0xf0] }
  0x70   :  { %1252 = vmatpush.bf16.msra.mxu0 %v4398_v44  ;;  %v4573_v39 = vld [vmem:[#allocation10 + $0x208] sm:$0xf]  ;;  %v6678_v41 = vld [vmem:[#allocation10 + $0x214] sm:$0xf0]  ;;  %v6640_v44 = vld [vmem:[#allocation10 + $0xec] sm:$0xf]  ;;  %v4446_v51 = vor.u32 %v6646_v38, %v4445_v37 }
  0x71   :  { %1265 = vmatpush.bf16.msra.mxu1 %v4526_v45  ;;  %v4701_v42 = vld [vmem:[#allocation10 + $0x308] sm:$0xf]  ;;  %v6710_v43 = vld [vmem:[#allocation10 + $0x314] sm:$0xf0]  ;;  %v4431_v45 = vld [vmem:[#allocation10 + $0xf8] sm:$0xf0]  ;;  %v4574_v52 = vor.u32 %v6678_v41, %v4573_v39 }
  0x72   :  { %1278 = vmatpush.bf16.msra.mxu2 %v4654_v46  ;;  %v6672_v46 = vld [vmem:[#allocation10 + $0x1ec] sm:$0xf]  ;;  %v4702_v55 = vor.u32 %v6710_v43, %v4701_v42  ;;  %v4655_v15 = vld [vmem:[#allocation10 + $0x2b8] sm:$0xf0] }
  0x73   :  { %1291 = vmatpush.bf16.msra.mxu3 %v4782_v50  ;;  %v4687_v50 = vld [vmem:[#allocation10 + $0x2f8] sm:$0xf0]  ;;  %v6696_v14 = vld [vmem:[#allocation10 + $0x2ac] sm:$0xf] }
  0x74   :  { %1253 = vmatpush.bf16.msra.mxu0 %v4382_v56  ;;  %v4434_v56 = vor.u32 %v6640_v44, %v4431_v45  ;;  %v6728_v16 = vld [vmem:[#allocation10 + $0x3ac] sm:$0xf]  ;;  %v4783_v17 = vld [vmem:[#allocation10 + $0x3b8] sm:$0xf0] }
  0x75   :  { %1266 = vmatpush.bf16.msra.mxu1 %v4510_v57  ;;  %v4562_v57 = vor.u32 %v6672_v46, %v4559_v48  ;;  %v6628_v22 = vld [vmem:[#allocation10 + $0x8c] sm:$0xf]  ;;  %v4383_v23 = vld [vmem:[#allocation10 + $0x98] sm:$0xf0] }
  0x76   :  { %1279 = vmatpush.bf16.msra.mxu2 %v4638_v58  ;;  %v4690_v58 = vor.u32 %v6704_v49, %v4687_v50  ;;  %v6660_v24 = vld [vmem:[#allocation10 + $0x18c] sm:$0xf]  ;;  %v4511_v27 = vld [vmem:[#allocation10 + $0x198] sm:$0xf0] }
  0x77   :  { %1292 = vmatpush.bf16.msra.mxu3 %v4766_v62  ;;  %v4818_v62 = vor.u32 %v6736_v53, %v4815_v54  ;;  %v6692_v28 = vld [vmem:[#allocation10 + $0x28c] sm:$0xf]  ;;  %v4639_v29 = vld [vmem:[#allocation10 + $0x298] sm:$0xf0]  ;;  %v4514_v33 = vor.u32 %v6660_v24, %v4511_v27  ;;  %v5189_v24 = vld [vmem:[#allocation8 + $0x2e0] sm:$0xf] }
  0x78   :  { %1254 = vmatpush.bf16.msra.mxu0 %v4366_v4  ;;  %v4418_v4 = vor.u32 %v6636_v59, %v4415_v60  ;;  %v6724_v30 = vld [vmem:[#allocation10 + $0x38c] sm:$0xf]  ;;  %v4767_v31 = vld [vmem:[#allocation10 + $0x398] sm:$0xf0]  ;;  %v4642_v34 = vor.u32 %v6692_v28, %v4639_v29  ;;  %v5317_v29 = vld [vmem:[#allocation8 + $0x3e0] sm:$0xf] }
  0x79   :  { %1267 = vmatpush.bf16.msra.mxu1 %v4494_v5  ;;  %v4546_v5 = vor.u32 %v6668_v61, %v4543_v63  ;;  %v6656_v37 = vld [vmem:[#allocation10 + $0x16c] sm:$0xf]  ;;  %v4770_v38 = vor.u32 %v6724_v30, %v4767_v31  ;;  %v4495_v39 = vld [vmem:[#allocation10 + $0x178] sm:$0xf0]  ;;  %v6545_v30 = vld [vmem:[#allocation8 + $0x3ec] sm:$0xf0] }
  0x7a   :  { %1280 = vmatpush.bf16.msra.mxu2 %v4622_v6  ;;  %v4674_v6 = vor.u32 %v6700_v0, %v4671_v1  ;;  %v4623_v41 = vld [vmem:[#allocation10 + $0x278] sm:$0xf0]  ;;  %v6720_v42 = vld [vmem:[#allocation10 + $0x36c] sm:$0xf]  ;;  %v4498_v45 = vor.u32 %v6656_v37, %v4495_v39  ;;  %v5045_v37 = vld [vmem:[#allocation8 + $0x1c0] sm:$0xf] }
  0x7b   :  { %1293 = vmatpush.bf16.msra.mxu3 %v4750_v12  ;;  %v4802_v12 = vor.u32 %v6732_v2, %v4799_v3  ;;  %v4751_v43 = vld [vmem:[#allocation10 + $0x378] sm:$0xf0]  ;;  %v6652_v49 = vld [vmem:[#allocation10 + $0x14c] sm:$0xf]  ;;  %v6477_v39 = vld [vmem:[#allocation8 + $0x1cc] sm:$0xf0] }
  0x7c   :  { %1255 = vmatpush.bf16.msra.mxu0 %v4350_v19  ;;  %v4402_v19 = vor.u32 %v6632_v7, %v4399_v10  ;;  %v4351_v48 = vld [vmem:[#allocation10 + $0x58] sm:$0xf0]  ;;  %v4754_v50 = vor.u32 %v6720_v42, %v4751_v43  ;;  %v6716_v54 = vld [vmem:[#allocation10 + $0x34c] sm:$0xf]  ;;  %v5301_v42 = vld [vmem:[#allocation8 + $0x3c0] sm:$0xf] }
  0x7d   :  { %1268 = vmatpush.bf16.msra.mxu1 %v4478_v20  ;;  %v4530_v20 = vor.u32 %v6664_v11, %v4527_v13  ;;  %v4607_v53 = vld [vmem:[#allocation10 + $0x258] sm:$0xf0]  ;;  %v6616_v59 = vld [vmem:[#allocation10 + $0x2c] sm:$0xf]  ;;  %v6541_v43 = vld [vmem:[#allocation8 + $0x3cc] sm:$0xf0] }
  0x7e   :  { %1281 = vmatpush.bf16.msra.mxu2 %v4606_v21  ;;  %v4658_v21 = vor.u32 %v6696_v14, %v4655_v15  ;;  %v4335_v60 = vld [vmem:[#allocation10 + $0x38] sm:$0xf0]  ;;  %v6648_v61 = vld [vmem:[#allocation10 + $0x12c] sm:$0xf] }
  0x7f   :  { %1294 = vmatpush.bf16.msra.mxu3 %v4734_v26  ;;  %v4786_v26 = vor.u32 %v6728_v16, %v4783_v17  ;;  %v4463_v63 = vld [vmem:[#allocation10 + $0x138] sm:$0xf0]  ;;  %v6680_v0 = vld [vmem:[#allocation10 + $0x22c] sm:$0xf] }
  0x80   :  { %1256 = vmatpush.bf16.msra.mxu0 %v4334_v32  ;;  %v4386_v32 = vor.u32 %v6628_v22, %v4383_v23  ;;  %v4591_v1 = vld [vmem:[#allocation10 + $0x238] sm:$0xf0]  ;;  %v6712_v2 = vld [vmem:[#allocation10 + $0x32c] sm:$0xf]  ;;  %v4466_v7 = vor.u32 %v6648_v61, %v4463_v63  ;;  %v6481_v23 = vld [vmem:[#allocation8 + $0x1ec] sm:$0xf0] }
  0x81   :  { %1269 = vmatpush.bf16.msra.mxu1 %v4462_v35  ;;  %v6624_v35 = vld [vmem:[#allocation10 + $0x6c] sm:$0xf]  ;;  %v4719_v3 = vld [vmem:[#allocation10 + $0x338] sm:$0xf0]  ;;  %v4594_v10 = vor.u32 %v6680_v0, %v4591_v1  ;;  %v5013_v61 = vld [vmem:[#allocation8 + $0x180] sm:$0xf] }
  0x82   :  { %1282 = vmatpush.bf16.msra.mxu2 %v4590_v36  ;;  %v4367_v36 = vld [vmem:[#allocation10 + $0x78] sm:$0xf0]  ;;  %v6644_v11 = vld [vmem:[#allocation10 + $0x10c] sm:$0xf]  ;;  %v4722_v14 = vor.u32 %v6712_v2, %v4719_v3  ;;  %v5141_v63 = vld [vmem:[#allocation8 + $0x280] sm:$0xf] }
  0x83   :  { %1295 = vmatpush.bf16.msra.mxu3 %v4718_v40  ;;  %v6688_v40 = vld [vmem:[#allocation10 + $0x26c] sm:$0xf]  ;;  %v4370_v44 = vor.u32 %v6624_v35, %v4367_v36  ;;  %v4575_v15 = vld [vmem:[#allocation10 + $0x218] sm:$0xf0]  ;;  %v4917_v35 = vld [vmem:[#allocation8 + $0xc0] sm:$0xf] }
  0x84   :  { %1257 = vmatpush.bf16.msra.mxu0 %v4318_v47  ;;  %v4626_v46 = vor.u32 %v6688_v40, %v4623_v41  ;;  %v6620_v47 = vld [vmem:[#allocation10 + $0x4c] sm:$0xf]  ;;  %v4703_v17 = vld [vmem:[#allocation10 + $0x318] sm:$0xf0]  ;;  %v6445_v36 = vld [vmem:[#allocation8 + $0xcc] sm:$0xf0] }
  0x85   :  { %1270 = vmatpush.bf16.msra.mxu1 %v4446_v51  ;;  %v4479_v51 = vld [vmem:[#allocation10 + $0x158] sm:$0xf0]  ;;  %v6676_v13 = vld [vmem:[#allocation10 + $0x20c] sm:$0xf]  ;;  %v5173_v40 = vld [vmem:[#allocation8 + $0x2c0] sm:$0xf] }
  0x86   :  { %1283 = vmatpush.bf16.msra.mxu2 %v4574_v52  ;;  %v6684_v52 = vld [vmem:[#allocation10 + $0x24c] sm:$0xf]  ;;  %v4578_v28 = vor.u32 %v6676_v13, %v4575_v15  ;;  %v6509_v41 = vld [vmem:[#allocation8 + $0x2cc] sm:$0xf0]  ;;  %v5269_v1 = vld [vmem:[#allocation8 + $0x380] sm:$0xf] }
  0x87   :  { %1296 = vmatpush.bf16.msra.mxu3 %v4702_v55  ;;  %1258 = vmatmul.bf16.vlgmr.msra.gmra.mxu0 %v7305_v18  ;;  %v4735_v55 = vld [vmem:[#allocation10 + $0x358] sm:$0xf0]  ;;  %v6708_v16 = vld [vmem:[#allocation10 + $0x30c] sm:$0xf]  ;;  %v6501_v0 = vld [vmem:[#allocation8 + $0x28c] sm:$0xf0] }
  0x88   :  { %1302 = vmatpush.bf16.msrb.mxu0 %v4434_v56  ;;  %1271 = vmatmul.bf16.vlgmr.msra.gmra.mxu1 %v7307_v25  ;;  %v4354_v56 = vor.u32 %v6620_v47, %v4351_v48  ;;  %v4706_v31 = vor.u32 %v6708_v16, %v4703_v17  ;;  %v4901_v47 = vld [vmem:[#allocation8 + $0xa0] sm:$0xf]  ;;  %v6441_v48 = vld [vmem:[#allocation8 + $0xac] sm:$0xf0] }
  0x89   :  { %1315 = vmatpush.bf16.msrb.mxu1 %v4562_v57  ;;  %1284 = vmatmul.bf16.vlgmr.msra.gmra.mxu2 %v7299_v8  ;;  %v4482_v57 = vor.u32 %v6652_v49, %v4479_v51  ;;  %v5029_v49 = vld [vmem:[#allocation8 + $0x1a0] sm:$0xf]  ;;  %v6473_v51 = vld [vmem:[#allocation8 + $0x1ac] sm:$0xf0] }
  0x8a   :  { %1328 = vmatpush.bf16.msrb.mxu2 %v4690_v58  ;;  %1297 = vmatmul.bf16.vlgmr.msra.gmra.mxu3 %v7301_v9  ;;  %v4610_v58 = vor.u32 %v6684_v52, %v4607_v53  ;;  %v5157_v52 = vld [vmem:[#allocation8 + $0x2a0] sm:$0xf]  ;;  %v6505_v53 = vld [vmem:[#allocation8 + $0x2ac] sm:$0xf0] }
  0x8b   :  { %1341 = vmatpush.bf16.msrb.mxu3 %v4818_v62  ;;  %v4738_v62 = vor.u32 %v6716_v54, %v4735_v55  ;;  %v5285_v54 = vld [vmem:[#allocation8 + $0x3a0] sm:$0xf]  ;;  %v6537_v55 = vld [vmem:[#allocation8 + $0x3ac] sm:$0xf0] }
  0x8c   :  { %1303 = vmatpush.bf16.msrb.mxu0 %v4418_v4  ;;  %v4338_v4 = vor.u32 %v6616_v59, %v4335_v60  ;;  %v4885_v59 = vld [vmem:[#allocation8 + $0x80] sm:$0xf]  ;;  %v6437_v60 = vld [vmem:[#allocation8 + $0x8c] sm:$0xf0] }
  0x8d   :  { %1316 = vmatpush.bf16.msrb.mxu1 %v4546_v5  ;;  %v6612_v5 = vld [vmem:[#allocation10 + $0xc] sm:$0xf]  ;;  %v4869_v3 = vld [vmem:[#allocation8 + $0x60] sm:$0xf]  ;;  %v6529_v13 = vld [vmem:[#allocation8 + $0x36c] sm:$0xf0] }
  0x8e   :  { %1329 = vmatpush.bf16.msrb.mxu2 %v4674_v6  ;;  %v4319_v6 = vld [vmem:[#allocation10 + $0x18] sm:$0xf0]  ;;  %v4853_v17 = vld [vmem:[#allocation8 + $0x40] sm:$0xf] }
  0x8f   :  { %1342 = vmatpush.bf16.msrb.mxu3 %v4802_v12  ;;  %v4447_v12 = vld [vmem:[#allocation10 + $0x118] sm:$0xf0]  ;;  %v4322_v22 = vor.u32 %v6612_v5, %v4319_v6  ;;  %v4997_v5 = vld [vmem:[#allocation8 + $0x160] sm:$0xf] }
  0x90   :  { %1304 = vmatpush.bf16.msrb.mxu0 %v4402_v19  ;;  %v4933_v19 = vld [vmem:[#allocation8 + $0xe0] sm:$0xf]  ;;  %v4450_v27 = vor.u32 %v6644_v11, %v4447_v12  ;;  %v6497_v11 = vld [vmem:[#allocation8 + $0x26c] sm:$0xf0] }
  0x91   :  { %1317 = vmatpush.bf16.msrb.mxu1 %v4530_v20  ;;  %v6449_v20 = vld [vmem:[#allocation8 + $0xec] sm:$0xf0]  ;;  %v5253_v12 = vld [vmem:[#allocation8 + $0x360] sm:$0xf] }
  0x92   :  { %1330 = vmatpush.bf16.msrb.mxu2 %v4658_v21  ;;  %v5061_v21 = vld [vmem:[#allocation8 + $0x1e0] sm:$0xf] }
  0x93   :  { %1343 = vmatpush.bf16.msrb.mxu3 %v4786_v26  ;;  %v6513_v26 = vld [vmem:[#allocation8 + $0x2ec] sm:$0xf0] }
  0x94   :  { %1305 = vmatpush.bf16.msrb.mxu0 %v4386_v32  ;;  %v4934_v32 = vor.u32 %v6449_v20, %v4933_v19  ;;  %v6429_v19 = vld [vmem:[#allocation8 + $0x4c] sm:$0xf0]  ;;  %v4981_v20 = vld [vmem:[#allocation8 + $0x140] sm:$0xf] }
  0x95   :  { %1318 = vmatpush.bf16.msrb.mxu1 %v4514_v33  ;;  %v5062_v33 = vor.u32 %v6481_v23, %v5061_v21  ;;  %v5254_v21 = vor.u32 %v6529_v13, %v5253_v12  ;;  %v5109_v23 = vld [vmem:[#allocation8 + $0x240] sm:$0xf]  ;;  %v4919_v12 = vld [vmem:[#allocation8 + $0xd0] sm:$0xf0] }
  0x96   :  { %1331 = vmatpush.bf16.msrb.mxu2 %v4642_v34  ;;  %v5190_v34 = vor.u32 %v6513_v26, %v5189_v24  ;;  %v6493_v24 = vld [vmem:[#allocation8 + $0x24c] sm:$0xf0]  ;;  %v5237_v26 = vld [vmem:[#allocation8 + $0x340] sm:$0xf] }
  0x97   :  { %1344 = vmatpush.bf16.msrb.mxu3 %v4770_v38  ;;  %v5318_v38 = vor.u32 %v6545_v30, %v5317_v29  ;;  %v5110_v30 = vor.u32 %v6493_v24, %v5109_v23  ;;  %v6569_v23 = vld [vmem:[#allocation8 + $0x4ac] sm:$0xf0]  ;;  %v5541_v24 = vld [vmem:[#allocation8 + $0x5a0] sm:$0xf] }
  0x98   :  { %1306 = vmatpush.bf16.msrb.mxu0 %v4370_v44  ;;  %v4918_v44 = vor.u32 %v6445_v36, %v4917_v35  ;;  %v6457_v35 = vld [vmem:[#allocation8 + $0x12c] sm:$0xf0]  ;;  %v5093_v36 = vld [vmem:[#allocation8 + $0x220] sm:$0xf] }
  0x99   :  { %1319 = vmatpush.bf16.msrb.mxu1 %v4498_v45  ;;  %v5046_v45 = vor.u32 %v6477_v39, %v5045_v37  ;;  %v6489_v37 = vld [vmem:[#allocation8 + $0x22c] sm:$0xf0] }
  0x9a   :  { %1332 = vmatpush.bf16.msrb.mxu2 %v4626_v46  ;;  %v5174_v46 = vor.u32 %v6509_v41, %v5173_v40  ;;  %v6521_v39 = vld [vmem:[#allocation8 + $0x32c] sm:$0xf0]  ;;  %v4821_v41 = vld [vmem:[#allocation8] sm:$0xf] }
  0x9b   :  { %1345 = vmatpush.bf16.msrb.mxu3 %v4754_v50  ;;  %v5302_v50 = vor.u32 %v6541_v43, %v5301_v42  ;;  %v6421_v42 = vld [vmem:[#allocation8 + $0xc] sm:$0xf0] }
  0x9c   :  { %1307 = vmatpush.bf16.msrb.mxu0 %v4354_v56  ;;  %v4902_v56 = vor.u32 %v6441_v48, %v4901_v47  ;;  %v5077_v47 = vld [vmem:[#allocation8 + $0x200] sm:$0xf] }
  0x9d   :  { %1320 = vmatpush.bf16.msrb.mxu1 %v4482_v57  ;;  %v5030_v57 = vor.u32 %v6473_v51, %v5029_v49  ;;  %v6485_v49 = vld [vmem:[#allocation8 + $0x20c] sm:$0xf0] }
  0x9e   :  { %1333 = vmatpush.bf16.msrb.mxu2 %v4610_v58  ;;  %v5158_v58 = vor.u32 %v6505_v53, %v5157_v52  ;;  %v6517_v51 = vld [vmem:[#allocation8 + $0x30c] sm:$0xf0]  ;;  %v5445_v52 = vld [vmem:[#allocation8 + $0x4e0] sm:$0xf] }
  0x9f   :  { %1346 = vmatpush.bf16.msrb.mxu3 %v4738_v62  ;;  %v5286_v62 = vor.u32 %v6537_v55, %v5285_v54  ;;  %v6577_v53 = vld [vmem:[#allocation8 + $0x4ec] sm:$0xf0]  ;;  %v5573_v54 = vld [vmem:[#allocation8 + $0x5e0] sm:$0xf]  ;;  %v4822_v55 = vor.u32 %v6421_v42, %v4821_v41  ;;  %v4887_v41 = vld [vmem:[#allocation8 + $0x90] sm:$0xf0] }
  0xa0   :  { %1308 = vmatpush.bf16.msrb.mxu0 %v4338_v4  ;;  %v6433_v4 = vld [vmem:[#allocation8 + $0x6c] sm:$0xf0]  ;;  %v6467_v42 = vld [vmem:[#allocation8 + $0x184] sm:$0xf] }
  0xa1   :  { %1321 = vmatpush.bf16.msrb.mxu1 %v4466_v7  ;;  %v6465_v7 = vld [vmem:[#allocation8 + $0x16c] sm:$0xf0] }
  0xa2   :  { %1334 = vmatpush.bf16.msrb.mxu2 %v4594_v10  ;;  %v5125_v10 = vld [vmem:[#allocation8 + $0x260] sm:$0xf]  ;;  %v4998_v15 = vor.u32 %v6465_v7, %v4997_v5 }
  0xa3   :  { %1347 = vmatpush.bf16.msrb.mxu3 %v4722_v14  ;;  %v4870_v14 = vor.u32 %v6433_v4, %v4869_v3  ;;  %v5126_v16 = vor.u32 %v6497_v11, %v5125_v10  ;;  %v5429_v3 = vld [vmem:[#allocation8 + $0x4c0] sm:$0xf]  ;;  %v6573_v4 = vld [vmem:[#allocation8 + $0x4cc] sm:$0xf0]  ;;  %v6443_v11 = vld [vmem:[#allocation8 + $0xc4] sm:$0xf] }
  0xa4   :  { %1309 = vmatpush.bf16.msrb.mxu0 %v4322_v22  ;;  %v6461_v22 = vld [vmem:[#allocation8 + $0x14c] sm:$0xf0]  ;;  %v5557_v5 = vld [vmem:[#allocation8 + $0x5c0] sm:$0xf] }
  0xa5   :  { %1322 = vmatpush.bf16.msrb.mxu1 %v4450_v27  ;;  %v6525_v27 = vld [vmem:[#allocation8 + $0x34c] sm:$0xf0]  ;;  %v4982_v29 = vor.u32 %v6461_v22, %v4981_v20  ;;  %v5413_v22 = vld [vmem:[#allocation8 + $0x4a0] sm:$0xf] }
  0xa6   :  { %1335 = vmatpush.bf16.msrb.mxu2 %v4578_v28  ;;  %v4854_v28 = vor.u32 %v6429_v19, %v4853_v17  ;;  %v6605_v10 = vld [vmem:[#allocation8 + $0x5cc] sm:$0xf0]  ;;  %v5430_v19 = vor.u32 %v6573_v4, %v5429_v3 }
  0xa7   :  { %1348 = vmatpush.bf16.msrb.mxu3 %v4706_v31  ;;  %1310 = vmatmul.bf16.vlgmr.msrb.gmra.mxu0 %v7305_v18  ;;  %v6469_v18 = vld [vmem:[#allocation8 + $0x18c] sm:$0xf0]  ;;  %v4837_v31 = vld [vmem:[#allocation8 + $0x20] sm:$0xf]  ;;  %v5558_v20 = vor.u32 %v6605_v10, %v5557_v5 }
  0xa8   :  { %2314 = vmatpush.bf16.msra.mxu0 %v4934_v32  ;;  %1323 = vmatmul.bf16.vlgmr.msrb.gmra.mxu1 %v7307_v25  ;;  %v4886_v25 = vor.u32 %v6437_v60, %v4885_v59  ;;  %v5014_v2 = vor.u32 %v6469_v18, %v5013_v61  ;;  %v6425_v32 = vld [vmem:[#allocation8 + $0x2c] sm:$0xf0]  ;;  %v5078_v60 = vor.u32 %v6485_v49, %v5077_v47  ;;  %v6479_v61 = vld [vmem:[#allocation8 + $0x1e4] sm:$0xf]  ;;  %v5381_v47 = vld [vmem:[#allocation8 + $0x460] sm:$0xf] }
  0xa9   :  { %2327 = vmatpush.bf16.msra.mxu1 %v5062_v33  ;;  %1336 = vmatmul.bf16.vlgmr.msrb.gmra.mxu2 %v7299_v8  ;;  %v6533_v8 = vld [vmem:[#allocation8 + $0x38c] sm:$0xf0]  ;;  %v4965_v33 = vld [vmem:[#allocation8 + $0x120] sm:$0xf]  ;;  %v4838_v40 = vor.u32 %v6425_v32, %v4837_v31  ;;  %v5031_v31 = vld [vmem:[#allocation8 + $0x1b0] sm:$0xf0]  ;;  %v5414_v32 = vor.u32 %v6569_v23, %v5413_v22 }
  0xaa   :  { %2340 = vmatpush.bf16.msra.mxu2 %v5190_v34  ;;  %1349 = vmatmul.bf16.vlgmr.msrb.gmra.mxu3 %v7301_v9  ;;  %v5142_v9 = vor.u32 %v6501_v0, %v5141_v63  ;;  %v5270_v6 = vor.u32 %v6533_v8, %v5269_v1  ;;  %v5238_v34 = vor.u32 %v6525_v27, %v5237_v26  ;;  %v158_v18 = vld [vmem:[#allocation2] sm:$0xff]  ;;  %v160_v1 = vld [vmem:[#allocation2 + $0x10] sm:$0xff]  ;;  %v159_v8 = vld [vmem:[#allocation2 + $0x8] sm:$0xff] }
  0xab   :  { %2353 = vmatpush.bf16.msra.mxu3 %v5318_v38  ;;  %v5221_v38 = vld [vmem:[#allocation8 + $0x320] sm:$0xf]  ;;  %v4966_v43 = vor.u32 %v6457_v35, %v4965_v33  ;;  %v5446_v0 = vor.u32 %v6577_v53, %v5445_v52  ;;  %v7323_v7 = vpack.c.bf16 %v158_v18, %v158_v18  ;;  %v7325_v13 = vpack.c.bf16 %v160_v1, %v160_v1  ;;  %v6601_v27 = vld [vmem:[#allocation8 + $0x5ac] sm:$0xf0]  ;;  %v6431_v52 = vld [vmem:[#allocation8 + $0x64] sm:$0xf] }
  0xac   :  { %2315 = vmatpush.bf16.msra.mxu0 %v4918_v44  ;;  %v5094_v44 = vor.u32 %v6489_v37, %v5093_v36  ;;  %v5222_v48 = vor.u32 %v6521_v39, %v5221_v38  ;;  %v5542_v33 = vor.u32 %v6601_v27, %v5541_v24  ;;  %v5397_v35 = vld [vmem:[#allocation8 + $0x480] sm:$0xf]  ;;  %v6565_v36 = vld [vmem:[#allocation8 + $0x48c] sm:$0xf0]  ;;  %v4871_v53 = vld [vmem:[#allocation8 + $0x70] sm:$0xf0] }
  0xad   :  { %2328 = vmatpush.bf16.msra.mxu1 %v5046_v45  ;;  %v4949_v45 = vld [vmem:[#allocation8 + $0x100] sm:$0xf]  ;;  %v6597_v39 = vld [vmem:[#allocation8 + $0x58c] sm:$0xf0]  ;;  %v6459_v1 = vld [vmem:[#allocation8 + $0x144] sm:$0xf] }
  0xae   :  { %2341 = vmatpush.bf16.msra.mxu2 %v5174_v46  ;;  %v6453_v46 = vld [vmem:[#allocation8 + $0x10c] sm:$0xf0]  ;;  %v5525_v37 = vld [vmem:[#allocation8 + $0x580] sm:$0xf]  ;;  %v6455_v22 = vld [vmem:[#allocation8 + $0x124] sm:$0xf] }
  0xaf   :  { %2354 = vmatpush.bf16.msra.mxu3 %v5302_v50  ;;  %v5205_v50 = vld [vmem:[#allocation8 + $0x300] sm:$0xf]  ;;  %v4950_v59 = vor.u32 %v6453_v46, %v4949_v45  ;;  %v5526_v45 = vor.u32 %v6597_v39, %v5525_v37  ;;  %v6589_v18 = vld [vmem:[#allocation8 + $0x54c] sm:$0xf0]  ;;  %v4967_v23 = vld [vmem:[#allocation8 + $0x130] sm:$0xf0] }
  0xb0   :  { %2316 = vmatpush.bf16.msra.mxu0 %v4902_v56  ;;  %v6609_v56 = vld [vmem:[#allocation8 + $0x5ec] sm:$0xf0]  ;;  %v5206_v63 = vor.u32 %v6517_v51, %v5205_v50  ;;  %v5509_v49 = vld [vmem:[#allocation8 + $0x560] sm:$0xf]  ;;  %v6451_v37 = vld [vmem:[#allocation8 + $0x104] sm:$0xf] }
  0xb1   :  { %2329 = vmatpush.bf16.msra.mxu1 %v5030_v57  ;;  %v6447_v57 = vld [vmem:[#allocation8 + $0xe4] sm:$0xf]  ;;  %v6593_v51 = vld [vmem:[#allocation8 + $0x56c] sm:$0xf0]  ;;  %v5349_v5 = vld [vmem:[#allocation8 + $0x420] sm:$0xf] }
  0xb2   :  { %2342 = vmatpush.bf16.msra.mxu2 %v5158_v58  ;;  %v4935_v58 = vld [vmem:[#allocation8 + $0xf0] sm:$0xf0]  ;;  %v5477_v10 = vld [vmem:[#allocation8 + $0x520] sm:$0xf]  ;;  %v6511_v39 = vld [vmem:[#allocation8 + $0x2e4] sm:$0xf] }
  0xb3   :  { %2355 = vmatpush.bf16.msra.mxu3 %v5286_v62  ;;  %v5063_v62 = vld [vmem:[#allocation8 + $0x1f0] sm:$0xf0]  ;;  %v5333_v27 = vld [vmem:[#allocation8 + $0x400] sm:$0xf] }
  0xb4   :  { %2317 = vmatpush.bf16.msra.mxu0 %v4886_v25  ;;  %v161_v25 = vld [vmem:[#allocation2 + $0x18] sm:$0xff] }
  0xb5   :  { %2330 = vmatpush.bf16.msra.mxu1 %v5014_v2  ;;  %v5574_v2 = vor.u32 %v6609_v56, %v5573_v54  ;;  %v7329_v17 = vpack.c.bf16 %v161_v25, %v161_v25  ;;  %v6463_v54 = vld [vmem:[#allocation8 + $0x164] sm:$0xf] }
  0xb6   :  { %2343 = vmatpush.bf16.msra.mxu2 %v5142_v9  ;;  %v4938_v9 = vor.u32 %v6447_v57, %v4935_v58  ;;  %v5510_v57 = vor.u32 %v6593_v51, %v5509_v49  ;;  %v4874_v58 = vor.u32 %v6431_v52, %v4871_v53  ;;  %v5575_v51 = vld [vmem:[#allocation8 + $0x5f0] sm:$0xf0] }
  0xb7   :  { %2356 = vmatpush.bf16.msra.mxu3 %v5270_v6  ;;  %v5066_v6 = vor.u32 %v6479_v61, %v5063_v62  ;;  %v5493_v61 = vld [vmem:[#allocation8 + $0x540] sm:$0xf]  ;;  %v162_v52 = vld [vmem:[#allocation2 + $0x20] sm:$0xff] }
  0xb8   :  { %2318 = vmatpush.bf16.msra.mxu0 %v4870_v14  ;;  %v7327_v14 = vpack.c.bf16 %v159_v8, %v159_v8  ;;  %v4983_v8 = vld [vmem:[#allocation8 + $0x150] sm:$0xf0]  ;;  %v5494_v3 = vor.u32 %v6589_v18, %v5493_v61 }
  0xb9   :  { %2331 = vmatpush.bf16.msra.mxu1 %v4998_v15  ;;  %v6475_v15 = vld [vmem:[#allocation8 + $0x1c4] sm:$0xf]  ;;  %v5175_v61 = vld [vmem:[#allocation8 + $0x2d0] sm:$0xf0] }
  0xba   :  { %2344 = vmatpush.bf16.msra.mxu2 %v5126_v16  ;;  %v5047_v16 = vld [vmem:[#allocation8 + $0x1d0] sm:$0xf0] }
  0xbb   :  { %2357 = vmatpush.bf16.msra.mxu3 %v5254_v21  ;;  %v4922_v21 = vor.u32 %v6443_v11, %v4919_v12  ;;  %v5050_v26 = vor.u32 %v6475_v15, %v5047_v16  ;;  %v4986_v12 = vor.u32 %v6459_v1, %v4983_v8  ;;  %v6585_v15 = vld [vmem:[#allocation8 + $0x52c] sm:$0xf0]  ;;  %v6423_v16 = vld [vmem:[#allocation8 + $0x24] sm:$0xf]  ;;  %v5431_v8 = vld [vmem:[#allocation8 + $0x4d0] sm:$0xf0] }
  0xbc   :  { %2319 = vmatpush.bf16.msra.mxu0 %v4854_v28  ;;  %v6439_v28 = vld [vmem:[#allocation8 + $0xa4] sm:$0xf] }
  0xbd   :  { %2332 = vmatpush.bf16.msra.mxu1 %v4982_v29  ;;  %v4903_v29 = vld [vmem:[#allocation8 + $0xb0] sm:$0xf0]  ;;  %v6571_v1 = vld [vmem:[#allocation8 + $0x4c4] sm:$0xf] }
  0xbe   :  { %2345 = vmatpush.bf16.msra.mxu2 %v5110_v30  ;;  %v6471_v30 = vld [vmem:[#allocation8 + $0x1a4] sm:$0xf] }
  0xbf   :  { %2358 = vmatpush.bf16.msra.mxu3 %v5238_v34  ;;  %v4906_v34 = vor.u32 %v6439_v28, %v4903_v29  ;;  %v5034_v38 = vor.u32 %v6471_v30, %v5031_v31  ;;  %v6549_v28 = vld [vmem:[#allocation8 + $0x40c] sm:$0xf0]  ;;  %v5478_v29 = vor.u32 %v6585_v15, %v5477_v10  ;;  %v5461_v31 = vld [vmem:[#allocation8 + $0x500] sm:$0xf]  ;;  %v5159_v10 = vld [vmem:[#allocation8 + $0x2b0] sm:$0xf0] }
  0xc0   :  { %2320 = vmatpush.bf16.msra.mxu0 %v4838_v40  ;;  %v6435_v40 = vld [vmem:[#allocation8 + $0x84] sm:$0xf]  ;;  %v5287_v15 = vld [vmem:[#allocation8 + $0x3b0] sm:$0xf0] }
  0xc1   :  { %2333 = vmatpush.bf16.msra.mxu1 %v4966_v43  ;;  %v5015_v43 = vld [vmem:[#allocation8 + $0x190] sm:$0xf0]  ;;  %v4890_v46 = vor.u32 %v6435_v40, %v4887_v41  ;;  %v6543_v41 = vld [vmem:[#allocation8 + $0x3e4] sm:$0xf] }
  0xc2   :  { %2346 = vmatpush.bf16.msra.mxu2 %v5094_v44  ;;  %v5398_v44 = vor.u32 %v6565_v36, %v5397_v35  ;;  %v5018_v50 = vor.u32 %v6467_v42, %v5015_v43  ;;  %v4970_v35 = vor.u32 %v6455_v22, %v4967_v23  ;;  %v4823_v36 = vld [vmem:[#allocation8 + $0x10] sm:$0xf0]  ;;  %v5334_v43 = vor.u32 %v6549_v28, %v5333_v27  ;;  %v6531_v28 = vld [vmem:[#allocation8 + $0x384] sm:$0xf] }
  0xc3   :  { %2359 = vmatpush.bf16.msra.mxu3 %v5222_v48  ;;  %v6561_v48 = vld [vmem:[#allocation8 + $0x46c] sm:$0xf0]  ;;  %v5191_v40 = vld [vmem:[#allocation8 + $0x2f0] sm:$0xf0] }
  0xc4   :  { %2321 = vmatpush.bf16.msra.mxu0 %v4822_v55  ;;  %v4999_v55 = vld [vmem:[#allocation8 + $0x170] sm:$0xf0]  ;;  %v5382_v56 = vor.u32 %v6561_v48, %v5381_v47 }
  0xc5   :  { %2334 = vmatpush.bf16.msra.mxu1 %v4950_v59  ;;  %v5365_v59 = vld [vmem:[#allocation8 + $0x440] sm:$0xf]  ;;  %v5002_v62 = vor.u32 %v6463_v54, %v4999_v55  ;;  %v5194_v54 = vor.u32 %v6511_v39, %v5191_v40  ;;  %v163_v55 = vld [vmem:[#allocation2 + $0x28] sm:$0xff]  ;;  %v5143_v27 = vld [vmem:[#allocation8 + $0x290] sm:$0xf0] }
  0xc6   :  { %2347 = vmatpush.bf16.msra.mxu2 %v5078_v60  ;;  %v6557_v60 = vld [vmem:[#allocation8 + $0x44c] sm:$0xf0]  ;;  %v6495_v40 = vld [vmem:[#allocation8 + $0x264] sm:$0xf] }
  0xc7   :  { %2360 = vmatpush.bf16.msra.mxu3 %v5206_v63  ;;  %2322 = vmatmul.bf16.vlgmr.msra.gmra.mxu0 %v7323_v7  ;;  %v6427_v63 = vld [vmem:[#allocation8 + $0x44] sm:$0xf] }
  0xc8   :  { %2366 = vmatpush.bf16.msrb.mxu0 %v5446_v0  ;;  %2335 = vmatmul.bf16.vlgmr.msra.gmra.mxu1 %v7327_v14  ;;  %v4855_v0 = vld [vmem:[#allocation8 + $0x50] sm:$0xf0] }
  0xc9   :  { %2379 = vmatpush.bf16.msrb.mxu1 %v5574_v2  ;;  %2348 = vmatmul.bf16.vlgmr.msra.gmra.mxu2 %v7325_v13  ;;  %v5366_v2 = vor.u32 %v6557_v60, %v5365_v59  ;;  %v4858_v4 = vor.u32 %v6427_v63, %v4855_v0  ;;  %v6507_v60 = vld [vmem:[#allocation8 + $0x2c4] sm:$0xf]  ;;  %v7337_v63 = vpack.c.bf16 %v162_v52, %v162_v52  ;;  %v5303_v0 = vld [vmem:[#allocation8 + $0x3d0] sm:$0xf0] }
  0xca   :  { %2392 = vmatpush.bf16.msrb.mxu2 %v4938_v9  ;;  %2361 = vmatmul.bf16.vlgmr.msra.gmra.mxu3 %v7329_v17  ;;  %v1155_v25 = vpop.f32.mrf.mxu0  ;;  %v1168_v9 = vpop.f32.mrf.mxu1 }
  0xcb   :  { %2405 = vmatpush.bf16.msrb.mxu3 %v5066_v6  ;;  %v6553_v6 = vld [vmem:[#allocation8 + $0x42c] sm:$0xf0]  ;;  %v1169_v11 = vadd.f32 %v1168_v9, %v1155_v25  ;;  %v7339_v25 = vpack.c.bf16 %v163_v55, %v163_v55  ;;  %v5559_v9 = vld [vmem:[#allocation8 + $0x5d0] sm:$0xf0] }
  0xcc   :  { %2367 = vmatpush.bf16.msrb.mxu0 %v5430_v19  ;;  %v4839_v19 = vld [vmem:[#allocation8 + $0x30] sm:$0xf0] }
  0xcd   :  { %2380 = vmatpush.bf16.msrb.mxu1 %v5558_v20  ;;  %v4842_v30 = vor.u32 %v6423_v16, %v4839_v19  ;;  %v6567_v16 = vld [vmem:[#allocation8 + $0x4a4] sm:$0xf]  ;;  %v5415_v19 = vld [vmem:[#allocation8 + $0x4b0] sm:$0xf0] }
  0xce   :  { %2393 = vmatpush.bf16.msrb.mxu2 %v4922_v21  ;;  %v1181_v20 = vpop.f32.mrf.mxu2  ;;  %v1194_v21 = vpop.f32.mrf.mxu3  ;;  %v5111_v55 = vld [vmem:[#allocation8 + $0x250] sm:$0xf0] }
  0xcf   :  { %2406 = vmatpush.bf16.msrb.mxu3 %v5050_v26  ;;  %v1182_v24 = vadd.f32 %v1181_v20, %v1169_v11  ;;  %v5350_v26 = vor.u32 %v6553_v6, %v5349_v5  ;;  %v5434_v5 = vor.u32 %v6571_v1, %v5431_v8  ;;  %v6503_v6 = vld [vmem:[#allocation8 + $0x2a4] sm:$0xf]  ;;  %v5495_v1 = vld [vmem:[#allocation8 + $0x550] sm:$0xf0] }
  0xd0   :  { %2368 = vmatpush.bf16.msrb.mxu0 %v5414_v32  ;;  %v6581_v32 = vld [vmem:[#allocation8 + $0x50c] sm:$0xf0]  ;;  %v6535_v11 = vld [vmem:[#allocation8 + $0x3a4] sm:$0xf]  ;;  %v5162_v22 = vor.u32 %v6503_v6, %v5159_v10  ;;  %v5095_v6 = vld [vmem:[#allocation8 + $0x230] sm:$0xf0] }
  0xd1   :  { %2381 = vmatpush.bf16.msrb.mxu1 %v5542_v33  ;;  %v6419_v33 = vld [vmem:[#allocation8 + $0x4] sm:$0xf]  ;;  %v5462_v48 = vor.u32 %v6581_v32, %v5461_v31  ;;  %v5290_v23 = vor.u32 %v6535_v11, %v5287_v15  ;;  %v5399_v32 = vld [vmem:[#allocation8 + $0x490] sm:$0xf0] }
  0xd2   :  { %2394 = vmatpush.bf16.msrb.mxu2 %v4906_v34  ;;  %v7335_v34 = vadd.f32 %v1194_v21, %v1182_v24  ;;  %v1157_v42 = vpop.f32.mrf.mxu0  ;;  %v1170_v47 = vpop.f32.mrf.mxu1  ;;  %v4826_v49 = vor.u32 %v6419_v33, %v4823_v36  ;;  %v6599_v20 = vld [vmem:[#allocation8 + $0x5a4] sm:$0xf]  ;;  %v5543_v21 = vld [vmem:[#allocation8 + $0x5b0] sm:$0xf0]  ;;  %v5418_v24 = vor.u32 %v6567_v16, %v5415_v19 }
  0xd3   :  { %2407 = vmatpush.bf16.msrb.mxu3 %v5034_v38  ;;  %v4951_v38 = vld [vmem:[#allocation8 + $0x110] sm:$0xf0]  ;;  %v6563_v31 = vld [vmem:[#allocation8 + $0x484] sm:$0xf] }
  0xd4   :  { %2369 = vmatpush.bf16.msrb.mxu0 %v5398_v44  ;;  %v5319_v44 = vld [vmem:[#allocation8 + $0x3f0] sm:$0xf0]  ;;  %v4954_v53 = vor.u32 %v6451_v37, %v4951_v38  ;;  %v6595_v33 = vld [vmem:[#allocation8 + $0x584] sm:$0xf]  ;;  %v5402_v39 = vor.u32 %v6563_v31, %v5399_v32 }
  0xd5   :  { %2382 = vmatpush.bf16.msrb.mxu1 %v5526_v45  ;;  %v6575_v45 = vld [vmem:[#allocation8 + $0x4e4] sm:$0xf]  ;;  %v5383_v47 = vld [vmem:[#allocation8 + $0x470] sm:$0xf0] }
  0xd6   :  { %2395 = vmatpush.bf16.msrb.mxu2 %v4890_v46  ;;  %v5447_v46 = vld [vmem:[#allocation8 + $0x4f0] sm:$0xf0]  ;;  %v6527_v42 = vld [vmem:[#allocation8 + $0x364] sm:$0xf] }
  0xd7   :  { %2408 = vmatpush.bf16.msrb.mxu3 %v5018_v50  ;;  %v6607_v50 = vld [vmem:[#allocation8 + $0x5e4] sm:$0xf]  ;;  %v5450_v59 = vor.u32 %v6575_v45, %v5447_v46  ;;  %v5255_v45 = vld [vmem:[#allocation8 + $0x370] sm:$0xf0] }
  0xd8   :  { %2370 = vmatpush.bf16.msrb.mxu0 %v5382_v56  ;;  %v1183_v56 = vpop.f32.mrf.mxu2  ;;  %v5578_v18 = vor.u32 %v6607_v50, %v5575_v51  ;;  %v6559_v46 = vld [vmem:[#allocation8 + $0x464] sm:$0xf]  ;;  %v5511_v50 = vld [vmem:[#allocation8 + $0x570] sm:$0xf0]  ;;  %v5258_v52 = vor.u32 %v6527_v42, %v5255_v45  ;;  %v6482_v42 = vld [vmem:[#allocation8 + $0x1f4] sm:$0xf0] }
  0xd9   :  { %2383 = vmatpush.bf16.msrb.mxu1 %v5510_v57  ;;  %v1196_v57 = vpop.f32.mrf.mxu3  ;;  %v6523_v56 = vld [vmem:[#allocation8 + $0x344] sm:$0xf]  ;;  %v5223_v15 = vld [vmem:[#allocation8 + $0x330] sm:$0xf0] }
  0xda   :  { %2396 = vmatpush.bf16.msrb.mxu2 %v4874_v58  ;;  %v5322_v58 = vor.u32 %v6543_v41, %v5319_v44  ;;  %v5127_v41 = vld [vmem:[#allocation8 + $0x270] sm:$0xf0]  ;;  %v6519_v10 = vld [vmem:[#allocation8 + $0x324] sm:$0xf] }
  0xdb   :  { %2409 = vmatpush.bf16.msrb.mxu3 %v5002_v62  ;;  %v6539_v62 = vld [vmem:[#allocation8 + $0x3c4] sm:$0xf]  ;;  %v5130_v51 = vor.u32 %v6495_v40, %v5127_v41  ;;  %v5351_v19 = vld [vmem:[#allocation8 + $0x430] sm:$0xf0]  ;;  %v5069_v40 = vld [vmem:[#allocation8 + $0x1e8] sm:$0xf] }
  0xdc   :  { %2371 = vmatpush.bf16.msrb.mxu0 %v5366_v2  ;;  %v6603_v2 = vld [vmem:[#allocation8 + $0x5c4] sm:$0xf] }
  0xdd   :  { %2384 = vmatpush.bf16.msrb.mxu1 %v5494_v3  ;;  %v5178_v3 = vor.u32 %v6507_v60, %v5175_v61  ;;  %v6555_v60 = vld [vmem:[#allocation8 + $0x444] sm:$0xf]  ;;  %v5367_v61 = vld [vmem:[#allocation8 + $0x450] sm:$0xf0] }
  0xde   :  { %2397 = vmatpush.bf16.msrb.mxu2 %v4858_v4  ;;  %v5306_v4 = vor.u32 %v6539_v62, %v5303_v0  ;;  %v6587_v0 = vld [vmem:[#allocation8 + $0x544] sm:$0xf] }
  0xdf   :  { %2410 = vmatpush.bf16.msrb.mxu3 %v4986_v12  ;;  %v5562_v12 = vor.u32 %v6603_v2, %v5559_v9  ;;  %v6551_v16 = vld [vmem:[#allocation8 + $0x424] sm:$0xf] }
  0xe0   :  { %2372 = vmatpush.bf16.msrb.mxu0 %v5350_v26  ;;  %v6499_v26 = vld [vmem:[#allocation8 + $0x284] sm:$0xf] }
  0xe1   :  { %2385 = vmatpush.bf16.msrb.mxu1 %v5478_v29  ;;  %v5546_v29 = vor.u32 %v6599_v20, %v5543_v21  ;;  %v5146_v36 = vor.u32 %v6499_v26, %v5143_v27  ;;  %v6583_v20 = vld [vmem:[#allocation8 + $0x524] sm:$0xf]  ;;  %v5479_v21 = vld [vmem:[#allocation8 + $0x530] sm:$0xf0]  ;;  %v5226_v26 = vor.u32 %v6519_v10, %v5223_v15  ;;  %v5354_v27 = vor.u32 %v6551_v16, %v5351_v19  ;;  %v5293_v10 = vld [vmem:[#allocation8 + $0x3a8] sm:$0xf] }
  0xe2   :  { %2398 = vmatpush.bf16.msrb.mxu2 %v4842_v30  ;;  %v5271_v30 = vld [vmem:[#allocation8 + $0x390] sm:$0xf0]  ;;  %v5482_v32 = vor.u32 %v6583_v20, %v5479_v21  ;;  %v4893_v19 = vld [vmem:[#allocation8 + $0x88] sm:$0xf]  ;;  %v6438_v20 = vld [vmem:[#allocation8 + $0x94] sm:$0xf0] }
  0xe3   :  { %2411 = vmatpush.bf16.msrb.mxu3 %v4970_v35  ;;  %v5527_v35 = vld [vmem:[#allocation8 + $0x590] sm:$0xf0]  ;;  %v5274_v38 = vor.u32 %v6531_v28, %v5271_v30  ;;  %v6515_v28 = vld [vmem:[#allocation8 + $0x304] sm:$0xf]  ;;  %v5021_v21 = vld [vmem:[#allocation8 + $0x188] sm:$0xf] }
  0xe4   :  { %2373 = vmatpush.bf16.msrb.mxu0 %v5334_v43  ;;  %v1207_v37 = vpop.f32.mrf.mxu0  ;;  %v5530_v44 = vor.u32 %v6595_v33, %v5527_v35  ;;  %v6547_v30 = vld [vmem:[#allocation8 + $0x404] sm:$0xf]  ;;  %v5335_v33 = vld [vmem:[#allocation8 + $0x410] sm:$0xf0] }
  0xe5   :  { %2386 = vmatpush.bf16.msrb.mxu1 %v5462_v48  ;;  %v1220_v43 = vpop.f32.mrf.mxu1  ;;  %v6579_v35 = vld [vmem:[#allocation8 + $0x504] sm:$0xf] }
  0xe6   :  { %2399 = vmatpush.bf16.msrb.mxu2 %v4826_v49  ;;  %v1221_v48 = vadd.f32 %v1220_v43, %v1207_v37  ;;  %v6591_v49 = vld [vmem:[#allocation8 + $0x564] sm:$0xf]  ;;  %v5197_v43 = vld [vmem:[#allocation8 + $0x2e8] sm:$0xf] }
  0xe7   :  { %2412 = vmatpush.bf16.msrb.mxu3 %v4954_v53  ;;  %2374 = vmatmul.bf16.vlgmr.msrb.gmra.mxu0 %v7337_v63  ;;  %v5386_v53 = vor.u32 %v6559_v46, %v5383_v47  ;;  %v5338_v46 = vor.u32 %v6547_v30, %v5335_v33  ;;  %v5325_v47 = vld [vmem:[#allocation8 + $0x3e8] sm:$0xf] }
  0xe8   :  { %2418 = vmatpush.bf16.msra.mxu0 %v5194_v54  ;;  %2387 = vmatmul.bf16.vlgmr.msrb.gmra.mxu1 %v7339_v25  ;;  %v6491_v54 = vld [vmem:[#allocation8 + $0x244] sm:$0xf]  ;;  %v4877_v33 = vld [vmem:[#allocation8 + $0x68] sm:$0xf] }
  0xe9   :  { %2431 = vmatpush.bf16.msra.mxu1 %v5322_v58  ;;  %2400 = vmatmul.bf16.vlgmr.msrb.gmra.mxu2 %v7323_v7  ;;  %v5514_v58 = vor.u32 %v6591_v49, %v5511_v50  ;;  %v5114_v8 = vor.u32 %v6491_v54, %v5111_v55  ;;  %v6446_v54 = vld [vmem:[#allocation8 + $0xd4] sm:$0xf0]  ;;  %v5053_v55 = vld [vmem:[#allocation8 + $0x1c8] sm:$0xf] }
  0xea   :  { %2444 = vmatpush.bf16.msra.mxu2 %v5450_v59  ;;  %2413 = vmatmul.bf16.vlgmr.msrb.gmra.mxu3 %v7327_v14  ;;  %v5239_v59 = vld [vmem:[#allocation8 + $0x350] sm:$0xf0] }
  0xeb   :  { %2457 = vmatpush.bf16.msra.mxu3 %v5578_v18 }
  0xec   :  { %2419 = vmatpush.bf16.msra.mxu0 %v5178_v3  ;;  %v1233_v57 = vpop.f32.mrf.mxu2  ;;  %v1209_v9 = vpop.f32.mrf.mxu0  ;;  %v5242_v3 = vor.u32 %v6523_v56, %v5239_v59  ;;  %v6510_v59 = vld [vmem:[#allocation8 + $0x2d4] sm:$0xf0] }
  0xed   :  { %2432 = vmatpush.bf16.msra.mxu1 %v5306_v4  ;;  %v1234_v62 = vadd.f32 %v1233_v57, %v1221_v48  ;;  %v1246_v18 = vpop.f32.mrf.mxu3  ;;  %v5370_v4 = vor.u32 %v6555_v60, %v5367_v61  ;;  %v1222_v11 = vpop.f32.mrf.mxu1  ;;  %v6546_v48 = vld [vmem:[#allocation8 + $0x3f4] sm:$0xf0]  ;;  %v5309_v60 = vld [vmem:[#allocation8 + $0x3c8] sm:$0xf] }
  0xee   :  { %2445 = vmatpush.bf16.msra.mxu2 %v5434_v5  ;;  %v6487_v5 = vld [vmem:[#allocation8 + $0x224] sm:$0xf]  ;;  %v5326_v56 = vor.u32 %v6546_v48, %v5325_v47  ;;  %v6478_v57 = vld [vmem:[#allocation8 + $0x1d4] sm:$0xf0]  ;;  %v5037_v9 = vld [vmem:[#allocation8 + $0x1a8] sm:$0xf] }
  0xef   :  { %2458 = vmatpush.bf16.msra.mxu3 %v5562_v12  ;;  %v7345_v2 = vadd.f32 %v1246_v18, %v1234_v62  ;;  %v5498_v12 = vor.u32 %v6587_v0, %v5495_v1  ;;  %v6542_v61 = vld [vmem:[#allocation8 + $0x3d4] sm:$0xf0]  ;;  %v5054_v18 = vor.u32 %v6478_v57, %v5053_v55  ;;  %v4909_v1 = vld [vmem:[#allocation8 + $0xa8] sm:$0xf] }
  0xf0   :  { %2420 = vmatpush.bf16.msra.mxu0 %v5162_v22  ;;  %v5098_v22 = vor.u32 %v6487_v5, %v5095_v6  ;;  %v5165_v5 = vld [vmem:[#allocation8 + $0x2a8] sm:$0xf]  ;;  %v6506_v6 = vld [vmem:[#allocation8 + $0x2b4] sm:$0xf0] }
  0xf1   :  { %2433 = vmatpush.bf16.msra.mxu1 %v5290_v23  ;;  %v6483_v23 = vld [vmem:[#allocation8 + $0x204] sm:$0xf]  ;;  %v6538_v11 = vld [vmem:[#allocation8 + $0x3b4] sm:$0xf0]  ;;  %v5166_v16 = vor.u32 %v6506_v6, %v5165_v5  ;;  %v4861_v48 = vld [vmem:[#allocation8 + $0x48] sm:$0xf] }
  0xf2   :  { %2446 = vmatpush.bf16.msra.mxu2 %v5418_v24  ;;  %v5079_v24 = vld [vmem:[#allocation8 + $0x210] sm:$0xf0]  ;;  %v6494_v55 = vld [vmem:[#allocation8 + $0x254] sm:$0xf0]  ;;  %v5101_v6 = vld [vmem:[#allocation8 + $0x228] sm:$0xf] }
  0xf3   :  { %2459 = vmatpush.bf16.msra.mxu3 %v5546_v29  ;;  %v5207_v29 = vld [vmem:[#allocation8 + $0x310] sm:$0xf0]  ;;  %v5082_v41 = vor.u32 %v6483_v23, %v5079_v24  ;;  %v6470_v23 = vld [vmem:[#allocation8 + $0x194] sm:$0xf0]  ;;  %v5149_v24 = vld [vmem:[#allocation8 + $0x288] sm:$0xf] }
  0xf4   :  { %2421 = vmatpush.bf16.msra.mxu0 %v5146_v36  ;;  %v1235_v31 = vpop.f32.mrf.mxu2  ;;  %v5463_v36 = vld [vmem:[#allocation8 + $0x510] sm:$0xf0]  ;;  %v5210_v45 = vor.u32 %v6515_v28, %v5207_v29  ;;  %v6534_v28 = vld [vmem:[#allocation8 + $0x394] sm:$0xf0]  ;;  %v4894_v29 = vor.u32 %v6438_v20, %v4893_v19 }
  0xf5   :  { %2434 = vmatpush.bf16.msra.mxu1 %v5274_v38  ;;  %v1248_v37 = vpop.f32.mrf.mxu3  ;;  %v4941_v38 = vld [vmem:[#allocation8 + $0xe8] sm:$0xf]  ;;  %v5466_v49 = vor.u32 %v6579_v35, %v5463_v36  ;;  %v5022_v31 = vor.u32 %v6470_v23, %v5021_v21  ;;  %v6434_v35 = vld [vmem:[#allocation8 + $0x74] sm:$0xf0] }
  0xf6   :  { %2447 = vmatpush.bf16.msra.mxu2 %v5402_v39  ;;  %v6450_v39 = vld [vmem:[#allocation8 + $0xf4] sm:$0xf0]  ;;  %v5005_v36 = vld [vmem:[#allocation8 + $0x168] sm:$0xf] }
  0xf7   :  { %2460 = vmatpush.bf16.msra.mxu3 %v5530_v44  ;;  %v6514_v44 = vld [vmem:[#allocation8 + $0x2f4] sm:$0xf0]  ;;  %v4942_v50 = vor.u32 %v6450_v39, %v4941_v38 }
  0xf8   :  { %2422 = vmatpush.bf16.msra.mxu0 %v5130_v51  ;;  %v5070_v51 = vor.u32 %v6482_v42, %v5069_v40  ;;  %v6466_v39 = vld [vmem:[#allocation8 + $0x174] sm:$0xf0]  ;;  %v5133_v40 = vld [vmem:[#allocation8 + $0x268] sm:$0xf] }
  0xf9   :  { %2435 = vmatpush.bf16.msra.mxu1 %v5258_v52  ;;  %v5198_v52 = vor.u32 %v6514_v44, %v5197_v43  ;;  %v5261_v43 = vld [vmem:[#allocation8 + $0x368] sm:$0xf]  ;;  %v6530_v44 = vld [vmem:[#allocation8 + $0x374] sm:$0xf0] }
  0xfa   :  { %2448 = vmatpush.bf16.msra.mxu2 %v5386_v53  ;;  %v4925_v53 = vld [vmem:[#allocation8 + $0xc8] sm:$0xf]  ;;  %v6458_v5 = vld [vmem:[#allocation8 + $0x134] sm:$0xf0] }
  0xfb   :  { %2461 = vmatpush.bf16.msra.mxu3 %v5514_v58  ;;  %v5181_v58 = vld [vmem:[#allocation8 + $0x2c8] sm:$0xf]  ;;  %v4926_v62 = vor.u32 %v6446_v54, %v4925_v53  ;;  %v6462_v53 = vld [vmem:[#allocation8 + $0x154] sm:$0xf0] }
  0xfc   :  { %2423 = vmatpush.bf16.msra.mxu0 %v5114_v8  ;;  %v5182_v0 = vor.u32 %v6510_v59, %v5181_v58  ;;  %v6442_v8 = vld [vmem:[#allocation8 + $0xb4] sm:$0xf0]  ;;  %v5117_v54 = vld [vmem:[#allocation8 + $0x248] sm:$0xf] }
  0xfd   :  { %2436 = vmatpush.bf16.msra.mxu1 %v5242_v3  ;;  %v5310_v3 = vor.u32 %v6542_v61, %v5309_v60  ;;  %v5245_v58 = vld [vmem:[#allocation8 + $0x348] sm:$0xf]  ;;  %v6526_v59 = vld [vmem:[#allocation8 + $0x354] sm:$0xf0] }
  0xfe   :  { %2449 = vmatpush.bf16.msra.mxu2 %v5370_v4  ;;  %v6474_v4 = vld [vmem:[#allocation8 + $0x1b4] sm:$0xf0] }
  0xff   :  { %2462 = vmatpush.bf16.msra.mxu3 %v5498_v12  ;;  %v4910_v12 = vor.u32 %v6442_v8, %v4909_v1  ;;  %v5038_v15 = vor.u32 %v6474_v4, %v5037_v9  ;;  %v4845_v1 = vld [vmem:[#allocation8 + $0x28] sm:$0xf]  ;;  %v6426_v8 = vld [vmem:[#allocation8 + $0x34] sm:$0xf0]  ;;  %v5246_v4 = vor.u32 %v6526_v59, %v5245_v58 }
 0x100   :  { %2424 = vmatpush.bf16.msra.mxu0 %v5098_v22  ;;  %v5294_v22 = vor.u32 %v6538_v11, %v5293_v10  ;;  %v4973_v9 = vld [vmem:[#allocation8 + $0x128] sm:$0xf]  ;;  %v6490_v10 = vld [vmem:[#allocation8 + $0x234] sm:$0xf0] }
 0x101   :  { %2437 = vmatpush.bf16.msra.mxu1 %v5226_v26  ;;  %v6502_v26 = vld [vmem:[#allocation8 + $0x294] sm:$0xf0]  ;;  %v5229_v11 = vld [vmem:[#allocation8 + $0x328] sm:$0xf]  ;;  %v4974_v20 = vor.u32 %v6458_v5, %v4973_v9  ;;  %v5102_v21 = vor.u32 %v6490_v10, %v5101_v6  ;;  %v4911_v9 = vld [vmem:[#allocation8 + $0xb8] sm:$0xf0] }
 0x102   :  { %2450 = vmatpush.bf16.msra.mxu2 %v5354_v27  ;;  %v5277_v27 = vld [vmem:[#allocation8 + $0x388] sm:$0xf]  ;;  %v6422_v19 = vld [vmem:[#allocation8 + $0x14] sm:$0xf0] }
 0x103   :  { %2463 = vmatpush.bf16.msra.mxu3 %v5482_v32  ;;  %v5150_v32 = vor.u32 %v6502_v26, %v5149_v24  ;;  %v5278_v38 = vor.u32 %v6534_v28, %v5277_v27  ;;  %v6454_v23 = vld [vmem:[#allocation8 + $0x114] sm:$0xf0]  ;;  %v5085_v24 = vld [vmem:[#allocation8 + $0x208] sm:$0xf] }
 0x104   :  { %2425 = vmatpush.bf16.msra.mxu0 %v5082_v41  ;;  %v1259_v30 = vpop.f32.mrf.mxu0  ;;  %v6498_v41 = vld [vmem:[#allocation8 + $0x274] sm:$0xf0] }
 0x105   :  { %2438 = vmatpush.bf16.msra.mxu1 %v5210_v45  ;;  %v1272_v37 = vpop.f32.mrf.mxu1  ;;  %v4878_v45 = vor.u32 %v6434_v35, %v4877_v33  ;;  %v5134_v47 = vor.u32 %v6498_v41, %v5133_v40  ;;  %v6486_v28 = vld [vmem:[#allocation8 + $0x214] sm:$0xf0]  ;;  %v5581_v35 = vld [vmem:[#allocation8 + $0x5e8] sm:$0xf] }
 0x106   :  { %2451 = vmatpush.bf16.msra.mxu2 %v5338_v46  ;;  %v1273_v42 = vadd.f32 %v1272_v37, %v1259_v30  ;;  %v5006_v46 = vor.u32 %v6466_v39, %v5005_v36  ;;  %v6518_v30 = vld [vmem:[#allocation8 + $0x314] sm:$0xf0]  ;;  %v4943_v39 = vld [vmem:[#allocation8 + $0xf8] sm:$0xf0]  ;;  %v5086_v41 = vor.u32 %v6486_v28, %v5085_v24 }
 0x107   :  { %2464 = vmatpush.bf16.msra.mxu3 %v5466_v49  ;;  %2426 = vmatmul.bf16.vlgmr.msra.gmra.mxu0 %v7325_v13  ;;  %v6430_v49 = vld [vmem:[#allocation8 + $0x54] sm:$0xf0] }
 0x108   :  { %2470 = vmatpush.bf16.msrb.mxu0 %v4942_v50  ;;  %2439 = vmatmul.bf16.vlgmr.msra.gmra.mxu1 %v7329_v17  ;;  %v4989_v50 = vld [vmem:[#allocation8 + $0x148] sm:$0xf]  ;;  %v4862_v60 = vor.u32 %v6430_v49, %v4861_v48  ;;  %v6578_v33 = vld [vmem:[#allocation8 + $0x4f4] sm:$0xf0] }
 0x109   :  { %2483 = vmatpush.bf16.msrb.mxu1 %v5070_v51  ;;  %2452 = vmatmul.bf16.vlgmr.msra.gmra.mxu2 %v7337_v63  ;;  %v6610_v37 = vld [vmem:[#allocation8 + $0x5f4] sm:$0xf0]  ;;  %v5437_v48 = vld [vmem:[#allocation8 + $0x4c8] sm:$0xf] }
 0x10a   :  { %2496 = vmatpush.bf16.msrb.mxu2 %v5198_v52  ;;  %2465 = vmatmul.bf16.vlgmr.msra.gmra.mxu3 %v7339_v25  ;;  %v5262_v52 = vor.u32 %v6530_v44, %v5261_v43  ;;  %v5071_v43 = vld [vmem:[#allocation8 + $0x1f8] sm:$0xf0]  ;;  %v6574_v49 = vld [vmem:[#allocation8 + $0x4d4] sm:$0xf0] }
 0x10b   :  { %2509 = vmatpush.bf16.msrb.mxu3 %v5326_v56 }
 0x10c   :  { %2471 = vmatpush.bf16.msrb.mxu0 %v4926_v62  ;;  %v1285_v51 = vpop.f32.mrf.mxu2  ;;  %v1261_v62 = vpop.f32.mrf.mxu0 }
 0x10d   :  { %2484 = vmatpush.bf16.msrb.mxu1 %v5054_v18  ;;  %v1286_v56 = vadd.f32 %v1285_v51, %v1273_v42  ;;  %v1298_v57 = vpop.f32.mrf.mxu3  ;;  %v4990_v18 = vor.u32 %v6462_v53, %v4989_v50  ;;  %v6480_v42 = vld [vmem:[#allocation8 + $0x1ec] sm:$0xf]  ;;  %v5565_v50 = vld [vmem:[#allocation8 + $0x5c8] sm:$0xf]  ;;  %v6570_v62 = vld [vmem:[#allocation8 + $0x4b4] sm:$0xf0] }
 0x10e   :  { %2497 = vmatpush.bf16.msrb.mxu2 %v5182_v0  ;;  %v5118_v0 = vor.u32 %v6494_v55, %v5117_v54  ;;  %v5074_v51 = vor.u32 %v6480_v42, %v5071_v43  ;;  %v6444_v53 = vld [vmem:[#allocation8 + $0xcc] sm:$0xf]  ;;  %v4927_v54 = vld [vmem:[#allocation8 + $0xd8] sm:$0xf0] }
 0x10f   :  { %2510 = vmatpush.bf16.msrb.mxu3 %v5310_v3  ;;  %v7351_v61 = vadd.f32 %v1298_v57, %v1286_v56  ;;  %v1274_v3 = vpop.f32.mrf.mxu1  ;;  %v6476_v55 = vld [vmem:[#allocation8 + $0x1cc] sm:$0xf]  ;;  %v5055_v56 = vld [vmem:[#allocation8 + $0x1d8] sm:$0xf0]  ;;  %v5438_v57 = vor.u32 %v6574_v49, %v5437_v48  ;;  %v4930_v59 = vor.u32 %v6444_v53, %v4927_v54  ;;  %v6590_v48 = vld [vmem:[#allocation8 + $0x554] sm:$0xf0] }
 0x110   :  { %2472 = vmatpush.bf16.msrb.mxu0 %v4910_v12  ;;  %v6522_v12 = vld [vmem:[#allocation8 + $0x334] sm:$0xf0]  ;;  %v6472_v3 = vld [vmem:[#allocation8 + $0x1ac] sm:$0xf]  ;;  %v4991_v53 = vld [vmem:[#allocation8 + $0x158] sm:$0xf0] }
 0x111   :  { %2485 = vmatpush.bf16.msrb.mxu1 %v5038_v15  ;;  %v4846_v15 = vor.u32 %v6426_v8, %v4845_v1  ;;  %v5230_v27 = vor.u32 %v6522_v12, %v5229_v11  ;;  %v6602_v1 = vld [vmem:[#allocation8 + $0x5b4] sm:$0xf0]  ;;  %v6440_v8 = vld [vmem:[#allocation8 + $0xac] sm:$0xf]  ;;  %v5405_v11 = vld [vmem:[#allocation8 + $0x488] sm:$0xf] }
 0x112   :  { %2498 = vmatpush.bf16.msrb.mxu2 %v5166_v16  ;;  %v4829_v16 = vld [vmem:[#allocation8 + $0x8] sm:$0xf]  ;;  %v4914_v10 = vor.u32 %v6440_v8, %v4911_v9  ;;  %v6566_v12 = vld [vmem:[#allocation8 + $0x494] sm:$0xf0]  ;;  %v6428_v49 = vld [vmem:[#allocation8 + $0x4c] sm:$0xf] }
 0x113   :  { %2511 = vmatpush.bf16.msrb.mxu3 %v5294_v22  ;;  %v4957_v22 = vld [vmem:[#allocation8 + $0x108] sm:$0xf]  ;;  %v4830_v36 = vor.u32 %v6422_v19, %v4829_v16  ;;  %v6598_v19 = vld [vmem:[#allocation8 + $0x594] sm:$0xf0] }
 0x114   :  { %2473 = vmatpush.bf16.msrb.mxu0 %v4894_v29  ;;  %v1287_v26 = vpop.f32.mrf.mxu2  ;;  %v5213_v29 = vld [vmem:[#allocation8 + $0x308] sm:$0xf]  ;;  %v4958_v40 = vor.u32 %v6454_v23, %v4957_v22  ;;  %v6468_v22 = vld [vmem:[#allocation8 + $0x18c] sm:$0xf]  ;;  %v5023_v23 = vld [vmem:[#allocation8 + $0x198] sm:$0xf0] }
 0x115   :  { %2486 = vmatpush.bf16.msrb.mxu1 %v5022_v31  ;;  %v1300_v31 = vpop.f32.mrf.mxu3  ;;  %v5214_v44 = vor.u32 %v6518_v30, %v5213_v29  ;;  %v5406_v26 = vor.u32 %v6566_v12, %v5405_v11  ;;  %v5389_v30 = vld [vmem:[#allocation8 + $0x468] sm:$0xf]  ;;  %v6586_v9 = vld [vmem:[#allocation8 + $0x534] sm:$0xf0] }
 0x116   :  { %2499 = vmatpush.bf16.msrb.mxu2 %v5150_v32  ;;  %v5453_v32 = vld [vmem:[#allocation8 + $0x4e8] sm:$0xf]  ;;  %v6562_v31 = vld [vmem:[#allocation8 + $0x474] sm:$0xf0] }
 0x117   :  { %2512 = vmatpush.bf16.msrb.mxu3 %v5278_v38  ;;  %v6448_v38 = vld [vmem:[#allocation8 + $0xec] sm:$0xf]  ;;  %v5341_v11 = vld [vmem:[#allocation8 + $0x408] sm:$0xf]  ;;  %v6550_v12 = vld [vmem:[#allocation8 + $0x414] sm:$0xf0] }
 0x118   :  { %2474 = vmatpush.bf16.msrb.mxu0 %v4878_v45  ;;  %v5454_v45 = vor.u32 %v6578_v33, %v5453_v32  ;;  %v5517_v32 = vld [vmem:[#allocation8 + $0x568] sm:$0xf] }
 0x119   :  { %2487 = vmatpush.bf16.msrb.mxu1 %v5006_v46  ;;  %v5582_v46 = vor.u32 %v6610_v37, %v5581_v35  ;;  %v5026_v35 = vor.u32 %v6468_v22, %v5023_v23  ;;  %v6432_v37 = vld [vmem:[#allocation8 + $0x6c] sm:$0xf]  ;;  %v4831_v23 = vld [vmem:[#allocation8 + $0x18] sm:$0xf0] }
 0x11a   :  { %2500 = vmatpush.bf16.msrb.mxu2 %v5134_v47  ;;  %v4946_v47 = vor.u32 %v6448_v38, %v4943_v39  ;;  %v4879_v38 = vld [vmem:[#allocation8 + $0x78] sm:$0xf0]  ;;  %v6464_v39 = vld [vmem:[#allocation8 + $0x16c] sm:$0xf] }
 0x11b   :  { %2513 = vmatpush.bf16.msrb.mxu3 %v5262_v52  ;;  %v6606_v52 = vld [vmem:[#allocation8 + $0x5d4] sm:$0xf0]  ;;  %v4882_v43 = vor.u32 %v6432_v37, %v4879_v38 }
 0x11c   :  { %2475 = vmatpush.bf16.msrb.mxu0 %v4862_v60  ;;  %v5566_v58 = vor.u32 %v6606_v52, %v5565_v50  ;;  %v5421_v60 = vld [vmem:[#allocation8 + $0x4a8] sm:$0xf]  ;;  %v4863_v50 = vld [vmem:[#allocation8 + $0x58] sm:$0xf0]  ;;  %v6460_v52 = vld [vmem:[#allocation8 + $0x14c] sm:$0xf] }
 0x11d   :  { %2488 = vmatpush.bf16.msrb.mxu1 %v4990_v18  ;;  %v5549_v18 = vld [vmem:[#allocation8 + $0x5a8] sm:$0xf]  ;;  %v5422_v5 = vor.u32 %v6570_v62, %v5421_v60  ;;  %v4866_v60 = vor.u32 %v6428_v49, %v4863_v50  ;;  %v4994_v8 = vor.u32 %v6460_v52, %v4991_v53  ;;  %v5311_v49 = vld [vmem:[#allocation8 + $0x3d8] sm:$0xf0]  ;;  %v6572_v50 = vld [vmem:[#allocation8 + $0x4cc] sm:$0xf] }
 0x11e   :  { %2501 = vmatpush.bf16.msrb.mxu2 %v5118_v0  ;;  %v5058_v0 = vor.u32 %v6476_v55, %v5055_v56  ;;  %v5550_v6 = vor.u32 %v6602_v1, %v5549_v18  ;;  %v5357_v62 = vld [vmem:[#allocation8 + $0x428] sm:$0xf]  ;;  %v6554_v18 = vld [vmem:[#allocation8 + $0x434] sm:$0xf0]  ;;  %v6604_v52 = vld [vmem:[#allocation8 + $0x5cc] sm:$0xf] }
 0x11f   :  { %2514 = vmatpush.bf16.msrb.mxu3 %v5246_v4  ;;  %v5039_v4 = vld [vmem:[#allocation8 + $0x1b8] sm:$0xf0] }
 0x120   :  { %2476 = vmatpush.bf16.msrb.mxu0 %v4846_v15  ;;  %v5533_v15 = vld [vmem:[#allocation8 + $0x588] sm:$0xf]  ;;  %v5042_v16 = vor.u32 %v6472_v3, %v5039_v4  ;;  %v6424_v3 = vld [vmem:[#allocation8 + $0x2c] sm:$0xf]  ;;  %v4847_v4 = vld [vmem:[#allocation8 + $0x38] sm:$0xf0] }
 0x121   :  { %2489 = vmatpush.bf16.msrb.mxu1 %v4974_v20  ;;  %v6436_v20 = vld [vmem:[#allocation8 + $0x8c] sm:$0xf]  ;;  %v5534_v28 = vor.u32 %v6598_v19, %v5533_v15  ;;  %v5469_v19 = vld [vmem:[#allocation8 + $0x508] sm:$0xf]  ;;  %v5567_v53 = vld [vmem:[#allocation8 + $0x5d8] sm:$0xf0] }
 0x122   :  { %2502 = vmatpush.bf16.msrb.mxu2 %v5102_v21  ;;  %v4895_v21 = vld [vmem:[#allocation8 + $0x98] sm:$0xf0] }
 0x123   :  { %2515 = vmatpush.bf16.msrb.mxu3 %v5230_v27  ;;  %v4898_v29 = vor.u32 %v6436_v20, %v4895_v21  ;;  %v6582_v20 = vld [vmem:[#allocation8 + $0x514] sm:$0xf0]  ;;  %v6420_v21 = vld [vmem:[#allocation8 + $0xc] sm:$0xf] }
 0x124   :  { %2477 = vmatpush.bf16.msrb.mxu0 %v4830_v36  ;;  %v1311_v24 = vpop.f32.mrf.mxu0  ;;  %v6594_v36 = vld [vmem:[#allocation8 + $0x574] sm:$0xf0]  ;;  %v5470_v37 = vor.u32 %v6582_v20, %v5469_v19  ;;  %v4834_v38 = vor.u32 %v6420_v21, %v4831_v23  ;;  %v6596_v20 = vld [vmem:[#allocation8 + $0x58c] sm:$0xf]  ;;  %v5535_v21 = vld [vmem:[#allocation8 + $0x598] sm:$0xf0] }
 0x125   :  { %2490 = vmatpush.bf16.msrb.mxu1 %v4958_v40  ;;  %v1324_v27 = vpop.f32.mrf.mxu1  ;;  %v5007_v40 = vld [vmem:[#allocation8 + $0x178] sm:$0xf0]  ;;  %v5518_v42 = vor.u32 %v6594_v36, %v5517_v32  ;;  %v5342_v32 = vor.u32 %v6550_v12, %v5341_v11  ;;  %v6532_v11 = vld [vmem:[#allocation8 + $0x38c] sm:$0xf] }
 0x126   :  { %2503 = vmatpush.bf16.msrb.mxu2 %v5086_v41  ;;  %v1325_v33 = vadd.f32 %v1324_v27, %v1311_v24  ;;  %v5390_v41 = vor.u32 %v6562_v31, %v5389_v30  ;;  %v6452_v24 = vld [vmem:[#allocation8 + $0x10c] sm:$0xf]  ;;  %v5455_v36 = vld [vmem:[#allocation8 + $0x4f8] sm:$0xf0] }
 0x127   :  { %2516 = vmatpush.bf16.msrb.mxu3 %v5214_v44  ;;  %2478 = vmatmul.bf16.vlgmr.msrb.gmra.mxu0 %v7323_v7  ;;  %v5373_v44 = vld [vmem:[#allocation8 + $0x448] sm:$0xf]  ;;  %v6544_v30 = vld [vmem:[#allocation8 + $0x3ec] sm:$0xf] }
 0x128   :  { %2522 = vmatpush.bf16.msra.mxu0 %v5454_v45  ;;  %2491 = vmatmul.bf16.vlgmr.msrb.gmra.mxu1 %v7327_v14  ;;  %v6558_v45 = vld [vmem:[#allocation8 + $0x454] sm:$0xf0] }
 0x129   :  { %2535 = vmatpush.bf16.msra.mxu1 %v5582_v46  ;;  %2504 = vmatmul.bf16.vlgmr.msrb.gmra.mxu2 %v7325_v13  ;;  %v5501_v46 = vld [vmem:[#allocation8 + $0x548] sm:$0xf] }
 0x12a   :  { %2548 = vmatpush.bf16.msra.mxu2 %v4946_v47  ;;  %2517 = vmatmul.bf16.vlgmr.msrb.gmra.mxu3 %v7329_v17  ;;  %v5010_v47 = vor.u32 %v6464_v39, %v5007_v40  ;;  %v6608_v39 = vld [vmem:[#allocation8 + $0x5ec] sm:$0xf]  ;;  %v5583_v40 = vld [vmem:[#allocation8 + $0x5f8] sm:$0xf0] }
 0x12b   :  { %2561 = vmatpush.bf16.msra.mxu3 %v5074_v51 }
 0x12c   :  { %2523 = vmatpush.bf16.msra.mxu0 %v5438_v57  ;;  %v1337_v51 = vpop.f32.mrf.mxu2  ;;  %v1313_v55 = vpop.f32.mrf.mxu0  ;;  %v5374_v57 = vor.u32 %v6558_v45, %v5373_v44  ;;  %v6508_v45 = vld [vmem:[#allocation8 + $0x2cc] sm:$0xf] }
 0x12d   :  { %2536 = vmatpush.bf16.msra.mxu1 %v5566_v58  ;;  %v1338_v54 = vadd.f32 %v1337_v51, %v1325_v33  ;;  %v1350_v56 = vpop.f32.mrf.mxu3  ;;  %v1326_v58 = vpop.f32.mrf.mxu1  ;;  %v5327_v33 = vld [vmem:[#allocation8 + $0x3f8] sm:$0xf0] }
 0x12e   :  { %2549 = vmatpush.bf16.msra.mxu2 %v4930_v59  ;;  %v5502_v59 = vor.u32 %v6590_v48, %v5501_v46  ;;  %v5183_v46 = vld [vmem:[#allocation8 + $0x2d8] sm:$0xf0]  ;;  %v5586_v48 = vor.u32 %v6608_v39, %v5583_v40  ;;  %v6492_v40 = vld [vmem:[#allocation8 + $0x24c] sm:$0xf] }
 0x12f   :  { %2562 = vmatpush.bf16.msra.mxu3 %v5058_v0  ;;  %v5485_v0 = vld [vmem:[#allocation8 + $0x528] sm:$0xf]  ;;  %v7357_v1 = vadd.f32 %v1350_v56, %v1338_v54  ;;  %v5439_v51 = vld [vmem:[#allocation8 + $0x4d8] sm:$0xf0]  ;;  %v5186_v54 = vor.u32 %v6508_v45, %v5183_v46  ;;  %v6556_v46 = vld [vmem:[#allocation8 + $0x44c] sm:$0xf] }
 0x130   :  { %2524 = vmatpush.bf16.msra.mxu0 %v5422_v5  ;;  %v6456_v5 = vld [vmem:[#allocation8 + $0x12c] sm:$0xf]  ;;  %v5486_v15 = vor.u32 %v6586_v9, %v5485_v0  ;;  %v5442_v56 = vor.u32 %v6572_v50, %v5439_v51  ;;  %v5167_v58 = vld [vmem:[#allocation8 + $0x2b8] sm:$0xf0] }
 0x131   :  { %2537 = vmatpush.bf16.msra.mxu1 %v5550_v6  ;;  %v4975_v6 = vld [vmem:[#allocation8 + $0x138] sm:$0xf0]  ;;  %v6588_v50 = vld [vmem:[#allocation8 + $0x54c] sm:$0xf] }
 0x132   :  { %2550 = vmatpush.bf16.msra.mxu2 %v4914_v10  ;;  %v5358_v10 = vor.u32 %v6554_v18, %v5357_v62  ;;  %v4978_v22 = vor.u32 %v6456_v5, %v4975_v6  ;;  %v5295_v62 = vld [vmem:[#allocation8 + $0x3b8] sm:$0xf0]  ;;  %v6568_v18 = vld [vmem:[#allocation8 + $0x4ac] sm:$0xf] }
 0x133   :  { %2563 = vmatpush.bf16.msra.mxu3 %v5042_v16  ;;  %v4850_v16 = vor.u32 %v6424_v3, %v4847_v4  ;;  %v5423_v0 = vld [vmem:[#allocation8 + $0x4b8] sm:$0xf0]  ;;  %v6500_v6 = vld [vmem:[#allocation8 + $0x28c] sm:$0xf] }
 0x134   :  { %2525 = vmatpush.bf16.msra.mxu0 %v5406_v26  ;;  %v4959_v26 = vld [vmem:[#allocation8 + $0x118] sm:$0xf0]  ;;  %v1339_v27 = vpop.f32.mrf.mxu2  ;;  %v5426_v5 = vor.u32 %v6568_v18, %v5423_v0  ;;  %v6552_v0 = vld [vmem:[#allocation8 + $0x42c] sm:$0xf] }
 0x135   :  { %2538 = vmatpush.bf16.msra.mxu1 %v5534_v28  ;;  %v6512_v28 = vld [vmem:[#allocation8 + $0x2ec] sm:$0xf]  ;;  %v1352_v31 = vpop.f32.mrf.mxu3  ;;  %v5551_v9 = vld [vmem:[#allocation8 + $0x5b8] sm:$0xf0] }
 0x136   :  { %2551 = vmatpush.bf16.msra.mxu2 %v4898_v29  ;;  %v5199_v29 = vld [vmem:[#allocation8 + $0x2f8] sm:$0xf0]  ;;  %v6496_v27 = vld [vmem:[#allocation8 + $0x26c] sm:$0xf] }
 0x137   :  { %2564 = vmatpush.bf16.msra.mxu3 %v5026_v35  ;;  %v6576_v35 = vld [vmem:[#allocation8 + $0x4ec] sm:$0xf]  ;;  %v5247_v45 = vld [vmem:[#allocation8 + $0x358] sm:$0xf0] }
 0x138   :  { %2526 = vmatpush.bf16.msra.mxu0 %v5390_v41  ;;  %v4962_v41 = vor.u32 %v6452_v24, %v4959_v26  ;;  %v5458_v44 = vor.u32 %v6576_v35, %v5455_v36  ;;  %v5391_v35 = vld [vmem:[#allocation8 + $0x478] sm:$0xf0]  ;;  %v6592_v36 = vld [vmem:[#allocation8 + $0x56c] sm:$0xf] }
 0x139   :  { %2539 = vmatpush.bf16.msra.mxu1 %v5518_v42  ;;  %v5202_v42 = vor.u32 %v6512_v28, %v5199_v29  ;;  %v5135_v28 = vld [vmem:[#allocation8 + $0x278] sm:$0xf0]  ;;  %v6528_v29 = vld [vmem:[#allocation8 + $0x36c] sm:$0xf] }
 0x13a   :  { %2552 = vmatpush.bf16.msra.mxu2 %v4882_v43  ;;  %v5330_v43 = vor.u32 %v6544_v30, %v5327_v33  ;;  %v5538_v30 = vor.u32 %v6596_v20, %v5535_v21  ;;  %v6560_v33 = vld [vmem:[#allocation8 + $0x46c] sm:$0xf]  ;;  %v5503_v51 = vld [vmem:[#allocation8 + $0x558] sm:$0xf0] }
 0x13b   :  { %2565 = vmatpush.bf16.msra.mxu3 %v5010_v47  ;;  %v6540_v47 = vld [vmem:[#allocation8 + $0x3cc] sm:$0xf]  ;;  %v5394_v39 = vor.u32 %v6560_v33, %v5391_v35  ;;  %v5231_v18 = vld [vmem:[#allocation8 + $0x338] sm:$0xf0]  ;;  %v6085_v33 = vld [vmem:[#allocation11 + $0x3e0] sm:$0xf] }
 0x13c   :  { %2527 = vmatpush.bf16.msra.mxu0 %v5374_v57  ;;  %v5314_v55 = vor.u32 %v6540_v47, %v5311_v49  ;;  %v6504_v57 = vld [vmem:[#allocation8 + $0x2ac] sm:$0xf]  ;;  %v5375_v47 = vld [vmem:[#allocation8 + $0x458] sm:$0xf0]  ;;  %v6865_v35 = vld [vmem:[#allocation11 + $0x3ec] sm:$0xf0] }
 0x13d   :  { %2540 = vmatpush.bf16.msra.mxu1 %v5502_v59  ;;  %v6536_v59 = vld [vmem:[#allocation8 + $0x3ac] sm:$0xf]  ;;  %v5170_v3 = vor.u32 %v6504_v57, %v5167_v58  ;;  %v5378_v57 = vor.u32 %v6556_v46, %v5375_v47  ;;  %v5471_v21 = vld [vmem:[#allocation8 + $0x518] sm:$0xf0]  ;;  %v6069_v46 = vld [vmem:[#allocation11 + $0x3c0] sm:$0xf] }
 0x13e   :  { %2553 = vmatpush.bf16.msra.mxu2 %v4866_v60  ;;  %v5570_v60 = vor.u32 %v6604_v52, %v5567_v53  ;;  %v5298_v4 = vor.u32 %v6536_v59, %v5295_v62  ;;  %v6488_v58 = vld [vmem:[#allocation8 + $0x22c] sm:$0xf]  ;;  %v5103_v59 = vld [vmem:[#allocation8 + $0x238] sm:$0xf0]  ;;  %v5506_v62 = vor.u32 %v6588_v50, %v5503_v51  ;;  %v6861_v47 = vld [vmem:[#allocation11 + $0x3cc] sm:$0xf0] }
 0x13f   :  { %2566 = vmatpush.bf16.msra.mxu3 %v4994_v8  ;;  %v6600_v8 = vld [vmem:[#allocation8 + $0x5ac] sm:$0xf]  ;;  %v5669_v51 = vld [vmem:[#allocation11 + $0xa0] sm:$0xf] }
 0x140   :  { %2528 = vmatpush.bf16.msra.mxu0 %v5358_v10  ;;  %v5151_v10 = vld [vmem:[#allocation8 + $0x298] sm:$0xf0]  ;;  %v5554_v12 = vor.u32 %v6600_v8, %v5551_v9  ;;  %v6584_v9 = vld [vmem:[#allocation8 + $0x52c] sm:$0xf] }
 0x141   :  { %2541 = vmatpush.bf16.msra.mxu1 %v5486_v15  ;;  %v5279_v15 = vld [vmem:[#allocation8 + $0x398] sm:$0xf0]  ;;  %v6580_v20 = vld [vmem:[#allocation8 + $0x50c] sm:$0xf] }
 0x142   :  { %2554 = vmatpush.bf16.msra.mxu2 %v4850_v16  ;;  %v6564_v16 = vld [vmem:[#allocation8 + $0x48c] sm:$0xf]  ;;  %v5282_v24 = vor.u32 %v6532_v11, %v5279_v15  ;;  %v5359_v8 = vld [vmem:[#allocation8 + $0x438] sm:$0xf0] }
 0x143   :  { %2567 = vmatpush.bf16.msra.mxu3 %v4978_v22  ;;  %v5154_v22 = vor.u32 %v6500_v6, %v5151_v10  ;;  %v5087_v6 = vld [vmem:[#allocation8 + $0x218] sm:$0xf0]  ;;  %v5362_v11 = vor.u32 %v6552_v0, %v5359_v8  ;;  %v5653_v8 = vld [vmem:[#allocation11 + $0x80] sm:$0xf] }
 0x144   :  { %2529 = vmatpush.bf16.msra.mxu0 %v5342_v32  ;;  %v2323_v19 = vpop.f32.mrf.mxu0  ;;  %v5263_v32 = vld [vmem:[#allocation8 + $0x378] sm:$0xf0] }
 0x145   :  { %2542 = vmatpush.bf16.msra.mxu1 %v5470_v37  ;;  %v2336_v23 = vpop.f32.mrf.mxu1  ;;  %v5519_v37 = vld [vmem:[#allocation8 + $0x578] sm:$0xf0] }
 0x146   :  { %2555 = vmatpush.bf16.msra.mxu2 %v4834_v38  ;;  %v5138_v38 = vor.u32 %v6496_v27, %v5135_v28  ;;  %v5215_v15 = vld [vmem:[#allocation8 + $0x318] sm:$0xf0]  ;;  %v6801_v28 = vld [vmem:[#allocation11 + $0x1ec] sm:$0xf0] }
 0x147   :  { %2568 = vmatpush.bf16.msra.mxu3 %v4962_v41  ;;  %2530 = vmatmul.bf16.vlgmr.msra.gmra.mxu0 %v7337_v63  ;;  %v5119_v41 = vld [vmem:[#allocation8 + $0x258] sm:$0xf0] }
 0x148   :  { %2574 = vmatpush.bf16.msrb.mxu0 %v5202_v42  ;;  %2543 = vmatmul.bf16.vlgmr.msra.gmra.mxu1 %v7339_v25  ;;  %v6524_v42 = vld [vmem:[#allocation8 + $0x34c] sm:$0xf]  ;;  %v5122_v53 = vor.u32 %v6492_v40, %v5119_v41  ;;  %v6765_v40 = vld [vmem:[#allocation11 + $0xcc] sm:$0xf0]  ;;  %v5813_v41 = vld [vmem:[#allocation11 + $0x1c0] sm:$0xf] }
 0x149   :  { %2587 = vmatpush.bf16.msrb.mxu1 %v5330_v43  ;;  %2556 = vmatmul.bf16.vlgmr.msra.gmra.mxu2 %v7323_v7  ;;  %v5407_v7 = vld [vmem:[#allocation8 + $0x498] sm:$0xf0]  ;;  %v5522_v43 = vor.u32 %v6592_v36, %v5519_v37  ;;  %v5474_v36 = vor.u32 %v6580_v20, %v5471_v21  ;;  %v5765_v20 = vld [vmem:[#allocation11 + $0x160] sm:$0xf] }
 0x14a   :  { %2600 = vmatpush.bf16.msrb.mxu2 %v5458_v44  ;;  %2569 = vmatmul.bf16.vlgmr.msra.gmra.mxu3 %v7327_v14  ;;  %v2324_v14 = vadd.f32 %v2323_v19, %v7335_v34  ;;  %v5410_v26 = vor.u32 %v6564_v16, %v5407_v7  ;;  %v5266_v34 = vor.u32 %v6528_v29, %v5263_v32  ;;  %v6548_v16 = vld [vmem:[#allocation8 + $0x40c] sm:$0xf]  ;;  %v5343_v19 = vld [vmem:[#allocation8 + $0x418] sm:$0xf0]  ;;  %v5957_v29 = vld [vmem:[#allocation11 + $0x2e0] sm:$0xf] }
 0x14b   :  { %2613 = vmatpush.bf16.msrb.mxu3 %v5586_v48  ;;  %v5346_v32 = vor.u32 %v6548_v16, %v5343_v19  ;;  %v6753_v19 = vld [vmem:[#allocation11 + $0x6c] sm:$0xf0] }
 0x14c   :  { %2575 = vmatpush.bf16.msrb.mxu0 %v5186_v54  ;;  %v2337_v31 = vadd.f32 %v2336_v23, %v2324_v14  ;;  %v2349_v44 = vpop.f32.mrf.mxu2  ;;  %v2325_v52 = vpop.f32.mrf.mxu0  ;;  %v6769_v23 = vld [vmem:[#allocation11 + $0xec] sm:$0xf0] }
 0x14d   :  { %2588 = vmatpush.bf16.msrb.mxu1 %v5314_v55  ;;  %v2362_v49 = vpop.f32.mrf.mxu3  ;;  %v2338_v54 = vpop.f32.mrf.mxu1  ;;  %v6761_v52 = vld [vmem:[#allocation11 + $0xac] sm:$0xf0] }
 0x14e   :  { %2601 = vmatpush.bf16.msrb.mxu2 %v5442_v56  ;;  %v2350_v48 = vadd.f32 %v2349_v44, %v2337_v31  ;;  %v5250_v56 = vor.u32 %v6524_v42, %v5247_v45  ;;  %v6086_v42 = vor.u32 %v6865_v35, %v6085_v33  ;;  %v5941_v44 = vld [vmem:[#allocation11 + $0x2c0] sm:$0xf]  ;;  %v6829_v45 = vld [vmem:[#allocation11 + $0x2cc] sm:$0xf0]  ;;  %v6070_v54 = vor.u32 %v6861_v47, %v6069_v46 }
 0x14f   :  { %2614 = vmatpush.bf16.msrb.mxu3 %v5570_v60  ;;  %v6520_v60 = vld [vmem:[#allocation8 + $0x32c] sm:$0xf]  ;;  %v5942_v50 = vor.u32 %v6829_v45, %v5941_v44 }
 0x150   :  { %2576 = vmatpush.bf16.msrb.mxu0 %v5170_v3  ;;  %v7364_v55 = vadd.f32 %v2362_v49, %v2350_v48  ;;  %v5487_v3 = vld [vmem:[#allocation8 + $0x538] sm:$0xf0]  ;;  %v5234_v10 = vor.u32 %v6520_v60, %v5231_v18  ;;  %v6857_v60 = vld [vmem:[#allocation11 + $0x3ac] sm:$0xf0] }
 0x151   :  { %2589 = vmatpush.bf16.msrb.mxu1 %v5298_v4  ;;  %v5106_v4 = vor.u32 %v6488_v58, %v5103_v59  ;;  %v5490_v7 = vor.u32 %v6584_v9, %v5487_v3  ;;  %v6825_v58 = vld [vmem:[#allocation11 + $0x2ac] sm:$0xf0]  ;;  %v6053_v59 = vld [vmem:[#allocation11 + $0x3a0] sm:$0xf] }
 0x152   :  { %2602 = vmatpush.bf16.msrb.mxu2 %v5426_v5  ;;  %v6484_v5 = vld [vmem:[#allocation8 + $0x20c] sm:$0xf]  ;;  %v5781_v9 = vld [vmem:[#allocation11 + $0x180] sm:$0xf]  ;;  %v6054_v3 = vor.u32 %v6857_v60, %v6053_v59  ;;  %v6741_v59 = vld [vmem:[#allocation11 + $0xc] sm:$0xf0] }
 0x153   :  { %2615 = vmatpush.bf16.msrb.mxu3 %v5554_v12  ;;  %v6516_v12 = vld [vmem:[#allocation8 + $0x30c] sm:$0xf]  ;;  %v5090_v27 = vor.u32 %v6484_v5, %v5087_v6  ;;  %v5909_v5 = vld [vmem:[#allocation11 + $0x280] sm:$0xf] }
 0x154   :  { %2577 = vmatpush.bf16.msrb.mxu0 %v5154_v22  ;;  %v2351_v14 = vpop.f32.mrf.mxu2  ;;  %v5701_v22 = vld [vmem:[#allocation11 + $0xe0] sm:$0xf]  ;;  %v5218_v31 = vor.u32 %v6516_v12, %v5215_v15 }
 0x155   :  { %2590 = vmatpush.bf16.msrb.mxu1 %v5282_v24  ;;  %v5829_v24 = vld [vmem:[#allocation11 + $0x1e0] sm:$0xf]  ;;  %v5702_v37 = vor.u32 %v6769_v23, %v5701_v22  ;;  %v6785_v22 = vld [vmem:[#allocation11 + $0x16c] sm:$0xf0] }
 0x156   :  { %2603 = vmatpush.bf16.msrb.mxu2 %v5410_v26  ;;  %v2364_v26 = vpop.f32.mrf.mxu3  ;;  %v5893_v23 = vld [vmem:[#allocation11 + $0x260] sm:$0xf] }
 0x157   :  { %2616 = vmatpush.bf16.msrb.mxu3 %v5538_v30  ;;  %v6833_v30 = vld [vmem:[#allocation11 + $0x2ec] sm:$0xf0]  ;;  %v6021_v26 = vld [vmem:[#allocation11 + $0x360] sm:$0xf] }
 0x158   :  { %2578 = vmatpush.bf16.msrb.mxu0 %v5138_v38  ;;  %v5830_v38 = vor.u32 %v6801_v28, %v5829_v24  ;;  %v6817_v24 = vld [vmem:[#allocation11 + $0x26c] sm:$0xf0]  ;;  %v5766_v28 = vor.u32 %v6785_v22, %v5765_v20  ;;  %v6087_v20 = vld [vmem:[#allocation11 + $0x3f0] sm:$0xf0] }
 0x159   :  { %2591 = vmatpush.bf16.msrb.mxu1 %v5266_v34  ;;  %v5958_v34 = vor.u32 %v6833_v30, %v5957_v29  ;;  %v5894_v29 = vor.u32 %v6817_v24, %v5893_v23  ;;  %v5621_v30 = vld [vmem:[#allocation11 + $0x40] sm:$0xf]  ;;  %v181_v24 = vld [vmem:[#allocation7 + $0x18] sm:$0xff] }
 0x15a   :  { %2604 = vmatpush.bf16.msrb.mxu2 %v5394_v39  ;;  %v5685_v39 = vld [vmem:[#allocation11 + $0xc0] sm:$0xf] }
 0x15b   :  { %2617 = vmatpush.bf16.msrb.mxu3 %v5522_v43  ;;  %v6797_v43 = vld [vmem:[#allocation11 + $0x1cc] sm:$0xf0]  ;;  %v5686_v48 = vor.u32 %v6765_v40, %v5685_v39  ;;  %v6005_v40 = vld [vmem:[#allocation11 + $0x340] sm:$0xf] }
 0x15c   :  { %2579 = vmatpush.bf16.msrb.mxu0 %v5122_v53  ;;  %v5814_v49 = vor.u32 %v6797_v43, %v5813_v41  ;;  %v5797_v53 = vld [vmem:[#allocation11 + $0x1a0] sm:$0xf]  ;;  %v6845_v41 = vld [vmem:[#allocation11 + $0x34c] sm:$0xf0] }
 0x15d   :  { %2592 = vmatpush.bf16.msrb.mxu1 %v5250_v56  ;;  %v6793_v56 = vld [vmem:[#allocation11 + $0x1ac] sm:$0xf0] }
 0x15e   :  { %2605 = vmatpush.bf16.msrb.mxu2 %v5378_v57  ;;  %v5925_v57 = vld [vmem:[#allocation11 + $0x2a0] sm:$0xf]  ;;  %v5798_v18 = vor.u32 %v6793_v56, %v5797_v53  ;;  %v6809_v53 = vld [vmem:[#allocation11 + $0x22c] sm:$0xf0] }
 0x15f   :  { %2618 = vmatpush.bf16.msrb.mxu3 %v5506_v62  ;;  %v5670_v62 = vor.u32 %v6761_v52, %v5669_v51  ;;  %v5926_v0 = vor.u32 %v6825_v58, %v5925_v57  ;;  %v6006_v51 = vor.u32 %v6845_v41, %v6005_v40  ;;  %v6777_v52 = vld [vmem:[#allocation11 + $0x12c] sm:$0xf0]  ;;  %v5589_v58 = vld [vmem:[#allocation11] sm:$0xf] }
 0x160   :  { %2580 = vmatpush.bf16.msrb.mxu0 %v5106_v4  ;;  %v6789_v4 = vld [vmem:[#allocation11 + $0x18c] sm:$0xf0] }
 0x161   :  { %2593 = vmatpush.bf16.msrb.mxu1 %v5234_v10  ;;  %v6853_v10 = vld [vmem:[#allocation11 + $0x38c] sm:$0xf0]  ;;  %v5782_v15 = vor.u32 %v6789_v4, %v5781_v9 }
 0x162   :  { %2606 = vmatpush.bf16.msrb.mxu2 %v5362_v11  ;;  %v6841_v56 = vld [vmem:[#allocation11 + $0x32c] sm:$0xf0] }
 0x163   :  { %2619 = vmatpush.bf16.msrb.mxu3 %v5490_v7  ;;  %v5637_v7 = vld [vmem:[#allocation11 + $0x60] sm:$0xf]  ;;  %v6805_v9 = vld [vmem:[#allocation11 + $0x20c] sm:$0xf0] }
 0x164   :  { %2581 = vmatpush.bf16.msrb.mxu0 %v5090_v27  ;;  %v2375_v6 = vpop.f32.mrf.mxu0  ;;  %v6849_v27 = vld [vmem:[#allocation11 + $0x36c] sm:$0xf0] }
 0x165   :  { %2594 = vmatpush.bf16.msrb.mxu1 %v5218_v31  ;;  %v2388_v12 = vpop.f32.mrf.mxu1  ;;  %v6749_v31 = vld [vmem:[#allocation11 + $0x4c] sm:$0xf0]  ;;  %v6022_v33 = vor.u32 %v6849_v27, %v6021_v26  ;;  %v6763_v26 = vld [vmem:[#allocation11 + $0xc4] sm:$0xf] }
 0x166   :  { %2607 = vmatpush.bf16.msrb.mxu2 %v5346_v32  ;;  %v5749_v32 = vld [vmem:[#allocation11 + $0x140] sm:$0xf]  ;;  %v5622_v43 = vor.u32 %v6749_v31, %v5621_v30  ;;  %v6837_v4 = vld [vmem:[#allocation11 + $0x30c] sm:$0xf0]  ;;  %v6795_v30 = vld [vmem:[#allocation11 + $0x1c4] sm:$0xf] }
 0x167   :  { %2620 = vmatpush.bf16.msrb.mxu3 %v5474_v36  ;;  %2582 = vmatmul.bf16.vlgmr.msrb.gmra.mxu0 %v7325_v13  ;;  %v6757_v13 = vld [vmem:[#allocation11 + $0x8c] sm:$0xf0]  ;;  %v178_v27 = vld [vmem:[#allocation7] sm:$0xff]  ;;  %v179_v31 = vld [vmem:[#allocation7 + $0x8] sm:$0xff] }
 0x168   :  { %3394 = vmatpush.bf16.msra.mxu0 %v5702_v37  ;;  %2595 = vmatmul.bf16.vlgmr.msrb.gmra.mxu1 %v7329_v17  ;;  %v6037_v17 = vld [vmem:[#allocation11 + $0x380] sm:$0xf]  ;;  %v5654_v11 = vor.u32 %v6757_v13, %v5653_v8  ;;  %v6781_v36 = vld [vmem:[#allocation11 + $0x14c] sm:$0xf0]  ;;  %v7380_v40 = vpack.c.bf16 %v178_v27, %v178_v27  ;;  %v6779_v27 = vld [vmem:[#allocation11 + $0x144] sm:$0xf] }
 0x169   :  { %3407 = vmatpush.bf16.msra.mxu1 %v5830_v38  ;;  %2608 = vmatmul.bf16.vlgmr.msrb.gmra.mxu2 %v7337_v63  ;;  %v6821_v63 = vld [vmem:[#allocation11 + $0x28c] sm:$0xf0]  ;;  %v6038_v21 = vor.u32 %v6853_v10, %v6037_v17  ;;  %v5877_v37 = vld [vmem:[#allocation11 + $0x240] sm:$0xf]  ;;  %v5750_v46 = vor.u32 %v6781_v36, %v5749_v32  ;;  %v6799_v17 = vld [vmem:[#allocation11 + $0x1e4] sm:$0xf] }
 0x16a   :  { %3420 = vmatpush.bf16.msra.mxu2 %v5958_v34  ;;  %2621 = vmatmul.bf16.vlgmr.msrb.gmra.mxu3 %v7339_v25  ;;  %v2376_v25 = vadd.f32 %v2375_v6, %v7364_v55  ;;  %v5910_v16 = vor.u32 %v6821_v63, %v5909_v5  ;;  %v5638_v55 = vor.u32 %v6753_v19, %v5637_v7  ;;  %v6813_v38 = vld [vmem:[#allocation11 + $0x24c] sm:$0xf0]  ;;  %v5845_v8 = vld [vmem:[#allocation11 + $0x200] sm:$0xf]  ;;  %v6767_v63 = vld [vmem:[#allocation11 + $0xe4] sm:$0xf] }
 0x16b   :  { %3433 = vmatpush.bf16.msra.mxu3 %v6086_v42  ;;  %v5878_v47 = vor.u32 %v6813_v38, %v5877_v37  ;;  %v5703_v6 = vld [vmem:[#allocation11 + $0xf0] sm:$0xf0]  ;;  %v5846_v7 = vor.u32 %v6805_v9, %v5845_v8  ;;  %v6863_v19 = vld [vmem:[#allocation11 + $0x3e4] sm:$0xf]  ;;  %v7378_v38 = vpack.c.bf16 %v181_v24, %v181_v24 }
 0x16c   :  { %3395 = vmatpush.bf16.msra.mxu0 %v5686_v48  ;;  %v7371_v14 = vadd.f32 %v2388_v12, %v2376_v25  ;;  %v2401_v35 = vpop.f32.mrf.mxu2  ;;  %v2377_v42 = vpop.f32.mrf.mxu0  ;;  %v5605_v48 = vld [vmem:[#allocation11 + $0x20] sm:$0xf]  ;;  %v5590_v25 = vor.u32 %v6741_v59, %v5589_v58  ;;  %v6831_v12 = vld [vmem:[#allocation11 + $0x2e4] sm:$0xf]  ;;  %v5706_v23 = vor.u32 %v6767_v63, %v5703_v6  ;;  %v6090_v32 = vor.u32 %v6863_v19, %v6087_v20  ;;  %v5943_v37 = vld [vmem:[#allocation11 + $0x2d0] sm:$0xf0] }
 0x16d   :  { %3408 = vmatpush.bf16.msra.mxu1 %v5814_v49  ;;  %v2402_v34 = vadd.f32 %v2401_v35, %v7345_v2  ;;  %v2414_v39 = vpop.f32.mrf.mxu3  ;;  %v2390_v44 = vpop.f32.mrf.mxu1  ;;  %v6745_v49 = vld [vmem:[#allocation11 + $0x2c] sm:$0xf0]  ;;  %v5861_v2 = vld [vmem:[#allocation11 + $0x220] sm:$0xf]  ;;  %v5815_v35 = vld [vmem:[#allocation11 + $0x1d0] sm:$0xf0]  ;;  %v7382_v42 = vpack.c.bf16 %v179_v31, %v179_v31 }
 0x16e   :  { %3421 = vmatpush.bf16.msra.mxu2 %v5942_v50  ;;  %v5733_v50 = vld [vmem:[#allocation11 + $0x120] sm:$0xf]  ;;  %v5606_v57 = vor.u32 %v6745_v49, %v5605_v48  ;;  %v6827_v36 = vld [vmem:[#allocation11 + $0x2c4] sm:$0xf]  ;;  %v5655_v59 = vld [vmem:[#allocation11 + $0x90] sm:$0xf0] }
 0x16f   :  { %3434 = vmatpush.bf16.msra.mxu3 %v6070_v54  ;;  %v7374_v45 = vadd.f32 %v2414_v39, %v2402_v34  ;;  %v5989_v54 = vld [vmem:[#allocation11 + $0x320] sm:$0xf]  ;;  %v5734_v60 = vor.u32 %v6777_v52, %v5733_v50  ;;  %v6859_v34 = vld [vmem:[#allocation11 + $0x3c4] sm:$0xf]  ;;  %v6071_v39 = vld [vmem:[#allocation11 + $0x3d0] sm:$0xf0]  ;;  %v5946_v44 = vor.u32 %v6827_v36, %v5943_v37 }
 0x170   :  { %3396 = vmatpush.bf16.msra.mxu0 %v5670_v62  ;;  %v5862_v62 = vor.u32 %v6809_v53, %v5861_v2  ;;  %v5990_v13 = vor.u32 %v6841_v56, %v5989_v54  ;;  %v6791_v48 = vld [vmem:[#allocation11 + $0x1a4] sm:$0xf]  ;;  %v6074_v49 = vor.u32 %v6859_v34, %v6071_v39  ;;  %v5799_v50 = vld [vmem:[#allocation11 + $0x1b0] sm:$0xf0] }
 0x171   :  { %3409 = vmatpush.bf16.msra.mxu1 %v5798_v18  ;;  %v5717_v18 = vld [vmem:[#allocation11 + $0x100] sm:$0xf]  ;;  %v5927_v52 = vld [vmem:[#allocation11 + $0x2b0] sm:$0xf0]  ;;  %v6855_v2 = vld [vmem:[#allocation11 + $0x3a4] sm:$0xf]  ;;  %v5802_v56 = vor.u32 %v6791_v48, %v5799_v50 }
 0x172   :  { %3422 = vmatpush.bf16.msra.mxu2 %v5926_v0  ;;  %v6773_v0 = vld [vmem:[#allocation11 + $0x10c] sm:$0xf0]  ;;  %v6055_v53 = vld [vmem:[#allocation11 + $0x3b0] sm:$0xf0]  ;;  %v6755_v58 = vld [vmem:[#allocation11 + $0x84] sm:$0xf] }
 0x173   :  { %3435 = vmatpush.bf16.msra.mxu3 %v6054_v3  ;;  %v5973_v3 = vld [vmem:[#allocation11 + $0x300] sm:$0xf]  ;;  %v5911_v8 = vld [vmem:[#allocation11 + $0x290] sm:$0xf0]  ;;  %v6851_v9 = vld [vmem:[#allocation11 + $0x384] sm:$0xf] }
 0x174   :  { %3397 = vmatpush.bf16.msra.mxu0 %v5654_v11  ;;  %v2403_v5 = vpop.f32.mrf.mxu2  ;;  %v5831_v11 = vld [vmem:[#allocation11 + $0x1f0] sm:$0xf0]  ;;  %v5974_v22 = vor.u32 %v6837_v4, %v5973_v3  ;;  %v6847_v20 = vld [vmem:[#allocation11 + $0x364] sm:$0xf] }
 0x175   :  { %3410 = vmatpush.bf16.msra.mxu1 %v5782_v15  ;;  %v2416_v10 = vpop.f32.mrf.mxu3  ;;  %v5959_v15 = vld [vmem:[#allocation11 + $0x2f0] sm:$0xf0]  ;;  %v5658_v5 = vor.u32 %v6755_v58, %v5655_v59  ;;  %v6747_v24 = vld [vmem:[#allocation11 + $0x44] sm:$0xf] }
 0x176   :  { %3423 = vmatpush.bf16.msra.mxu2 %v5910_v16  ;;  %v5718_v16 = vor.u32 %v6773_v0, %v5717_v18  ;;  %v5783_v18 = vld [vmem:[#allocation11 + $0x190] sm:$0xf0]  ;;  %v6819_v0 = vld [vmem:[#allocation11 + $0x284] sm:$0xf] }
 0x177   :  { %3436 = vmatpush.bf16.msra.mxu3 %v6038_v21  ;;  %v180_v21 = vld [vmem:[#allocation7 + $0x10] sm:$0xff]  ;;  %v6751_v10 = vld [vmem:[#allocation11 + $0x64] sm:$0xf] }
 0x178   :  { %3398 = vmatpush.bf16.msra.mxu0 %v5638_v55  ;;  %v5834_v55 = vor.u32 %v6799_v17, %v5831_v11  ;;  %v6039_v3 = vld [vmem:[#allocation11 + $0x390] sm:$0xf0]  ;;  %v5914_v17 = vor.u32 %v6819_v0, %v5911_v8  ;;  %v6783_v11 = vld [vmem:[#allocation11 + $0x164] sm:$0xf] }
 0x179   :  { %3411 = vmatpush.bf16.msra.mxu1 %v5766_v28  ;;  %v5962_v28 = vor.u32 %v6831_v12, %v5959_v15  ;;  %v6042_v12 = vor.u32 %v6851_v9, %v6039_v3  ;;  %v5895_v19 = vld [vmem:[#allocation11 + $0x270] sm:$0xf0]  ;;  %v6843_v36 = vld [vmem:[#allocation11 + $0x344] sm:$0xf] }
 0x17a   :  { %3424 = vmatpush.bf16.msra.mxu2 %v5894_v29  ;;  %v5687_v29 = vld [vmem:[#allocation11 + $0xd0] sm:$0xf0]  ;;  %v6803_v0 = vld [vmem:[#allocation11 + $0x204] sm:$0xf] }
 0x17b   :  { %3437 = vmatpush.bf16.msra.mxu3 %v6022_v33  ;;  %v7376_v33 = vpack.c.bf16 %v180_v21, %v180_v21  ;;  %v5690_v41 = vor.u32 %v6763_v26, %v5687_v29  ;;  %v6023_v21 = vld [vmem:[#allocation11 + $0x370] sm:$0xf0]  ;;  %v6835_v9 = vld [vmem:[#allocation11 + $0x304] sm:$0xf] }
 0x17c   :  { %3399 = vmatpush.bf16.msra.mxu0 %v5622_v43  ;;  %v5818_v43 = vor.u32 %v6795_v30, %v5815_v35  ;;  %v5623_v26 = vld [vmem:[#allocation11 + $0x50] sm:$0xf0]  ;;  %v6811_v30 = vld [vmem:[#allocation11 + $0x244] sm:$0xf] }
 0x17d   :  { %3412 = vmatpush.bf16.msra.mxu1 %v5750_v46  ;;  %v6759_v46 = vld [vmem:[#allocation11 + $0xa4] sm:$0xf]  ;;  %v5751_v29 = vld [vmem:[#allocation11 + $0x150] sm:$0xf0]  ;;  %v5626_v39 = vor.u32 %v6747_v24, %v5623_v26  ;;  %v6766_v24 = vld [vmem:[#allocation11 + $0xd4] sm:$0xf0] }
 0x17e   :  { %3425 = vmatpush.bf16.msra.mxu2 %v5878_v47  ;;  %v5671_v47 = vld [vmem:[#allocation11 + $0xb0] sm:$0xf0]  ;;  %v5821_v26 = vld [vmem:[#allocation11 + $0x1c8] sm:$0xf] }
 0x17f   :  { %3438 = vmatpush.bf16.msra.mxu3 %v6006_v51  ;;  %v6823_v51 = vld [vmem:[#allocation11 + $0x2a4] sm:$0xf]  ;;  %v5674_v54 = vor.u32 %v6759_v46, %v5671_v47  ;;  %v5879_v31 = vld [vmem:[#allocation11 + $0x250] sm:$0xf0] }
 0x180   :  { %3400 = vmatpush.bf16.msra.mxu0 %v5606_v57  ;;  %v5930_v57 = vor.u32 %v6823_v51, %v5927_v52  ;;  %v6007_v37 = vld [vmem:[#allocation11 + $0x350] sm:$0xf0]  ;;  %v5882_v46 = vor.u32 %v6811_v30, %v5879_v31  ;;  %v6743_v47 = vld [vmem:[#allocation11 + $0x24] sm:$0xf]  ;;  %v6077_v30 = vld [vmem:[#allocation11 + $0x3c8] sm:$0xf] }
 0x181   :  { %3413 = vmatpush.bf16.msra.mxu1 %v5734_v60  ;;  %v6787_v60 = vld [vmem:[#allocation11 + $0x184] sm:$0xf]  ;;  %v5607_v48 = vld [vmem:[#allocation11 + $0x30] sm:$0xf0]  ;;  %v6010_v50 = vor.u32 %v6843_v36, %v6007_v37  ;;  %v6862_v31 = vld [vmem:[#allocation11 + $0x3d4] sm:$0xf0] }
 0x182   :  { %3426 = vmatpush.bf16.msra.mxu2 %v5862_v62  ;;  %v6058_v62 = vor.u32 %v6855_v2, %v6055_v53  ;;  %v5786_v6 = vor.u32 %v6787_v60, %v5783_v18  ;;  %v5735_v51 = vld [vmem:[#allocation11 + $0x130] sm:$0xf0]  ;;  %v6807_v52 = vld [vmem:[#allocation11 + $0x224] sm:$0xf]  ;;  %v5677_v37 = vld [vmem:[#allocation11 + $0xa8] sm:$0xf] }
 0x183   :  { %3439 = vmatpush.bf16.msra.mxu3 %v5990_v13  ;;  %v5863_v2 = vld [vmem:[#allocation11 + $0x230] sm:$0xf0]  ;;  %v6839_v53 = vld [vmem:[#allocation11 + $0x324] sm:$0xf] }
 0x184   :  { %3401 = vmatpush.bf16.msra.mxu0 %v5590_v25  ;;  %v2427_v13 = vpop.f32.mrf.mxu0  ;;  %v5639_v25 = vld [vmem:[#allocation11 + $0x70] sm:$0xf0]  ;;  %v5866_v60 = vor.u32 %v6807_v52, %v5863_v2  ;;  %v5661_v2 = vld [vmem:[#allocation11 + $0x88] sm:$0xf] }
 0x185   :  { %3414 = vmatpush.bf16.msra.mxu1 %v5718_v16  ;;  %v2428_v4 = vadd.f32 %v2427_v13, %v7374_v45  ;;  %v2440_v63 = vpop.f32.mrf.mxu1  ;;  %v5767_v16 = vld [vmem:[#allocation11 + $0x170] sm:$0xf0] }
 0x186   :  { %3427 = vmatpush.bf16.msra.mxu2 %v5846_v7  ;;  %v6815_v7 = vld [vmem:[#allocation11 + $0x264] sm:$0xf]  ;;  %v5770_v45 = vor.u32 %v6783_v11, %v5767_v16  ;;  %v5591_v58 = vld [vmem:[#allocation11 + $0x10] sm:$0xf0]  ;;  %v5965_v11 = vld [vmem:[#allocation11 + $0x2e8] sm:$0xf] }
 0x187   :  { %3440 = vmatpush.bf16.msra.mxu3 %v5974_v22  ;;  %3402 = vmatmul.bf16.vlgmr.msra.gmra.mxu0 %v7380_v40  ;;  %v2441_v15 = vadd.f32 %v2440_v63, %v2428_v4  ;;  %v5642_v22 = vor.u32 %v6751_v10, %v5639_v25  ;;  %v5719_v18 = vld [vmem:[#allocation11 + $0x110] sm:$0xf0]  ;;  %v6770_v63 = vld [vmem:[#allocation11 + $0xf4] sm:$0xf0] }
 0x188   :  { %3446 = vmatpush.bf16.msrb.mxu0 %v5706_v23  ;;  %3415 = vmatmul.bf16.vlgmr.msra.gmra.mxu1 %v7382_v42  ;;  %v5898_v23 = vor.u32 %v6815_v7, %v5895_v19  ;;  %v5847_v13 = vld [vmem:[#allocation11 + $0x210] sm:$0xf0]  ;;  %v6802_v25 = vld [vmem:[#allocation11 + $0x1f4] sm:$0xf0]  ;;  %v6093_v7 = vld [vmem:[#allocation11 + $0x3e8] sm:$0xf] }
 0x189   :  { %3459 = vmatpush.bf16.msrb.mxu1 %v5834_v55  ;;  %3428 = vmatmul.bf16.vlgmr.msra.gmra.mxu2 %v7376_v33  ;;  %v6026_v55 = vor.u32 %v6847_v20, %v6023_v21  ;;  %v5975_v3 = vld [vmem:[#allocation11 + $0x310] sm:$0xf0]  ;;  %v5850_v16 = vor.u32 %v6803_v0, %v5847_v13  ;;  %v6866_v19 = vld [vmem:[#allocation11 + $0x3f4] sm:$0xf0] }
 0x18a   :  { %3472 = vmatpush.bf16.msrb.mxu2 %v5962_v28  ;;  %3441 = vmatmul.bf16.vlgmr.msra.gmra.mxu3 %v7378_v38  ;;  %v5978_v20 = vor.u32 %v6835_v9, %v5975_v3 }
 0x18b   :  { %3485 = vmatpush.bf16.msrb.mxu3 %v6090_v32 }
 0x18c   :  { %3447 = vmatpush.bf16.msrb.mxu0 %v5690_v41  ;;  %v2453_v28 = vpop.f32.mrf.mxu2  ;;  %v2429_v34 = vpop.f32.mrf.mxu0 }
 0x18d   :  { %3460 = vmatpush.bf16.msrb.mxu1 %v5818_v43  ;;  %v2454_v32 = vadd.f32 %v2453_v28, %v2441_v15  ;;  %v2466_v35 = vpop.f32.mrf.mxu3  ;;  %v2442_v41 = vpop.f32.mrf.mxu1  ;;  %v5949_v28 = vld [vmem:[#allocation11 + $0x2c8] sm:$0xf]  ;;  %v6762_v34 = vld [vmem:[#allocation11 + $0xb4] sm:$0xf0] }
 0x18e   :  { %3473 = vmatpush.bf16.msrb.mxu2 %v5946_v44  ;;  %v5754_v44 = vor.u32 %v6779_v27, %v5751_v29  ;;  %v6094_v27 = vor.u32 %v6866_v19, %v6093_v7  ;;  %v6830_v29 = vld [vmem:[#allocation11 + $0x2d4] sm:$0xf0]  ;;  %v6078_v41 = vor.u32 %v6862_v31, %v6077_v30  ;;  %v5629_v19 = vld [vmem:[#allocation11 + $0x48] sm:$0xf] }
 0x18f   :  { %3486 = vmatpush.bf16.msrb.mxu3 %v6074_v49  ;;  %v7389_v43 = vadd.f32 %v2466_v35, %v2454_v32  ;;  %v6775_v49 = vld [vmem:[#allocation11 + $0x124] sm:$0xf]  ;;  %v5950_v36 = vor.u32 %v6830_v29, %v5949_v28  ;;  %v6013_v28 = vld [vmem:[#allocation11 + $0x348] sm:$0xf]  ;;  %v6846_v29 = vld [vmem:[#allocation11 + $0x354] sm:$0xf0] }
 0x190   :  { %3448 = vmatpush.bf16.msrb.mxu0 %v5674_v54  ;;  %v5991_v54 = vld [vmem:[#allocation11 + $0x330] sm:$0xf0]  ;;  %v5738_v59 = vor.u32 %v6775_v49, %v5735_v51  ;;  %v6858_v49 = vld [vmem:[#allocation11 + $0x3b4] sm:$0xf0] }
 0x191   :  { %3461 = vmatpush.bf16.msrb.mxu1 %v5802_v56  ;;  %v5610_v56 = vor.u32 %v6743_v47, %v5607_v48  ;;  %v5994_v8 = vor.u32 %v6839_v53, %v5991_v54  ;;  %v6826_v47 = vld [vmem:[#allocation11 + $0x2b4] sm:$0xf0]  ;;  %v6061_v48 = vld [vmem:[#allocation11 + $0x3a8] sm:$0xf] }
 0x192   :  { %3474 = vmatpush.bf16.msrb.mxu2 %v5930_v57  ;;  %v6739_v57 = vld [vmem:[#allocation11 + $0x4] sm:$0xf]  ;;  %v6758_v53 = vld [vmem:[#allocation11 + $0x94] sm:$0xf0]  ;;  %v5789_v54 = vld [vmem:[#allocation11 + $0x188] sm:$0xf] }
 0x193   :  { %3487 = vmatpush.bf16.msrb.mxu3 %v6058_v62  ;;  %v6771_v62 = vld [vmem:[#allocation11 + $0x104] sm:$0xf]  ;;  %v5594_v10 = vor.u32 %v6739_v57, %v5591_v58  ;;  %v6790_v57 = vld [vmem:[#allocation11 + $0x194] sm:$0xf0]  ;;  %v5917_v58 = vld [vmem:[#allocation11 + $0x288] sm:$0xf] }
 0x194   :  { %3449 = vmatpush.bf16.msrb.mxu0 %v5658_v5  ;;  %v2455_v4 = vpop.f32.mrf.mxu2  ;;  %v5709_v5 = vld [vmem:[#allocation11 + $0xe8] sm:$0xf]  ;;  %v5722_v15 = vor.u32 %v6771_v62, %v5719_v18  ;;  %v6854_v18 = vld [vmem:[#allocation11 + $0x394] sm:$0xf0]  ;;  %v5790_v9 = vor.u32 %v6790_v57, %v5789_v54 }
 0x195   :  { %3462 = vmatpush.bf16.msrb.mxu1 %v5786_v6  ;;  %v5837_v6 = vld [vmem:[#allocation11 + $0x1e8] sm:$0xf]  ;;  %v5710_v21 = vor.u32 %v6770_v63, %v5709_v5  ;;  %v6754_v5 = vld [vmem:[#allocation11 + $0x74] sm:$0xf0] }
 0x196   :  { %3475 = vmatpush.bf16.msrb.mxu2 %v5914_v17  ;;  %v2468_v17 = vpop.f32.mrf.mxu3  ;;  %v6045_v62 = vld [vmem:[#allocation11 + $0x388] sm:$0xf]  ;;  %v6774_v57 = vld [vmem:[#allocation11 + $0x114] sm:$0xf0] }
 0x197   :  { %3488 = vmatpush.bf16.msrb.mxu3 %v6042_v12  ;;  %v6834_v12 = vld [vmem:[#allocation11 + $0x2f4] sm:$0xf0]  ;;  %v5645_v4 = vld [vmem:[#allocation11 + $0x68] sm:$0xf] }
 0x198   :  { %3450 = vmatpush.bf16.msrb.mxu0 %v5642_v22  ;;  %v5838_v22 = vor.u32 %v6802_v25, %v5837_v6  ;;  %v5773_v63 = vld [vmem:[#allocation11 + $0x168] sm:$0xf]  ;;  %v6046_v6 = vor.u32 %v6854_v18, %v6045_v62  ;;  %v6838_v18 = vld [vmem:[#allocation11 + $0x314] sm:$0xf0] }
 0x199   :  { %3463 = vmatpush.bf16.msrb.mxu1 %v5770_v45  ;;  %v5966_v45 = vor.u32 %v6834_v12, %v5965_v11  ;;  %v5901_v25 = vld [vmem:[#allocation11 + $0x268] sm:$0xf]  ;;  %v6818_v11 = vld [vmem:[#allocation11 + $0x274] sm:$0xf0] }
 0x19a   :  { %3476 = vmatpush.bf16.msrb.mxu2 %v5898_v23  ;;  %v5693_v23 = vld [vmem:[#allocation11 + $0xc8] sm:$0xf]  ;;  %v5902_v7 = vor.u32 %v6818_v11, %v5901_v25  ;;  %v6864_v25 = vld [vmem:[#allocation11 + $0x3ec] sm:$0xf]  ;;  %v6095_v11 = vld [vmem:[#allocation11 + $0x3f8] sm:$0xf0] }
 0x19b   :  { %3489 = vmatpush.bf16.msrb.mxu3 %v6026_v55  ;;  %v6798_v55 = vld [vmem:[#allocation11 + $0x1d4] sm:$0xf0]  ;;  %v5694_v32 = vor.u32 %v6766_v24, %v5693_v23  ;;  %v6029_v12 = vld [vmem:[#allocation11 + $0x368] sm:$0xf] }
 0x19c   :  { %3451 = vmatpush.bf16.msrb.mxu0 %v5626_v39  ;;  %v5822_v35 = vor.u32 %v6798_v55, %v5821_v26  ;;  %v5805_v39 = vld [vmem:[#allocation11 + $0x1a8] sm:$0xf]  ;;  %v6782_v23 = vld [vmem:[#allocation11 + $0x154] sm:$0xf0] }
 0x19d   :  { %3464 = vmatpush.bf16.msrb.mxu1 %v5754_v44  ;;  %v6794_v44 = vld [vmem:[#allocation11 + $0x1b4] sm:$0xf0]  ;;  %v5885_v24 = vld [vmem:[#allocation11 + $0x248] sm:$0xf] }
 0x19e   :  { %3477 = vmatpush.bf16.msrb.mxu2 %v5882_v46  ;;  %v5933_v46 = vld [vmem:[#allocation11 + $0x2a8] sm:$0xf]  ;;  %v5806_v51 = vor.u32 %v6794_v44, %v5805_v39  ;;  %v6814_v26 = vld [vmem:[#allocation11 + $0x254] sm:$0xf0]  ;;  %v6014_v44 = vor.u32 %v6846_v29, %v6013_v28  ;;  %v6760_v29 = vld [vmem:[#allocation11 + $0xac] sm:$0xf] }
 0x19f   :  { %3490 = vmatpush.bf16.msrb.mxu3 %v6010_v50  ;;  %v5678_v50 = vor.u32 %v6762_v34, %v5677_v37  ;;  %v5934_v52 = vor.u32 %v6826_v47, %v5933_v46  ;;  %v5886_v37 = vor.u32 %v6814_v26, %v5885_v24  ;;  %v5613_v34 = vld [vmem:[#allocation11 + $0x28] sm:$0xf]  ;;  %v6746_v39 = vld [vmem:[#allocation11 + $0x34] sm:$0xf0]  ;;  %v6860_v24 = vld [vmem:[#allocation11 + $0x3cc] sm:$0xf] }
 0x1a0   :  { %3452 = vmatpush.bf16.msrb.mxu0 %v5610_v56  ;;  %v6062_v56 = vor.u32 %v6858_v49, %v6061_v48  ;;  %v6778_v46 = vld [vmem:[#allocation11 + $0x134] sm:$0xf0]  ;;  %v5869_v47 = vld [vmem:[#allocation11 + $0x228] sm:$0xf]  ;;  %v6079_v26 = vld [vmem:[#allocation11 + $0x3d8] sm:$0xf0] }
 0x1a1   :  { %3465 = vmatpush.bf16.msrb.mxu1 %v5738_v59  ;;  %v6822_v59 = vld [vmem:[#allocation11 + $0x294] sm:$0xf0]  ;;  %v5997_v49 = vld [vmem:[#allocation11 + $0x328] sm:$0xf] }
 0x1a2   :  { %3478 = vmatpush.bf16.msrb.mxu2 %v5866_v60  ;;  %v5918_v3 = vor.u32 %v6822_v59, %v5917_v58  ;;  %v6810_v48 = vld [vmem:[#allocation11 + $0x234] sm:$0xf0]  ;;  %v5853_v58 = vld [vmem:[#allocation11 + $0x208] sm:$0xf] }
 0x1a3   :  { %3491 = vmatpush.bf16.msrb.mxu3 %v5994_v8  ;;  %v5662_v8 = vor.u32 %v6758_v53, %v5661_v2  ;;  %v6742_v2 = vld [vmem:[#allocation11 + $0x14] sm:$0xf0]  ;;  %v5870_v54 = vor.u32 %v6810_v48, %v5869_v47  ;;  %v5981_v62 = vld [vmem:[#allocation11 + $0x308] sm:$0xf]  ;;  %v6756_v48 = vld [vmem:[#allocation11 + $0x8c] sm:$0xf] }
 0x1a4   :  { %3453 = vmatpush.bf16.msrb.mxu0 %v5594_v10  ;;  %v2479_v60 = vpop.f32.mrf.mxu0  ;;  %v6786_v10 = vld [vmem:[#allocation11 + $0x174] sm:$0xf0] }
 0x1a5   :  { %3466 = vmatpush.bf16.msrb.mxu1 %v5722_v15  ;;  %v2480_v0 = vadd.f32 %v2479_v60, %v7351_v61  ;;  %v2492_v13 = vpop.f32.mrf.mxu1  ;;  %v6850_v15 = vld [vmem:[#allocation11 + $0x374] sm:$0xf0]  ;;  %v5774_v61 = vor.u32 %v6786_v10, %v5773_v63  ;;  %v6832_v63 = vld [vmem:[#allocation11 + $0x2ec] sm:$0xf] }
 0x1a6   :  { %3479 = vmatpush.bf16.msrb.mxu2 %v5850_v16  ;;  %v5646_v16 = vor.u32 %v6754_v5, %v5645_v4  ;;  %v6806_v60 = vld [vmem:[#allocation11 + $0x214] sm:$0xf0]  ;;  %v5839_v5 = vld [vmem:[#allocation11 + $0x1f8] sm:$0xf0] }
 0x1a7   :  { %3492 = vmatpush.bf16.msrb.mxu3 %v5978_v20  ;;  %3454 = vmatmul.bf16.vlgmr.msrb.gmra.mxu0 %v7380_v40  ;;  %v2493_v17 = vadd.f32 %v2492_v13, %v2480_v0  ;;  %v6750_v20 = vld [vmem:[#allocation11 + $0x54] sm:$0xf0]  ;;  %v5711_v13 = vld [vmem:[#allocation11 + $0xf8] sm:$0xf0]  ;;  %v5854_v10 = vor.u32 %v6806_v60, %v5853_v58 }
 0x1a8   :  { %3498 = vmatpush.bf16.msra.mxu0 %v5710_v21  ;;  %3467 = vmatmul.bf16.vlgmr.msrb.gmra.mxu1 %v7382_v42  ;;  %v5757_v21 = vld [vmem:[#allocation11 + $0x148] sm:$0xf]  ;;  %v5630_v31 = vor.u32 %v6750_v20, %v5629_v19  ;;  %v5695_v19 = vld [vmem:[#allocation11 + $0xd8] sm:$0xf0]  ;;  %v6796_v20 = vld [vmem:[#allocation11 + $0x1cc] sm:$0xf] }
 0x1a9   :  { %3511 = vmatpush.bf16.msra.mxu1 %v5838_v22  ;;  %3480 = vmatmul.bf16.vlgmr.msrb.gmra.mxu2 %v7376_v33  ;;  %v6030_v22 = vor.u32 %v6850_v15, %v6029_v12  ;;  %v5982_v12 = vor.u32 %v6838_v18, %v5981_v62 }
 0x1aa   :  { %3524 = vmatpush.bf16.msra.mxu2 %v5966_v45  ;;  %3493 = vmatmul.bf16.vlgmr.msrb.gmra.mxu3 %v7378_v38 }
 0x1ab   :  { %3537 = vmatpush.bf16.msra.mxu3 %v6094_v27 }
 0x1ac   :  { %3499 = vmatpush.bf16.msra.mxu0 %v5694_v32  ;;  %v2505_v45 = vpop.f32.mrf.mxu2  ;;  %v2481_v30 = vpop.f32.mrf.mxu0 }
 0x1ad   :  { %3512 = vmatpush.bf16.msra.mxu1 %v5822_v35  ;;  %v2506_v27 = vadd.f32 %v2505_v45, %v2493_v17  ;;  %v2518_v55 = vpop.f32.mrf.mxu3  ;;  %v2494_v32 = vpop.f32.mrf.mxu1  ;;  %v6828_v45 = vld [vmem:[#allocation11 + $0x2cc] sm:$0xf]  ;;  %v5679_v30 = vld [vmem:[#allocation11 + $0xb8] sm:$0xf0] }
 0x1ae   :  { %3525 = vmatpush.bf16.msra.mxu2 %v5950_v36  ;;  %v5758_v36 = vor.u32 %v6782_v23, %v5757_v21  ;;  %v6098_v21 = vor.u32 %v6864_v25, %v6095_v11  ;;  %v5951_v23 = vld [vmem:[#allocation11 + $0x2d8] sm:$0xf0]  ;;  %v6082_v32 = vor.u32 %v6860_v24, %v6079_v26  ;;  %v6748_v11 = vld [vmem:[#allocation11 + $0x4c] sm:$0xf] }
 0x1af   :  { %3538 = vmatpush.bf16.msra.mxu3 %v6078_v41  ;;  %v7396_v35 = vadd.f32 %v2518_v55, %v2506_v27  ;;  %v5741_v41 = vld [vmem:[#allocation11 + $0x128] sm:$0xf]  ;;  %v5954_v28 = vor.u32 %v6828_v45, %v5951_v23  ;;  %v6844_v45 = vld [vmem:[#allocation11 + $0x34c] sm:$0xf]  ;;  %v6015_v23 = vld [vmem:[#allocation11 + $0x358] sm:$0xf0] }
 0x1b0   :  { %3500 = vmatpush.bf16.msra.mxu0 %v5678_v50  ;;  %v6842_v50 = vld [vmem:[#allocation11 + $0x334] sm:$0xf0]  ;;  %v5742_v53 = vor.u32 %v6778_v46, %v5741_v41  ;;  %v6063_v41 = vld [vmem:[#allocation11 + $0x3b8] sm:$0xf0] }
 0x1b1   :  { %3513 = vmatpush.bf16.msra.mxu1 %v5806_v51  ;;  %v5614_v51 = vor.u32 %v6746_v39, %v5613_v34  ;;  %v5998_v59 = vor.u32 %v6842_v50, %v5997_v49  ;;  %v5935_v34 = vld [vmem:[#allocation11 + $0x2b8] sm:$0xf0]  ;;  %v6856_v39 = vld [vmem:[#allocation11 + $0x3ac] sm:$0xf] }
 0x1b2   :  { %3526 = vmatpush.bf16.msra.mxu2 %v5934_v52  ;;  %v5597_v52 = vld [vmem:[#allocation11 + $0x8] sm:$0xf]  ;;  %v5663_v49 = vld [vmem:[#allocation11 + $0x98] sm:$0xf0]  ;;  %v6788_v50 = vld [vmem:[#allocation11 + $0x18c] sm:$0xf] }
 0x1b3   :  { %3539 = vmatpush.bf16.msra.mxu3 %v6062_v56  ;;  %v5725_v56 = vld [vmem:[#allocation11 + $0x108] sm:$0xf]  ;;  %v5598_v4 = vor.u32 %v6742_v2, %v5597_v52  ;;  %v5791_v52 = vld [vmem:[#allocation11 + $0x198] sm:$0xf0]  ;;  %v6820_v2 = vld [vmem:[#allocation11 + $0x28c] sm:$0xf] }
 0x1b4   :  { %3501 = vmatpush.bf16.msra.mxu0 %v5662_v8  ;;  %v2507_v0 = vpop.f32.mrf.mxu2  ;;  %v6768_v8 = vld [vmem:[#allocation11 + $0xec] sm:$0xf]  ;;  %v5726_v17 = vor.u32 %v6774_v57, %v5725_v56  ;;  %v6047_v57 = vld [vmem:[#allocation11 + $0x398] sm:$0xf0]  ;;  %v5794_v62 = vor.u32 %v6788_v50, %v5791_v52 }
 0x1b5   :  { %3514 = vmatpush.bf16.msra.mxu1 %v5790_v9  ;;  %v6800_v9 = vld [vmem:[#allocation11 + $0x1ec] sm:$0xf]  ;;  %v5714_v15 = vor.u32 %v6768_v8, %v5711_v13  ;;  %v5647_v8 = vld [vmem:[#allocation11 + $0x78] sm:$0xf0] }
 0x1b6   :  { %3527 = vmatpush.bf16.msra.mxu2 %v5918_v3  ;;  %v2520_v3 = vpop.f32.mrf.mxu3  ;;  %v6852_v56 = vld [vmem:[#allocation11 + $0x38c] sm:$0xf] }
 0x1b7   :  { %3540 = vmatpush.bf16.msra.mxu3 %v6046_v6  ;;  %v5967_v6 = vld [vmem:[#allocation11 + $0x2f8] sm:$0xf0]  ;;  %v6752_v0 = vld [vmem:[#allocation11 + $0x6c] sm:$0xf] }
 0x1b8   :  { %3502 = vmatpush.bf16.msra.mxu0 %v5646_v16  ;;  %v5842_v16 = vor.u32 %v6800_v9, %v5839_v5  ;;  %v6784_v13 = vld [vmem:[#allocation11 + $0x16c] sm:$0xf]  ;;  %v6050_v9 = vor.u32 %v6852_v56, %v6047_v57  ;;  %v5983_v57 = vld [vmem:[#allocation11 + $0x318] sm:$0xf0] }
 0x1b9   :  { %3515 = vmatpush.bf16.msra.mxu1 %v5774_v61  ;;  %v5970_v61 = vor.u32 %v6832_v63, %v5967_v6  ;;  %v6816_v5 = vld [vmem:[#allocation11 + $0x26c] sm:$0xf]  ;;  %v5903_v63 = vld [vmem:[#allocation11 + $0x278] sm:$0xf0] }
 0x1ba   :  { %3528 = vmatpush.bf16.msra.mxu2 %v5902_v7  ;;  %v6764_v7 = vld [vmem:[#allocation11 + $0xcc] sm:$0xf]  ;;  %v5906_v25 = vor.u32 %v6816_v5, %v5903_v63  ;;  %v6141_v63 = vld [vmem:[#allocation13 + $0x50] sm:$0xf] }
 0x1bb   :  { %3541 = vmatpush.bf16.msra.mxu3 %v6030_v22  ;;  %v5823_v22 = vld [vmem:[#allocation11 + $0x1d8] sm:$0xf0]  ;;  %v5698_v27 = vor.u32 %v6764_v7, %v5695_v19  ;;  %v6848_v6 = vld [vmem:[#allocation11 + $0x36c] sm:$0xf] }
 0x1bc   :  { %3503 = vmatpush.bf16.msra.mxu0 %v5630_v31  ;;  %v5826_v55 = vor.u32 %v6796_v20, %v5823_v22  ;;  %v6792_v31 = vld [vmem:[#allocation11 + $0x1ac] sm:$0xf]  ;;  %v5759_v7 = vld [vmem:[#allocation11 + $0x158] sm:$0xf0] }
 0x1bd   :  { %3516 = vmatpush.bf16.msra.mxu1 %v5758_v36  ;;  %v5807_v36 = vld [vmem:[#allocation11 + $0x1b8] sm:$0xf0]  ;;  %v6812_v19 = vld [vmem:[#allocation11 + $0x24c] sm:$0xf] }
 0x1be   :  { %3529 = vmatpush.bf16.msra.mxu2 %v5886_v37  ;;  %v6824_v37 = vld [vmem:[#allocation11 + $0x2ac] sm:$0xf]  ;;  %v5810_v46 = vor.u32 %v6792_v31, %v5807_v36  ;;  %v5887_v20 = vld [vmem:[#allocation11 + $0x258] sm:$0xf0]  ;;  %v6018_v36 = vor.u32 %v6844_v45, %v6015_v23  ;;  %v6896_v45 = vld [vmem:[#allocation13 + $0xe4] sm:$0xf0] }
 0x1bf   :  { %3542 = vmatpush.bf16.msra.mxu3 %v6014_v44  ;;  %v5682_v44 = vor.u32 %v6760_v29, %v5679_v30  ;;  %v5938_v47 = vor.u32 %v6824_v37, %v5935_v34  ;;  %v5890_v29 = vor.u32 %v6812_v19, %v5887_v20  ;;  %v6744_v30 = vld [vmem:[#allocation11 + $0x2c] sm:$0xf]  ;;  %v5615_v31 = vld [vmem:[#allocation11 + $0x38] sm:$0xf0] }
 0x1c0   :  { %3504 = vmatpush.bf16.msra.mxu0 %v5614_v51  ;;  %v6066_v51 = vor.u32 %v6856_v39, %v6063_v41  ;;  %v5743_v37 = vld [vmem:[#allocation11 + $0x138] sm:$0xf0]  ;;  %v6808_v34 = vld [vmem:[#allocation11 + $0x22c] sm:$0xf] }
 0x1c1   :  { %3517 = vmatpush.bf16.msra.mxu1 %v5742_v53  ;;  %v5919_v53 = vld [vmem:[#allocation11 + $0x298] sm:$0xf0]  ;;  %v6840_v39 = vld [vmem:[#allocation11 + $0x32c] sm:$0xf] }
 0x1c2   :  { %3530 = vmatpush.bf16.msra.mxu2 %v5870_v54  ;;  %v5922_v18 = vor.u32 %v6820_v2, %v5919_v53  ;;  %v5999_v41 = vld [vmem:[#allocation11 + $0x338] sm:$0xf0]  ;;  %v6772_v50 = vld [vmem:[#allocation11 + $0x10c] sm:$0xf] }
 0x1c3   :  { %3543 = vmatpush.bf16.msra.mxu3 %v5998_v59  ;;  %v5666_v59 = vor.u32 %v6756_v48, %v5663_v49  ;;  %v5599_v49 = vld [vmem:[#allocation11 + $0x18] sm:$0xf0]  ;;  %v6002_v52 = vor.u32 %v6840_v39, %v5999_v41  ;;  %v6804_v2 = vld [vmem:[#allocation11 + $0x20c] sm:$0xf]  ;;  %v6868_v39 = vld [vmem:[#allocation13 + $0x4] sm:$0xf0] }
 0x1c4   :  { %3505 = vmatpush.bf16.msra.mxu0 %v5598_v4  ;;  %v2531_v54 = vpop.f32.mrf.mxu0  ;;  %v5775_v4 = vld [vmem:[#allocation11 + $0x178] sm:$0xf0]  ;;  %v6881_v41 = vld [vmem:[#allocation13 + $0x74] sm:$0xf] }
 0x1c5   :  { %3518 = vmatpush.bf16.msra.mxu1 %v5726_v17  ;;  %v2532_v58 = vadd.f32 %v2531_v54, %v7396_v35  ;;  %v2544_v60 = vpop.f32.mrf.mxu1  ;;  %v6031_v17 = vld [vmem:[#allocation11 + $0x378] sm:$0xf0]  ;;  %v5650_v35 = vor.u32 %v6752_v0, %v5647_v8  ;;  %v6836_v54 = vld [vmem:[#allocation11 + $0x30c] sm:$0xf] }
 0x1c6   :  { %3531 = vmatpush.bf16.msra.mxu2 %v5854_v10  ;;  %v5778_v10 = vor.u32 %v6784_v13, %v5775_v4  ;;  %v5855_v53 = vld [vmem:[#allocation11 + $0x218] sm:$0xf0]  ;;  %v5986_v8 = vor.u32 %v6836_v54, %v5983_v57  ;;  %v6880_v4 = vld [vmem:[#allocation13 + $0x64] sm:$0xf0]  ;;  %v6879_v54 = vld [vmem:[#allocation13 + $0x64] sm:$0xf] }
 0x1c7   :  { %3544 = vmatpush.bf16.msra.mxu3 %v5982_v12  ;;  %3506 = vmatmul.bf16.vlgmr.msra.gmra.mxu0 %v7380_v40  ;;  %v7403_v3 = vadd.f32 %v2544_v60, %v2532_v58  ;;  %v5631_v12 = vld [vmem:[#allocation11 + $0x58] sm:$0xf0]  ;;  %v6882_v60 = vld [vmem:[#allocation13 + $0x74] sm:$0xf0]  ;;  %v5858_v0 = vor.u32 %v6804_v2, %v5855_v53  ;;  %v6151_v57 = vld [vmem:[#allocation13 + $0x68] sm:$0xf0] }
 0x1c8   :  { %3550 = vmatpush.bf16.msrb.mxu0 %v5714_v15  ;;  %3519 = vmatmul.bf16.vlgmr.msra.gmra.mxu1 %v7382_v42  ;;  %v6780_v15 = vld [vmem:[#allocation11 + $0x14c] sm:$0xf]  ;;  %v5634_v26 = vor.u32 %v6748_v11, %v5631_v12  ;;  %v6890_v2 = vld [vmem:[#allocation13 + $0xb4] sm:$0xf0] }
 0x1c9   :  { %3563 = vmatpush.bf16.msrb.mxu1 %v5842_v16  ;;  %3532 = vmatmul.bf16.vlgmr.msra.gmra.mxu2 %v7376_v33  ;;  %v6034_v16 = vor.u32 %v6848_v6, %v6031_v17  ;;  %v6878_v6 = vld [vmem:[#allocation13 + $0x54] sm:$0xf0] }
 0x1ca   :  { %3576 = vmatpush.bf16.msrb.mxu2 %v5970_v61  ;;  %3545 = vmatmul.bf16.vlgmr.msra.gmra.mxu3 %v7378_v38  ;;  %v6142_v17 = vor.u32 %v6878_v6, %v6141_v63  ;;  %v6135_v63 = vld [vmem:[#allocation13 + $0x48] sm:$0xf0]  ;;  %v6165_v6 = vld [vmem:[#allocation13 + $0x80] sm:$0xf] }
 0x1cb   :  { %3589 = vmatpush.bf16.msrb.mxu3 %v6098_v21 }
 0x1cc   :  { %3551 = vmatpush.bf16.msrb.mxu0 %v5698_v27  ;;  %v2557_v61 = vpop.f32.mrf.mxu2  ;;  %v2533_v24 = vpop.f32.mrf.mxu0 }
 0x1cd   :  { %3564 = vmatpush.bf16.msrb.mxu1 %v5826_v55  ;;  %v2558_v21 = vadd.f32 %v2557_v61, %v7357_v1  ;;  %v2570_v22 = vpop.f32.mrf.mxu3  ;;  %v2546_v27 = vpop.f32.mrf.mxu1  ;;  %v5871_v1 = vld [vmem:[#allocation11 + $0x238] sm:$0xf0]  ;;  %v6898_v61 = vld [vmem:[#allocation13 + $0xf4] sm:$0xf0] }
 0x1ce   :  { %3577 = vmatpush.bf16.msrb.mxu2 %v5954_v28  ;;  %v5762_v28 = vor.u32 %v6780_v15, %v5759_v7  ;;  %v5874_v48 = vor.u32 %v6808_v34, %v5871_v1  ;;  %v6874_v7 = vld [vmem:[#allocation13 + $0x34] sm:$0xf0]  ;;  %v6101_v1 = vld [vmem:[#allocation13] sm:$0xf] }
 0x1cf   :  { %3590 = vmatpush.bf16.msrb.mxu3 %v6082_v32  ;;  %v2571_v55 = vadd.f32 %v2570_v22, %v2558_v21  ;;  %v6776_v32 = vld [vmem:[#allocation11 + $0x12c] sm:$0xf]  ;;  %v6213_v22 = vld [vmem:[#allocation13 + $0xe0] sm:$0xf] }
 0x1d0   :  { %3552 = vmatpush.bf16.msrb.mxu0 %v5682_v44  ;;  %v5618_v44 = vor.u32 %v6744_v30, %v5615_v31  ;;  %v6214_v27 = vor.u32 %v6896_v45, %v6213_v22  ;;  %v6109_v30 = vld [vmem:[#allocation13 + $0x10] sm:$0xf]  ;;  %v6870_v31 = vld [vmem:[#allocation13 + $0x14] sm:$0xf0]  ;;  %v6119_v22 = vld [vmem:[#allocation13 + $0x28] sm:$0xf0] }
 0x1d1   :  { %3565 = vmatpush.bf16.msrb.mxu1 %v5810_v46  ;;  %v6740_v46 = vld [vmem:[#allocation11 + $0xc] sm:$0xf]  ;;  %v6110_v34 = vor.u32 %v6870_v31, %v6109_v30 }
 0x1d2   :  { %3578 = vmatpush.bf16.msrb.mxu2 %v5938_v47  ;;  %v5746_v47 = vor.u32 %v6776_v32, %v5743_v37  ;;  %v6205_v32 = vld [vmem:[#allocation13 + $0xd0] sm:$0xf]  ;;  %v6215_v30 = vld [vmem:[#allocation13 + $0xe8] sm:$0xf0] }
 0x1d3   :  { %3591 = vmatpush.bf16.msrb.mxu3 %v6066_v51  ;;  %v5727_v51 = vld [vmem:[#allocation11 + $0x118] sm:$0xf0] }
 0x1d4   :  { %3553 = vmatpush.bf16.msrb.mxu0 %v5666_v59  ;;  %v2559_v56 = vpop.f32.mrf.mxu2  ;;  %v6157_v59 = vld [vmem:[#allocation13 + $0x70] sm:$0xf] }
 0x1d5   :  { %3566 = vmatpush.bf16.msrb.mxu1 %v5794_v62  ;;  %v2572_v58 = vpop.f32.mrf.mxu3  ;;  %v5602_v62 = vor.u32 %v6740_v46, %v5599_v49  ;;  %v6158_v13 = vor.u32 %v6882_v60, %v6157_v59  ;;  %v6159_v46 = vld [vmem:[#allocation13 + $0x78] sm:$0xf0]  ;;  %v6888_v59 = vld [vmem:[#allocation13 + $0xa4] sm:$0xf0]  ;;  %v6154_v60 = vor.u32 %v6879_v54, %v6151_v57  ;;  %v6103_v54 = vld [vmem:[#allocation13 + $0x8] sm:$0xf0] }
 0x1d6   :  { %3579 = vmatpush.bf16.msrb.mxu2 %v5922_v18  ;;  %v5730_v18 = vor.u32 %v6772_v50, %v5727_v51  ;;  %v6102_v51 = vor.u32 %v6868_v39, %v6101_v1  ;;  %v6162_v53 = vor.u32 %v6881_v41, %v6159_v46  ;;  %v6181_v58 = vld [vmem:[#allocation13 + $0xa0] sm:$0xf]  ;;  %v6869_v1 = vld [vmem:[#allocation13 + $0x14] sm:$0xf]  ;;  %v6111_v39 = vld [vmem:[#allocation13 + $0x18] sm:$0xf0] }
 0x1d7   :  { %3592 = vmatpush.bf16.msrb.mxu3 %v6050_v9  ;;  %v6149_v9 = vld [vmem:[#allocation13 + $0x60] sm:$0xf]  ;;  %v6910_v46 = vld [vmem:[#allocation13 + $0x154] sm:$0xf0] }
 0x1d8   :  { %3554 = vmatpush.bf16.msrb.mxu0 %v5650_v35  ;;  %v6150_v5 = vor.u32 %v6880_v4, %v6149_v9  ;;  %v6133_v35 = vld [vmem:[#allocation13 + $0x40] sm:$0xf]  ;;  %v6875_v4 = vld [vmem:[#allocation13 + $0x44] sm:$0xf] }
 0x1d9   :  { %3567 = vmatpush.bf16.msrb.mxu1 %v5778_v10  ;;  %v6876_v10 = vld [vmem:[#allocation13 + $0x44] sm:$0xf0]  ;;  %v6261_v57 = vld [vmem:[#allocation13 + $0x140] sm:$0xf] }
 0x1da   :  { %3580 = vmatpush.bf16.msrb.mxu2 %v5906_v25  ;;  %v6134_v15 = vor.u32 %v6876_v10, %v6133_v35  ;;  %v6138_v35 = vor.u32 %v6875_v4, %v6135_v63  ;;  %v6873_v10 = vld [vmem:[#allocation13 + $0x34] sm:$0xf]  ;;  %v6906_v4 = vld [vmem:[#allocation13 + $0x134] sm:$0xf0] }
 0x1db   :  { %3593 = vmatpush.bf16.msrb.mxu3 %v6034_v16  ;;  %v6221_v16 = vld [vmem:[#allocation13 + $0xf0] sm:$0xf] }
 0x1dc   :  { %3555 = vmatpush.bf16.msrb.mxu0 %v5634_v26  ;;  %v6222_v19 = vor.u32 %v6898_v61, %v6221_v16  ;;  %v6914_v16 = vld [vmem:[#allocation13 + $0x174] sm:$0xf0]  ;;  %v6897_v61 = vld [vmem:[#allocation13 + $0xf4] sm:$0xf] }
 0x1dd   :  { %3568 = vmatpush.bf16.msrb.mxu1 %v5762_v28 }
 0x1de   :  { %3581 = vmatpush.bf16.msrb.mxu2 %v5890_v29 }
 0x1df   :  { %3594 = vmatpush.bf16.msrb.mxu3 %v6018_v36  ;;  %v6894_v36 = vld [vmem:[#allocation13 + $0xd4] sm:$0xf0] }
 0x1e0   :  { %3556 = vmatpush.bf16.msrb.mxu0 %v5618_v44  ;;  %v6206_v37 = vor.u32 %v6894_v36, %v6205_v32 }
 0x1e1   :  { %3569 = vmatpush.bf16.msrb.mxu1 %v5746_v47  ;;  %v6197_v47 = vld [vmem:[#allocation13 + $0xc0] sm:$0xf] }
 0x1e2   :  { %3582 = vmatpush.bf16.msrb.mxu2 %v5874_v48  ;;  %v6892_v48 = vld [vmem:[#allocation13 + $0xc4] sm:$0xf0] }
 0x1e3   :  { %3595 = vmatpush.bf16.msrb.mxu3 %v6002_v52  ;;  %v6198_v50 = vor.u32 %v6892_v48, %v6197_v47  ;;  %v6189_v52 = vld [vmem:[#allocation13 + $0xb0] sm:$0xf]  ;;  %v6893_v47 = vld [vmem:[#allocation13 + $0xd4] sm:$0xf] }
 0x1e4   :  { %3557 = vmatpush.bf16.msrb.mxu0 %v5602_v62  ;;  %v2583_v25 = vpop.f32.mrf.mxu0  ;;  %v6190_v56 = vor.u32 %v6890_v2, %v6189_v52  ;;  %v6877_v62 = vld [vmem:[#allocation13 + $0x54] sm:$0xf] }
 0x1e5   :  { %3570 = vmatpush.bf16.msrb.mxu1 %v5730_v18  ;;  %v2584_v11 = vadd.f32 %v2583_v25, %v2571_v55  ;;  %v2596_v12 = vpop.f32.mrf.mxu1  ;;  %v6182_v18 = vor.u32 %v6888_v59, %v6181_v58  ;;  %v6127_v25 = vld [vmem:[#allocation13 + $0x38] sm:$0xf0]  ;;  %v6908_v58 = vld [vmem:[#allocation13 + $0x144] sm:$0xf0]  ;;  %v6891_v59 = vld [vmem:[#allocation13 + $0xc4] sm:$0xf] }
 0x1e6   :  { %3583 = vmatpush.bf16.msrb.mxu2 %v5858_v0  ;;  %v6143_v0 = vld [vmem:[#allocation13 + $0x58] sm:$0xf0] }
 0x1e7   :  { %3596 = vmatpush.bf16.msrb.mxu3 %v5986_v8  ;;  %3558 = vmatmul.bf16.vlgmr.msrb.gmra.mxu0 %v7380_v40  ;;  %v6125_v40 = vld [vmem:[#allocation13 + $0x30] sm:$0xf]  ;;  %v2597_v20 = vadd.f32 %v2596_v12, %v2584_v11  ;;  %v6146_v9 = vor.u32 %v6877_v62, %v6143_v0  ;;  %v6199_v0 = vld [vmem:[#allocation13 + $0xc8] sm:$0xf0] }
 0x1e8   :  { %4018 = vmatpush.bf16.msra.mxu0 %v6158_v13  ;;  %3571 = vmatmul.bf16.vlgmr.msrb.gmra.mxu1 %v7382_v42  ;;  %v6117_v42 = vld [vmem:[#allocation13 + $0x20] sm:$0xf]  ;;  %v6173_v8 = vld [vmem:[#allocation13 + $0x90] sm:$0xf]  ;;  %v6886_v13 = vld [vmem:[#allocation13 + $0x94] sm:$0xf0] }
 0x1e9   :  { %3584 = vmatmul.bf16.vlgmr.msrb.gmra.mxu2 %v7376_v33  ;;  %4031 = vmatpush.bf16.msra.mxu1 %v6222_v19  ;;  %v6126_v33 = vor.u32 %v6874_v7, %v6125_v40  ;;  %v6223_v19 = vld [vmem:[#allocation13 + $0xf8] sm:$0xf0] }
 0x1ea   :  { %3597 = vmatmul.bf16.vlgmr.msrb.gmra.mxu3 %v7378_v38  ;;  %v6872_v38 = vld [vmem:[#allocation13 + $0x24] sm:$0xf0] }
 0x1eb   :  { %v6118_v55 = vor.u32 %v6872_v38, %v6117_v42  ;;  %v6130_v42 = vor.u32 %v6873_v10, %v6127_v25  ;;  %v7415_v38 = vld [vmem:[%s7440_s6] sm:$0xf]  ;;  %v6887_v25 = vld [vmem:[#allocation13 + $0xa4] sm:$0xf] }
 0x1ec   :  { %4019 = vmatpush.bf16.msra.mxu0 %v6150_v5  ;;  %v2609_v21 = vpop.f32.mrf.mxu2  ;;  %v2585_v26 = vpop.f32.mrf.mxu0  ;;  %v6174_v5 = vor.u32 %v6886_v13, %v6173_v8  ;;  %v6202_v8 = vor.u32 %v6891_v59, %v6199_v0  ;;  %v6907_v0 = vld [vmem:[#allocation13 + $0x144] sm:$0xf] }
 0x1ed   :  { %v2610_v23 = vadd.f32 %v2609_v21, %v2597_v20  ;;  %v2622_v24 = vpop.f32.mrf.mxu3  ;;  %v2598_v28 = vpop.f32.mrf.mxu1  ;;  %4032 = vmatpush.bf16.msra.mxu1 %v6214_v27  ;;  %v6871_v21 = vld [vmem:[#allocation13 + $0x24] sm:$0xf] }
 0x1ee   :  { %v6895_v26 = vld [vmem:[#allocation13 + $0xe4] sm:$0xf]  ;;  %v6122_v31 = vor.u32 %v6871_v21, %v6119_v22  ;;  %v6167_v22 = vld [vmem:[#allocation13 + $0x88] sm:$0xf0] }
 0x1ef   :  { %v7410_v29 = vadd.f32 %v2622_v24, %v2610_v23  ;;  %v6277_v23 = vld [vmem:[#allocation13 + $0x160] sm:$0xf]  ;;  %v6912_v24 = vld [vmem:[#allocation13 + $0x164] sm:$0xf0]  ;;  %v6218_v32 = vor.u32 %v6895_v26, %v6215_v30  ;;  %v6883_v21 = vld [vmem:[#allocation13 + $0x84] sm:$0xf] }
 0x1f0   :  { %4020 = vmatpush.bf16.msra.mxu0 %v6142_v17  ;;  %v6884_v17 = vld [vmem:[#allocation13 + $0x84] sm:$0xf0]  ;;  %v6278_v28 = vor.u32 %v6912_v24, %v6277_v23  ;;  %v6170_v23 = vor.u32 %v6883_v21, %v6167_v22  ;;  %v6349_v26 = vld [vmem:[#allocation13 + $0x1f0] sm:$0xf]  ;;  %v6293_v22 = vld [vmem:[#allocation13 + $0x180] sm:$0xf] }
 0x1f1   :  { %4033 = vmatpush.bf16.msra.mxu1 %v6206_v37  ;;  %v6166_v11 = vor.u32 %v6884_v17, %v6165_v6  ;;  %v3608_v37 = vperm.slane %v7415_v38, 0  ;;  %v6191_v6 = vld [vmem:[#allocation13 + $0xb8] sm:$0xf0]  ;;  %v6245_v17 = vld [vmem:[#allocation13 + $0x120] sm:$0xf] }
 0x1f4   :  { %4021 = vmatpush.bf16.msra.mxu0 %v6134_v15  ;;  %v2611_v44 = vpop.f32.mrf.mxu2  ;;  %v6285_v15 = vld [vmem:[#allocation13 + $0x170] sm:$0xf] }
 0x1f5   :  { %v2624_v49 = vpop.f32.mrf.mxu3  ;;  %4034 = vmatpush.bf16.msra.mxu1 %v6198_v50  ;;  %v6286_v7 = vor.u32 %v6914_v16, %v6285_v15  ;;  %v6269_v44 = vld [vmem:[#allocation13 + $0x150] sm:$0xf]  ;;  %v6207_v50 = vld [vmem:[#allocation13 + $0xd8] sm:$0xf0] }
 0x1f6   :  { %v6270_v49 = vor.u32 %v6910_v46, %v6269_v44  ;;  %v6210_v52 = vor.u32 %v6893_v47, %v6207_v50  ;;  %v6237_v16 = vld [vmem:[#allocation13 + $0x110] sm:$0xf]  ;;  %v6279_v44 = vld [vmem:[#allocation13 + $0x168] sm:$0xf0]  ;;  %v3609_v50 = vperm.slane %v7415_v38, 1 }
 0x1f7   :  { %4044 = vmatpush.bf16.msra.mxu2 %v6286_v7  ;;  %v6175_v7 = vld [vmem:[#allocation13 + $0x98] sm:$0xf0] }
 0x1f8   :  { %4022 = vmatpush.bf16.msra.mxu0 %v6126_v33  ;;  %v6226_v33 = vor.u32 %v6897_v61, %v6223_v19  ;;  %v6902_v61 = vld [vmem:[#allocation13 + $0x114] sm:$0xf0] }
 0x1f9   :  { %4035 = vmatpush.bf16.msra.mxu1 %v6190_v56  ;;  %v6238_v19 = vor.u32 %v6902_v61, %v6237_v16  ;;  %v6247_v16 = vld [vmem:[#allocation13 + $0x128] sm:$0xf0] }
 0x1fb   :  { %4045 = vmatpush.bf16.msra.mxu2 %v6278_v28 }
 0x1fc   :  { %4023 = vmatpush.bf16.msra.mxu0 %v6118_v55 }
 0x1fd   :  { %4036 = vmatpush.bf16.msra.mxu1 %v6182_v18  ;;  %v6262_v18 = vor.u32 %v6908_v58, %v6261_v57  ;;  %v6271_v57 = vld [vmem:[#allocation13 + $0x158] sm:$0xf0] }
 0x1ff   :  { %4046 = vmatpush.bf16.msra.mxu2 %v6270_v49 }
 0x200   :  { %4024 = vmatpush.bf16.msra.mxu0 %v6110_v34 }
 0x201   :  { %4037 = vmatpush.bf16.msra.mxu1 %v6174_v5  ;;  %v6889_v5 = vld [vmem:[#allocation13 + $0xb4] sm:$0xf] }
 0x202   :  { %v6194_v10 = vor.u32 %v6889_v5, %v6191_v6  ;;  %v6317_v6 = vld [vmem:[#allocation13 + $0x1b0] sm:$0xf] }
 0x203   :  { %4047 = vmatpush.bf16.msra.mxu2 %v6262_v18  ;;  %v6924_v18 = vld [vmem:[#allocation13 + $0x1c4] sm:$0xf0] }
 0x204   :  { %4025 = vmatpush.bf16.msra.mxu0 %v6102_v51  ;;  %v3403_v12 = vpop.f32.mrf.mxu0  ;;  %v6114_v51 = vor.u32 %v6869_v1, %v6111_v39  ;;  %v6911_v1 = vld [vmem:[#allocation13 + $0x164] sm:$0xf] }
 0x205   :  { %v3416_v40 = vpop.f32.mrf.mxu1  ;;  %4038 = vmatpush.bf16.msra.mxu1 %v6166_v11  ;;  %v6183_v11 = vld [vmem:[#allocation13 + $0xa8] sm:$0xf0] }
 0x206   :  { %v3417_v20 = vadd.f32 %v3416_v40, %v3403_v12  ;;  %v6186_v15 = vor.u32 %v6887_v25, %v6183_v11  ;;  %v6885_v40 = vld [vmem:[#allocation13 + $0x94] sm:$0xf]  ;;  %v6309_v25 = vld [vmem:[#allocation13 + $0x1a0] sm:$0xf]  ;;  %v6920_v11 = vld [vmem:[#allocation13 + $0x1a4] sm:$0xf0] }
 0x207   :  { %v6310_v61 = vor.u32 %v6920_v11, %v6309_v25 }
 0x208   :  { %4070 = vmatpush.bf16.msrb.mxu0 %v6162_v53  ;;  %v6867_v53 = vld [vmem:[#allocation13 + $0x4] sm:$0xf] }
 0x209   :  { %4083 = vmatpush.bf16.msrb.mxu1 %v6226_v33  ;;  %v6229_v33 = vld [vmem:[#allocation13 + $0x100] sm:$0xf] }
 0x20c   :  { %4071 = vmatpush.bf16.msrb.mxu0 %v6154_v60  ;;  %v3429_v45 = vpop.f32.mrf.mxu2  ;;  %v3405_v34 = vpop.f32.mrf.mxu0 }
 0x20d   :  { %v3430_v27 = vadd.f32 %v3429_v45, %v3417_v20  ;;  %v3442_v55 = vpop.f32.mrf.mxu3  ;;  %v3418_v41 = vpop.f32.mrf.mxu1  ;;  %4084 = vmatpush.bf16.msrb.mxu1 %v6218_v32  ;;  %v6178_v20 = vor.u32 %v6885_v40, %v6175_v7  ;;  %v6928_v34 = vld [vmem:[#allocation13 + $0x1e4] sm:$0xf0]  ;;  %v6301_v7 = vld [vmem:[#allocation13 + $0x190] sm:$0xf] }
 0x20f   :  { %v3443_v36 = vadd.f32 %v3442_v55, %v3430_v27  ;;  %v6930_v27 = vld [vmem:[#allocation13 + $0x1f4] sm:$0xf0]  ;;  %v6913_v55 = vld [vmem:[#allocation13 + $0x174] sm:$0xf] }
 0x210   :  { %4072 = vmatpush.bf16.msrb.mxu0 %v6146_v9  ;;  %v6253_v9 = vld [vmem:[#allocation13 + $0x130] sm:$0xf]  ;;  %v6350_v30 = vor.u32 %v6930_v27, %v6349_v26  ;;  %v6231_v26 = vld [vmem:[#allocation13 + $0x108] sm:$0xf0]  ;;  %v6929_v27 = vld [vmem:[#allocation13 + $0x1f4] sm:$0xf] }
 0x211   :  { %v3602_v48 = vadd.f32 %v3443_v36, %v7371_v14  ;;  %4085 = vmatpush.bf16.msrb.mxu1 %v6210_v52  ;;  %v6106_v14 = vor.u32 %v6867_v53, %v6103_v54  ;;  %v6254_v63 = vor.u32 %v6906_v4, %v6253_v9  ;;  %v6333_v52 = vld [vmem:[#allocation13 + $0x1d0] sm:$0xf] }
 0x212   :  { %4057 = vmatpush.bf16.msra.mxu3 %v6350_v30 }
 0x213   :  { %v3616_v2 = vadd.f32 %v3608_v37, %v3602_v48  ;;  %4048 = vmatpush.bf16.msra.mxu2 %v6254_v63  ;;  %v6341_v37 = vld [vmem:[#allocation13 + $0x1e0] sm:$0xf]  ;;  %v6282_v48 = vor.u32 %v6911_v1, %v6279_v44 }
 0x214   :  { %4073 = vmatpush.bf16.msrb.mxu0 %v6138_v35  ;;  %v3431_v56 = vpop.f32.mrf.mxu2  ;;  %v6904_v35 = vld [vmem:[#allocation13 + $0x124] sm:$0xf0]  ;;  %v6342_v41 = vor.u32 %v6928_v34, %v6341_v37  ;;  %v6927_v37 = vld [vmem:[#allocation13 + $0x1e4] sm:$0xf]  ;;  %v6343_v34 = vld [vmem:[#allocation13 + $0x1e8] sm:$0xf0] }
 0x215   :  { %v3620_v60 = vmax.f32 %v3616_v2, 0.0  ;;  %v3444_v62 = vpop.f32.mrf.mxu3  ;;  %4086 = vmatpush.bf16.msrb.mxu1 %v6202_v8  ;;  %v6246_v12 = vor.u32 %v6904_v35, %v6245_v17  ;;  %v6926_v2 = vld [vmem:[#allocation13 + $0x1d4] sm:$0xf0]  ;;  %v6909_v56 = vld [vmem:[#allocation13 + $0x154] sm:$0xf]  ;;  %v6346_v1 = vor.u32 %v6927_v37, %v6343_v34 }
 0x216   :  { %4058 = vmatpush.bf16.msra.mxu3 %v6342_v41  ;;  %v6334_v54 = vor.u32 %v6926_v2, %v6333_v52  ;;  %v6274_v59 = vor.u32 %v6909_v56, %v6271_v57  ;;  %v6325_v62 = vld [vmem:[#allocation13 + $0x1c0] sm:$0xf]  ;;  %v6922_v17 = vld [vmem:[#allocation13 + $0x1b4] sm:$0xf0]  ;;  %v6905_v35 = vld [vmem:[#allocation13 + $0x134] sm:$0xf] }
 0x217   :  { %v3624_v13 = vpack.c.bf16 %v3620_v60, %v3620_v60  ;;  %4049 = vmatpush.bf16.msra.mxu2 %v6246_v12  ;;  %v6326_v8 = vor.u32 %v6924_v18, %v6325_v62  ;;  %v6921_v62 = vld [vmem:[#allocation13 + $0x1b4] sm:$0xf]  ;;  %v6319_v18 = vld [vmem:[#allocation13 + $0x1b8] sm:$0xf0] }
 0x218   :  { %4074 = vmatpush.bf16.msrb.mxu0 %v6130_v42  ;;  %v6900_v42 = vld [vmem:[#allocation13 + $0x104] sm:$0xf0]  ;;  %v6933_v37 = vld [vmem:[#allocation14 + $0x10] sm:$0xff] }
 0x219   :  { %4026 = vmatmul.bf16.vlgmr.msra.gmra.mxu0 %v3624_v13  ;;  %4087 = vmatpush.bf16.msrb.mxu1 %v6194_v10  ;;  %v6230_v45 = vor.u32 %v6900_v42, %v6229_v33  ;;  %v6255_v10 = vld [vmem:[#allocation13 + $0x138] sm:$0xf0]  ;;  %v6945_v34 = vld [vmem:[#allocation14 + $0x70] sm:$0xff] }
 0x21a   :  { %4059 = vmatpush.bf16.msra.mxu3 %v6334_v54  ;;  %v6258_v12 = vor.u32 %v6905_v35, %v6255_v10  ;;  %v6239_v33 = vld [vmem:[#allocation13 + $0x118] sm:$0xf0]  ;;  %v6327_v54 = vld [vmem:[#allocation13 + $0x1c8] sm:$0xf0] }
 0x21b   :  { %4050 = vmatpush.bf16.msra.mxu2 %v6238_v19  ;;  %v6918_v19 = vld [vmem:[#allocation13 + $0x194] sm:$0xf0] }
 0x21c   :  { %4075 = vmatpush.bf16.msrb.mxu0 %v6122_v31  ;;  %v6287_v31 = vld [vmem:[#allocation13 + $0x178] sm:$0xf0]  ;;  %v6302_v42 = vor.u32 %v6918_v19, %v6301_v7 }
 0x21d   :  { %4088 = vmatpush.bf16.msrb.mxu1 %v6186_v15  ;;  %v6290_v36 = vor.u32 %v6913_v55, %v6287_v31  ;;  %v6903_v15 = vld [vmem:[#allocation13 + $0x124] sm:$0xf]  ;;  %v6351_v55 = vld [vmem:[#allocation13 + $0x1f8] sm:$0xf0] }
 0x21e   :  { %4060 = vmatpush.bf16.msra.mxu3 %v6326_v8  ;;  %v6250_v40 = vor.u32 %v6903_v15, %v6247_v16  ;;  %v6354_v31 = vor.u32 %v6929_v27, %v6351_v55  ;;  %v6919_v8 = vld [vmem:[#allocation13 + $0x1a4] sm:$0xf]  ;;  %v6938_v27 = vld [vmem:[#allocation14 + $0x38] sm:$0xff] }
 0x21f   :  { %4051 = vmatpush.bf16.msra.mxu2 %v6230_v45  ;;  %v6916_v45 = vld [vmem:[#allocation13 + $0x184] sm:$0xf0] }
 0x220   :  { %4076 = vmatpush.bf16.msrb.mxu0 %v6114_v51 }
 0x221   :  { %4089 = vmatpush.bf16.msrb.mxu1 %v6178_v20  ;;  %v6901_v20 = vld [vmem:[#allocation13 + $0x114] sm:$0xf] }
 0x222   :  { %v6242_v21 = vor.u32 %v6901_v20, %v6239_v33 }
 0x223   :  { %4096 = vmatpush.bf16.msrb.mxu2 %v6290_v36 }
 0x224   :  { %4077 = vmatpush.bf16.msrb.mxu0 %v6106_v14  ;;  %v3455_v24 = vpop.f32.mrf.mxu0 }
 0x225   :  { %v3468_v28 = vpop.f32.mrf.mxu1  ;;  %4090 = vmatpush.bf16.msrb.mxu1 %v6170_v23  ;;  %v6899_v23 = vld [vmem:[#allocation13 + $0x104] sm:$0xf] }
 0x226   :  { %v3469_v32 = vadd.f32 %v3468_v28, %v3455_v24  ;;  %v6294_v24 = vor.u32 %v6916_v45, %v6293_v22  ;;  %v6234_v30 = vor.u32 %v6899_v23, %v6231_v26 }
 0x227   :  { %4097 = vmatpush.bf16.msrb.mxu2 %v6282_v48 }
 0x228   :  { %4258 = vmatpush.bf16.msra.mxu0 %v6938_v27 }
 0x229   :  { %4078 = vmatmul.bf16.vlgmr.msrb.gmra.mxu0 %v3624_v13  ;;  %v6263_v13 = vld [vmem:[#allocation13 + $0x148] sm:$0xf0] }
 0x22a   :  { %v6266_v5 = vor.u32 %v6907_v0, %v6263_v13  ;;  %v6311_v13 = vld [vmem:[#allocation13 + $0x1a8] sm:$0xf0] }
 0x22b   :  { %4098 = vmatpush.bf16.msrb.mxu2 %v6274_v59 }
 0x22c   :  { %v3481_v39 = vpop.f32.mrf.mxu2  ;;  %v3457_v51 = vpop.f32.mrf.mxu0 }
 0x22d   :  { %v3482_v46 = vadd.f32 %v3481_v39, %v3469_v32  ;;  %v3494_v47 = vpop.f32.mrf.mxu3  ;;  %v3470_v53 = vpop.f32.mrf.mxu1 }
 0x22e   :  { %v6923_v53 = vld [vmem:[#allocation13 + $0x1c4] sm:$0xf] }
 0x22f   :  { %v3495_v49 = vadd.f32 %v3494_v47, %v3482_v46  ;;  %4099 = vmatpush.bf16.msrb.mxu2 %v6266_v5  ;;  %v6925_v46 = vld [vmem:[#allocation13 + $0x1d4] sm:$0xf]  ;;  %v6335_v47 = vld [vmem:[#allocation13 + $0x1d8] sm:$0xf0]  ;;  %v6330_v57 = vor.u32 %v6923_v53, %v6327_v54 }
 0x230   :  { %v6338_v51 = vor.u32 %v6925_v46, %v6335_v47  ;;  %v6943_v46 = vld [vmem:[#allocation14 + $0x60] sm:$0xff]  ;;  %v6942_v47 = vld [vmem:[#allocation14 + $0x58] sm:$0xff] }
 0x231   :  { %v3603_v58 = vadd.f32 %v3495_v49, %v7389_v43  ;;  %v6318_v43 = vor.u32 %v6922_v17, %v6317_v6  ;;  %v3610_v49 = vperm.slane %v7415_v38, 2  ;;  %v6295_v6 = vld [vmem:[#allocation13 + $0x188] sm:$0xf0] }
 0x233   :  { %v3617_v60 = vadd.f32 %v3609_v50, %v3603_v58  ;;  %4061 = vmatpush.bf16.msra.mxu3 %v6318_v43  ;;  %4100 = vmatpush.bf16.msrb.mxu2 %v6258_v12 }
 0x234   :  { %v3483_v14 = vpop.f32.mrf.mxu2 }
 0x235   :  { %v3621_v9 = vmax.f32 %v3617_v60, 0.0  ;;  %v3496_v4 = vpop.f32.mrf.mxu3  ;;  %v6322_v14 = vor.u32 %v6921_v62, %v6319_v18 }
 0x236   :  { %v6917_v4 = vld [vmem:[#allocation13 + $0x194] sm:$0xf] }
 0x237   :  { %v3625_v63 = vpack.c.bf16 %v3621_v9, %v3621_v9  ;;  %4062 = vmatpush.bf16.msra.mxu3 %v6310_v61  ;;  %4101 = vmatpush.bf16.msrb.mxu2 %v6250_v40  ;;  %v6314_v9 = vor.u32 %v6919_v8, %v6311_v13  ;;  %v3611_v40 = vperm.slane %v7415_v38, 3  ;;  %v6936_v38 = vld [vmem:[#allocation14 + $0x28] sm:$0xff] }
 0x239   :  { %4039 = vmatmul.bf16.vlgmr.msra.gmra.mxu1 %v3625_v63 }
 0x23b   :  { %4063 = vmatpush.bf16.msra.mxu3 %v6302_v42  ;;  %4102 = vmatpush.bf16.msrb.mxu2 %v6242_v21 }
 0x23f   :  { %4064 = vmatpush.bf16.msra.mxu3 %v6294_v24  ;;  %4103 = vmatpush.bf16.msrb.mxu2 %v6234_v30 }
 0x243   :  { %4109 = vmatpush.bf16.msrb.mxu3 %v6354_v31  ;;  %v6946_v31 = vld [vmem:[#allocation14 + $0x78] sm:$0xff] }
 0x244   :  { %v3507_v28 = vpop.f32.mrf.mxu0  ;;  %4271 = vmatpush.bf16.msra.mxu1 %v6946_v31 }
 0x245   :  { %v3520_v32 = vpop.f32.mrf.mxu1 }
 0x246   :  { %v3521_v36 = vadd.f32 %v3520_v32, %v3507_v28  ;;  %v6937_v28 = vld [vmem:[#allocation14 + $0x30] sm:$0xff]  ;;  %v6934_v32 = vld [vmem:[#allocation14 + $0x18] sm:$0xff] }
 0x247   :  { %4110 = vmatpush.bf16.msrb.mxu3 %v6346_v1  ;;  %4259 = vmatpush.bf16.msra.mxu0 %v6937_v28  ;;  %v6932_v1 = vld [vmem:[#allocation14 + $0x8] sm:$0xff] }
 0x248   :  { %4272 = vmatpush.bf16.msra.mxu1 %v6945_v34 }
 0x249   :  { %4091 = vmatmul.bf16.vlgmr.msrb.gmra.mxu1 %v3625_v63  ;;  %v6915_v63 = vld [vmem:[#allocation13 + $0x184] sm:$0xf] }
 0x24a   :  { %v6298_v17 = vor.u32 %v6915_v63, %v6295_v6 }
 0x24b   :  { %4111 = vmatpush.bf16.msrb.mxu3 %v6338_v51  ;;  %4260 = vmatpush.bf16.msra.mxu0 %v6936_v38 }
 0x24c   :  { %v3533_v39 = vpop.f32.mrf.mxu2  ;;  %v3509_v50 = vpop.f32.mrf.mxu0 }
 0x24d   :  { %v3534_v41 = vadd.f32 %v3533_v39, %v3521_v36  ;;  %v3546_v44 = vpop.f32.mrf.mxu3  ;;  %v3522_v52 = vpop.f32.mrf.mxu1  ;;  %v6944_v39 = vld [vmem:[#allocation14 + $0x68] sm:$0xff] }
 0x24e   :  { %4273 = vmatpush.bf16.msra.mxu1 %v6944_v39  ;;  %v6940_v50 = vld [vmem:[#allocation14 + $0x48] sm:$0xff]  ;;  %v6939_v52 = vld [vmem:[#allocation14 + $0x40] sm:$0xff] }
 0x24f   :  { %v3547_v48 = vadd.f32 %v3546_v44, %v3534_v41  ;;  %4112 = vmatpush.bf16.msrb.mxu3 %v6330_v57  ;;  %v6931_v44 = vld [vmem:[#allocation14] sm:$0xff] }
 0x251   :  { %v3604_v2 = vadd.f32 %v3547_v48, %v7403_v3  ;;  %v6303_v3 = vld [vmem:[#allocation13 + $0x198] sm:$0xf0]  ;;  %v6941_v48 = vld [vmem:[#allocation14 + $0x50] sm:$0xff] }
 0x252   :  { %v6306_v5 = vor.u32 %v6917_v4, %v6303_v3  ;;  %4274 = vmatpush.bf16.msra.mxu1 %v6943_v46 }
 0x253   :  { %v3618_v56 = vadd.f32 %v3610_v49, %v3604_v2  ;;  %4113 = vmatpush.bf16.msrb.mxu3 %v6322_v14  ;;  %v3692_v2 = vld [vmem:[%s7442_s8] sm:$0x3] }
 0x254   :  { %v3535_v58 = vpop.f32.mrf.mxu2  ;;  %v3694_v53 = vperm.slane %v3692_v2, 0 }
 0x255   :  { %v3622_v59 = vmax.f32 %v3618_v56, 0.0  ;;  %v3548_v60 = vpop.f32.mrf.mxu3 }
 0x256   :  { %4275 = vmatpush.bf16.msra.mxu1 %v6942_v47 }
 0x257   :  { %v3626_v0 = vpack.c.bf16 %v3622_v59, %v3622_v59  ;;  %4114 = vmatpush.bf16.msrb.mxu3 %v6314_v9 }
 0x259   :  { %4052 = vmatmul.bf16.vlgmr.msra.gmra.mxu2 %v3626_v0 }
 0x25a   :  { %4276 = vmatpush.bf16.msra.mxu1 %v6941_v48 }
 0x25b   :  { %4115 = vmatpush.bf16.msrb.mxu3 %v6306_v5 }
 0x25e   :  { %4277 = vmatpush.bf16.msra.mxu1 %v6940_v50 }
 0x25f   :  { %4116 = vmatpush.bf16.msrb.mxu3 %v6298_v17 }
 0x262   :  { %4278 = vmatpush.bf16.msra.mxu1 %v6939_v52 }
 0x264   :  { %v3559_v35 = vpop.f32.mrf.mxu0 }
 0x265   :  { %v3572_v43 = vpop.f32.mrf.mxu1 }
 0x266   :  { %v3573_v10 = vadd.f32 %v3572_v43, %v3559_v35  ;;  %v6962_v43 = vld [vmem:[%s7444_s10] ss:$0 sm:$0xff] }
 0x269   :  { %4104 = vmatmul.bf16.vlgmr.msrb.gmra.mxu2 %v3626_v0  ;;  %v3695_v0 = vperm.slane %v3692_v2, 1 }
 0x26c   :  { %v3585_v25 = vpop.f32.mrf.mxu2  ;;  %v3561_v15 = vpop.f32.mrf.mxu0 }
 0x26d   :  { %v3586_v11 = vadd.f32 %v3585_v25, %v3573_v10  ;;  %v3598_v12 = vpop.f32.mrf.mxu3  ;;  %v3574_v16 = vpop.f32.mrf.mxu1 }
 0x26f   :  { %v3599_v61 = vadd.f32 %v3598_v12, %v3586_v11 }
 0x271   :  { %v3605_v7 = vadd.f32 %v3599_v61, %v7410_v29  ;;  %v6935_v29 = vld [vmem:[#allocation14 + $0x20] sm:$0xff] }
 0x272   :  { %4261 = vmatpush.bf16.msra.mxu0 %v6935_v29 }
 0x273   :  { %v3619_v19 = vadd.f32 %v3611_v40, %v3605_v7 }
 0x274   :  { %v3587_v20 = vpop.f32.mrf.mxu2 }
 0x275   :  { %v3623_v33 = vmax.f32 %v3619_v19, 0.0  ;;  %v3600_v42 = vpop.f32.mrf.mxu3 }
 0x276   :  { %4262 = vmatpush.bf16.msra.mxu0 %v6934_v32 }
 0x277   :  { %v3627_v21 = vpack.c.bf16 %v3623_v33, %v3623_v33 }
 0x279   :  { %4065 = vmatmul.bf16.vlgmr.msra.gmra.mxu3 %v3627_v21 }
 0x27a   :  { %4263 = vmatpush.bf16.msra.mxu0 %v6933_v37 }
 0x27e   :  { %4264 = vmatpush.bf16.msra.mxu0 %v6932_v1 }
 0x282   :  { %4265 = vmatpush.bf16.msra.mxu0 %v6931_v44 }
 0x289   :  { %4117 = vmatmul.bf16.vlgmr.msrb.gmra.mxu3 %v3627_v21 }
 0x296   :  { %v4027_v22 = vpop.f32.mrf.mxu0 }
 0x297   :  { %v4028_v56 = vadd.f32 %v4027_v22, %v3694_v53 }
 0x29e   :  { %v4029_v45 = vpop.f32.mrf.mxu0 }
 0x2a6   :  { %v4079_v23 = vpop.f32.mrf.mxu0 }
 0x2a7   :  { %v4080_v8 = vadd.f32 %v4079_v23, %v3695_v0 }
 0x2ae   :  { %v4081_v24 = vpop.f32.mrf.mxu0 }
 0x2b6   :  { %v4040_v26 = vpop.f32.mrf.mxu1 }
 0x2b7   :  { %v4041_v57 = vadd.f32 %v4040_v26, %v4028_v56 }
 0x2be   :  { %v4042_v55 = vpop.f32.mrf.mxu1 }
 0x2c6   :  { %v4092_v30 = vpop.f32.mrf.mxu1 }
 0x2c7   :  { %v4093_v13 = vadd.f32 %v4092_v30, %v4080_v8 }
 0x2ce   :  { %v4094_v36 = vpop.f32.mrf.mxu1 }
 0x2dc   :  { %v4053_v41 = vpop.f32.mrf.mxu2 }
 0x2dd   :  { %v4054_v58 = vadd.f32 %v4053_v41, %v4041_v57 }
 0x2e4   :  { %v4055_v49 = vpop.f32.mrf.mxu2 }
 0x2ec   :  { %v4105_v51 = vpop.f32.mrf.mxu2 }
 0x2ed   :  { %v4106_v9 = vadd.f32 %v4105_v51, %v4093_v13 }
 0x2f4   :  { %v4107_v54 = vpop.f32.mrf.mxu2 }
 0x2fc   :  { %v4066_v59 = vpop.f32.mrf.mxu3 }
 0x2fd   :  { %v4067_v60 = vadd.f32 %v4066_v59, %v4054_v58 }
 0x2ff   :  { %v4122_v62 = vmax.f32 %v4067_v60, 0.0 }
 0x301   :  { %v4124_v18 = vpack.c.bf16 %v4122_v62, %v4122_v62 }
 0x303   :  { %4266 = vmatmul.bf16.vlgmr.msra.gmra.mxu0 %v4124_v18 }
 0x304   :  { %v4068_v14 = vpop.f32.mrf.mxu3 }
 0x30c   :  { %v4118_v4 = vpop.f32.mrf.mxu3 }
 0x30d   :  { %v4119_v3 = vadd.f32 %v4118_v4, %v4106_v9 }
 0x30f   :  { %v4123_v5 = vmax.f32 %v4119_v3, 0.0 }
 0x311   :  { %v4125_v63 = vpack.c.bf16 %v4123_v5, %v4123_v5 }
 0x313   :  { %4279 = vmatmul.bf16.vlgmr.msra.gmra.mxu1 %v4125_v63 }
 0x314   :  { %v4120_v6 = vpop.f32.mrf.mxu3 }
 0x380   :  { %v4267_v17 = vpop.f32.mrf.mxu0 }
 0x381   :  { %v4268_v10 = vadd.f32 %v6962_v43, %v4267_v17 }
 0x388   :  { %v4269_v35 = vpop.f32.mrf.mxu0 }
 0x390   :  { %v4280_v25 = vpop.f32.mrf.mxu1 }
 0x391   :  { %v4281_v11 = vadd.f32 %v4280_v25, %v4268_v10 }
 0x393   :  { %v4284_v12 = vpack.c.bf16 %v4281_v11, %v4281_v11 }
 0x395   :  { %4285 = vst [vmem:[#allocation16] sm:$0xf] %v4284_v12 }
 0x396   :  { %4296 = dma.vmem_to_hbm [thread:$0]  %s4292_s20, 64, %s4294_s22, [#allocation4]  }
 0x398   :  { %v4282_v15 = vpop.f32.mrf.mxu1 }
 0x399   :  { %7189 = dma.done.wait [#allocation4], 64  }
 0x39a   :  { %7190 = vsyncadd [#allocation4], 4294967232 }
 0x39b   :  { %4301 = vsyncpa [#allocation3], 1 }
 0x39c   :  { %4302 = vsyncpa [#allocation6], 1 }
 0x39d   :  { %4303 = vsyncpa [#allocation9], 1 }
 0x39e   :  { %4304 = vsyncpa [#allocation12], 1 }
 0x39f   :  { %4305 = vsyncpa [#allocation15], 1 }
 0x3a0   :  { %4306 = vsyncpa [#allocation4], 1 }

</bundles_post_ra>
